<compile_context>
chip_gen: v6e
topology: v6e:2x2x1
jax: 0.10.0
libtpu: 0.0.40
codegen_flags: <defaults>
</compile_context>

<pallas_src>
import numpy as np
import jax
import jax.numpy as jnp
from jax.experimental import pallas as pl
from jax.experimental.pallas import tpu as pltpu

# ----------------------------- config (small) -----------------------------
VOCAB = 50
EMBED = 32
HIDDEN = 32
NUM_LAYERS = 2
BATCH = 2
SEQ = 8

BPAD = 8                  # batch padded to one full sublane tile
H = HIDDEN
H4 = 4 * HIDDEN
H8 = 8 * HIDDEN
LANES = 128               # packed-output lane width


# ----------------------------- Pallas kernel -----------------------------
def fused_bilstm_head_kernel(ids_ref, emb_ref,
                             wih0_ref, whh0_ref, b0_ref,
                             wih1_ref, whh1_ref, b1_ref,
                             awc_ref, ab_ref, cb_ref,
                             out_ref,
                             x_scr, h0_scr, h1_scr):
    """Embedding gather + 2 bidirectional LSTM layers + attention + classifier.

    Row layout for all (T*BPAD, ·) buffers: row t*BPAD + b holds timestep t of
    (padded) batch element b.  Weight layout per layer: [fwd | bwd] along the
    4H gate axis, PyTorch gate order (i, f, g, o); W_hh is block-diagonal over
    the two directions so one matmul serves both recurrences.
    """
    T, B = SEQ, BATCH

    # ---- fused embedding lookup (padding_idx=0 row is zero in the table) ----
    x_scr[...] = jnp.zeros((T * BPAD, EMBED), jnp.float32)   # pad-batch rows = 0
    for t in range(T):
        for b in range(B):
            tok = ids_ref[b, t]                              # SMEM scalar read
            x_scr[pl.ds(t * BPAD + b, 1), :] = emb_ref[pl.ds(tok, 1), :]

    def lstm_cell(gates, c):
        # gates: (BPAD, 4H) f32, PyTorch order (i, f, g, o)
        i = jax.nn.sigmoid(gates[:, 0 * H:1 * H])
        f = jax.nn.sigmoid(gates[:, 1 * H:2 * H])
        g = jnp.tanh(gates[:, 2 * H:3 * H])
        o = jax.nn.sigmoid(gates[:, 3 * H:4 * H])
        c_new = f * c + i * g
        h_new = o * jnp.tanh(c_new)
        return h_new, c_new

    def bilstm_layer(x_bf16, wih_ref_l, whh_ref_l, b_ref_l, out_scr):
        # Input projection for ALL timesteps & both directions: one MXU pass.
        gx = jnp.dot(x_bf16, wih_ref_l[...],
                     preferred_element_type=jnp.float32) + b_ref_l[...]  # (T*BPAD, 8H) f32
        whh = whh_ref_l[...]                     # (2H, 8H) bf16, block-diag [fwd | bwd]
        h_cat = jnp.zeros((BPAD, 2 * H), jnp.float32)
        c_f = jnp.zeros((BPAD, H), jnp.float32)
        c_b = jnp.zeros((BPAD, H), jnp.float32)
        # Fully unrolled (T static & small); fwd / bwd chains share one matmul/step.
        for t in range(T):
            tr = T - 1 - t                       # backward walks time in reverse
            gf = gx[t * BPAD:(t + 1) * BPAD, 0:H4]
            gb = gx[tr * BPAD:(tr + 1) * BPAD, H4:H8]
            if t > 0:                            # h == 0 at t == 0: skip the matmul
                gall = jnp.dot(h_cat.astype(jnp.bfloat16), whh,
                               preferred_element_type=jnp.float32)   # (BPAD, 8H)
                gf = gf + gall[:, 0:H4]
                gb = gb + gall[:, H4:H8]
            h_f, c_f = lstm_cell(gf, c_f)
            h_b, c_b = lstm_cell(gb, c_b)
            # Write straight into the layer-output scratch (no concat tail).
            out_scr[t * BPAD:(t + 1) * BPAD, 0:H] = h_f
            out_scr[tr * BPAD:(tr + 1) * BPAD, H:2 * H] = h_b
            h_cat = jnp.concatenate([h_f, h_b], axis=1)     # (BPAD, 2H) state

    # Layer 0 (embeddings) -> h0_scr, layer 1 (layer-0 output) -> h1_scr.
    bilstm_layer(x_scr[...].astype(jnp.bfloat16), wih0_ref, whh0_ref, b0_ref, h0_scr)
    bilstm_layer(h0_scr[...].astype(jnp.bfloat16), wih1_ref, whh1_ref, b1_ref, h1_scr)

    # Attention scores and classifier projection in ONE matmul:
    #   col 0 = att_w . h_t,  col 1 = cls_w . h_t   (logits folded in by linearity).
    sq = jnp.dot(h1_scr[...].astype(jnp.bfloat16), awc_ref[...],
                 preferred_element_type=jnp.float32)          # (T*BPAD, 2)
    s_col = sq[:, 0:1] + ab_ref[0]                            # attention logits
    q_col = sq[:, 1:2]                                        # per-step classifier proj
    # Gather timesteps onto lanes: (BPAD, T).
    s_bt = jnp.concatenate([s_col[t * BPAD:(t + 1) * BPAD, :] for t in range(T)], axis=1)
    q_bt = jnp.concatenate([q_col[t * BPAD:(t + 1) * BPAD, :] for t in range(T)], axis=1)

    m = jnp.max(s_bt, axis=1, keepdims=True)
    e = jnp.exp(s_bt - m)
    p_bt = e * pl.reciprocal(jnp.sum(e, axis=1, keepdims=True), approx=True)  # (BPAD, T)
    logits = jnp.sum(p_bt * q_bt, axis=1, keepdims=True) + cb_ref[0]          # (BPAD, 1)

    # Lane-dense packed output: lane 0 = logits, lanes 1..T = attention weights.
    out_ref[...] = jnp.concatenate(
        [logits, p_bt, jnp.zeros((BPAD, LANES - 1 - T), jnp.float32)], axis=1)


def run_fused(ids, kp):
    return pl.pallas_call(
        fused_bilstm_head_kernel,
        out_shape=jax.ShapeDtypeStruct((BPAD, LANES), jnp.float32),
        in_specs=[
            pl.BlockSpec(memory_space=pltpu.MemorySpace.SMEM),   # input_ids (B, T)
            pl.BlockSpec(memory_space=pltpu.MemorySpace.VMEM),   # embedding table
            pl.BlockSpec(memory_space=pltpu.MemorySpace.VMEM),   # wih0 (E, 8H) bf16
            pl.BlockSpec(memory_space=pltpu.MemorySpace.VMEM),   # whh0 (2H, 8H) bf16 blk-diag
            pl.BlockSpec(memory_space=pltpu.MemorySpace.VMEM),   # b0 (1, 8H) f32
            pl.BlockSpec(memory_space=pltpu.MemorySpace.VMEM),   # wih1 (2H, 8H) bf16
            pl.BlockSpec(memory_space=pltpu.MemorySpace.VMEM),   # whh1 (2H, 8H) bf16 blk-diag
            pl.BlockSpec(memory_space=pltpu.MemorySpace.VMEM),   # b1 (1, 8H) f32
            pl.BlockSpec(memory_space=pltpu.MemorySpace.VMEM),   # [att_w^T | cls_w^T] (2H, 2)
            pl.BlockSpec(memory_space=pltpu.MemorySpace.SMEM),   # attention bias (1,)
            pl.BlockSpec(memory_space=pltpu.MemorySpace.SMEM),   # classifier bias (1,)
        ],
        out_specs=pl.BlockSpec(memory_space=pltpu.MemorySpace.VMEM),
        scratch_shapes=[
            pltpu.VMEM((SEQ * BPAD, EMBED), jnp.float32),        # embedded input
            pltpu.VMEM((SEQ * BPAD, 2 * HIDDEN), jnp.float32),   # layer-0 output
            pltpu.VMEM((SEQ * BPAD, 2 * HIDDEN), jnp.float32),   # layer-1 output
        ],
    )(ids, kp["emb"], kp["wih0"], kp["whh0"], kp["b0"],
      kp["wih1"], kp["whh1"], kp["b1"], kp["awc"], kp["ab"], kp["cb"])


# ----------------------------- parameters -----------------------------
def _xavier(key, shape):
    fan_out, fan_in = shape[0], shape[1]
    lim = (6.0 / (fan_in + fan_out)) ** 0.5
    return jax.random.uniform(key, shape, jnp.float32, -lim, lim)


def make_params(key):
    """Canonical f32 parameters (mirrors the PyTorch module's structure)."""
    keys = iter(jax.random.split(key, 32))
    emb = _xavier(next(keys), (VOCAB, EMBED))
    emb = emb.at[0].set(0.0)  # padding_idx=0 row zeroed, as in the module

    lstm = []
    din = EMBED
    for _ in range(NUM_LAYERS):
        wih_parts, whh_parts, b_parts = [], [], []
        for _d in range(2):  # fwd, bwd
            w_ih = _xavier(next(keys), (4 * HIDDEN, din))
            # TODO(synk): PyTorch uses orthogonal init for weight_hh; a deterministic
            # xavier draw is used here (forward semantics are unaffected).
            w_hh = _xavier(next(keys), (4 * HIDDEN, HIDDEN))
            b_ih = jnp.zeros((4 * HIDDEN,), jnp.float32).at[HIDDEN:2 * HIDDEN].set(1.0)
            b_hh = jnp.zeros((4 * HIDDEN,), jnp.float32).at[HIDDEN:2 * HIDDEN].set(1.0)
            wih_parts.append(w_ih.T)
            whh_parts.append(w_hh.T)
            b_parts.append(b_ih + b_hh)
        lstm.append(dict(
            wihT=jnp.concatenate(wih_parts, axis=1),   # (din, 8H)  [fwd | bwd]
            whhT=jnp.concatenate(whh_parts, axis=1),   # (H, 8H)    [fwd | bwd]
            b=jnp.concatenate(b_parts)[None, :],       # (1, 8H)
        ))
        din = 2 * HIDDEN

    att_w = _xavier(next(keys), (1, 2 * HIDDEN))
    att_b = jnp.zeros((1,), jnp.float32)
    cls_w = _xavier(next(keys), (1, 2 * HIDDEN))
    cls_b = jnp.zeros((1,), jnp.float32)
    return dict(embedding=emb, lstm=lstm,
                att_w=att_w, att_b=att_b, cls_w=cls_w, cls_b=cls_b)


def pack_params(p):
    """One-time repack into the kernel layout (bf16 MXU operands, merged W_hh)."""
    def pack_layer(layer):
        wihT, whhT, b = layer["wihT"], layer["whhT"], layer["b"]
        whh_m = jnp.zeros((2 * HIDDEN, H8), jnp.float32)       # block-diag [fwd | bwd]
        whh_m = whh_m.at[:HIDDEN, :H4].set(whhT[:, :H4])
        whh_m = whh_m.at[HIDDEN:, H4:].set(whhT[:, H4:])
        return wihT.astype(jnp.bfloat16), whh_m.astype(jnp.bfloat16), b
    wih0, whh0, b0 = pack_layer(p["lstm"][0])
    wih1, whh1, b1 = pack_layer(p["lstm"][1])
    awc = jnp.concatenate([p["att_w"].T, p["cls_w"].T], axis=1).astype(jnp.bfloat16)
    return dict(emb=p["embedding"], wih0=wih0, whh0=whh0, b0=b0,
                wih1=wih1, whh1=whh1, b1=b1, awc=awc,
                ab=p["att_b"], cb=p["cls_b"])


# ----------------------------- forward -----------------------------
def forward(kernel_params, input_ids):
    B, T = input_ids.shape
    assert B <= BPAD and T == SEQ
    # TODO(synk): attention_mask / lengths (packed-sequence) paths not implemented
    # (None path only); dropout is identity in inference mode.
    out = run_fused(input_ids.astype(jnp.int32), kernel_params)
    logits = out[:B, 0:1]
    attw = out[:B, 1:1 + T][:, :, None]
    return logits, attw


# ----------------------------- pure-JAX f32 reference -----------------------------
def _ref_lstm_dir(x_btD, wihT, whhT, b):
    Hd = whhT.shape[0]

    def step(carry, x_t):
        h, c = carry
        gates = (x_t @ wihT + h @ whhT + b).astype(jnp.float32)
        i = jax.nn.sigmoid(gates[:, :Hd])
        f = jax.nn.sigmoid(gates[:, Hd:2 * Hd])
        g = jnp.tanh(gates[:, 2 * Hd:3 * Hd])
        o = jax.nn.sigmoid(gates[:, 3 * Hd:])
        c = f * c + i * g
        h = o * jnp.tanh(c)
        return (h, c), h

    Bsz = x_btD.shape[0]
    h0 = jnp.zeros((Bsz, Hd), jnp.float32)
    c0 = jnp.zeros((Bsz, Hd), jnp.float32)
    _, hs = jax.lax.scan(step, (h0, c0), jnp.transpose(x_btD, (1, 0, 2)))
    return jnp.transpose(hs, (1, 0, 2))


def ref_forward(params, input_ids):
    x = params["embedding"][input_ids]
    for l in range(NUM_LAYERS):
        layer = params["lstm"][l]
        wih, whh, b = layer["wihT"], layer["whhT"], layer["b"]
        hf = _ref_lstm_dir(x, wih[:, :H4], whh[:, :H4], b[0, :H4])
        hb = _ref_lstm_dir(x[:, ::-1], wih[:, H4:], whh[:, H4:], b[0, H4:])[:, ::-1]
        x = jnp.concatenate([hf, hb], axis=-1)
    scores = jnp.einsum("btd,d->bt", x, params["att_w"][0]) + params["att_b"][0]
    p = jax.nn.softmax(scores, axis=1)
    attended = jnp.einsum("bt,btd->bd", p, x)
    logits = attended @ params["cls_w"].T + params["cls_b"][0]
    return logits, p[:, :, None]


# ----------------------------- main -----------------------------
if __name__ == "__main__":
    key = jax.random.PRNGKey(0)
    k_param, k_ids = jax.random.split(key)
    params = make_params(k_param)
    kparams = pack_params(params)
    input_ids = jax.random.randint(k_ids, (BATCH, SEQ), 0, VOCAB, dtype=jnp.int32)

    logits, attw = forward(kparams, input_ids)
    logits = jax.block_until_ready(logits)
    attw = jax.block_until_ready(attw)

    ref_logits, ref_attw = ref_forward(params, input_ids)
    # Tolerance widened vs f32 reference because the kernel uses bf16 MXU inputs
    # (f32 accumulation) for the recurrent matmuls.
    np.testing.assert_allclose(np.asarray(logits), np.asarray(ref_logits),
                               rtol=2e-2, atol=2e-2)
    np.testing.assert_allclose(np.asarray(attw), np.asarray(ref_attw),
                               rtol=2e-2, atol=2e-2)

    assert logits.shape == (BATCH, 1)
    assert attw.shape == (BATCH, SEQ, 1)
    print("KERNEL_OK")
</pallas_src>

<mosaic_0001>
module attributes {stable_mosaic.version = 11 : i64} {
  func.func @fused_bilstm_head_kernel(%arg0: memref<2x8xi32, #tpu.memory_space<smem>>, %arg1: memref<50x32xf32, #tpu.memory_space<vmem>>, %arg2: memref<32x256xbf16, #tpu.memory_space<vmem>>, %arg3: memref<64x256xbf16, #tpu.memory_space<vmem>>, %arg4: memref<1x256xf32, #tpu.memory_space<vmem>>, %arg5: memref<64x256xbf16, #tpu.memory_space<vmem>>, %arg6: memref<64x256xbf16, #tpu.memory_space<vmem>>, %arg7: memref<1x256xf32, #tpu.memory_space<vmem>>, %arg8: memref<64x2xbf16, #tpu.memory_space<vmem>>, %arg9: memref<1xf32, #tpu.memory_space<smem>>, %arg10: memref<1xf32, #tpu.memory_space<smem>>, %arg11: memref<8x128xf32, #tpu.memory_space<vmem>>, %arg12: memref<64x32xf32, #tpu.memory_space<vmem>>, %arg13: memref<64x64xf32, #tpu.memory_space<vmem>>, %arg14: memref<64x64xf32, #tpu.memory_space<vmem>>) attributes {dimension_semantics = [], scalar_prefetch = 0 : i64, scratch_operands = 3 : i64, tpu.core_type = #tpu.core_type<tc>} {
    %cst = arith.constant 0.000000e+00 : f32
    %0 = vector.broadcast %cst : f32 to vector<64x32xf32>
    %c0 = arith.constant 0 : index
    %c0_0 = arith.constant 0 : index
    %1 = vector.load %arg12[%c0, %c0_0] : memref<64x32xf32, #tpu.memory_space<vmem>>, vector<64x32xf32>
    tpu.vector_store %arg12[%c0, %c0_0], %0 {strides = array<i32>} : memref<64x32xf32, #tpu.memory_space<vmem>>, vector<64x32xf32>,
    %c0_1 = arith.constant 0 : index
    %c0_2 = arith.constant 0 : index
    %2 = memref.load %arg0[%c0_1, %c0_2] : memref<2x8xi32, #tpu.memory_space<smem>>
    %3 = arith.index_cast %2 : i32 to index
    %c0_3 = arith.constant 0 : index
    %4 = vector.load %arg1[%3, %c0_3] : memref<50x32xf32, #tpu.memory_space<vmem>>, vector<1x32xf32>
    %c0_4 = arith.constant 0 : index
    %c0_5 = arith.constant 0 : index
    %5 = vector.load %arg12[%c0_4, %c0_5] : memref<64x32xf32, #tpu.memory_space<vmem>>, vector<1x32xf32>
    tpu.vector_store %arg12[%c0_4, %c0_5], %4 {strides = array<i32>} : memref<64x32xf32, #tpu.memory_space<vmem>>, vector<1x32xf32>,
    %c1 = arith.constant 1 : index
    %c0_6 = arith.constant 0 : index
    %6 = memref.load %arg0[%c1, %c0_6] : memref<2x8xi32, #tpu.memory_space<smem>>
    %7 = arith.index_cast %6 : i32 to index
    %c0_7 = arith.constant 0 : index
    %8 = vector.load %arg1[%7, %c0_7] : memref<50x32xf32, #tpu.memory_space<vmem>>, vector<1x32xf32>
    %c1_8 = arith.constant 1 : index
    %c0_9 = arith.constant 0 : index
    %9 = vector.load %arg12[%c1_8, %c0_9] : memref<64x32xf32, #tpu.memory_space<vmem>>, vector<1x32xf32>
    tpu.vector_store %arg12[%c1_8, %c0_9], %8 {strides = array<i32>} : memref<64x32xf32, #tpu.memory_space<vmem>>, vector<1x32xf32>,
    %c0_10 = arith.constant 0 : index
    %c1_11 = arith.constant 1 : index
    %10 = memref.load %arg0[%c0_10, %c1_11] : memref<2x8xi32, #tpu.memory_space<smem>>
    %11 = arith.index_cast %10 : i32 to index
    %c0_12 = arith.constant 0 : index
    %12 = vector.load %arg1[%11, %c0_12] : memref<50x32xf32, #tpu.memory_space<vmem>>, vector<1x32xf32>
    %c8 = arith.constant 8 : index
    %c0_13 = arith.constant 0 : index
    %13 = vector.load %arg12[%c8, %c0_13] : memref<64x32xf32, #tpu.memory_space<vmem>>, vector<1x32xf32>
    tpu.vector_store %arg12[%c8, %c0_13], %12 {strides = array<i32>} : memref<64x32xf32, #tpu.memory_space<vmem>>, vector<1x32xf32>,
    %c1_14 = arith.constant 1 : index
    %c1_15 = arith.constant 1 : index
    %14 = memref.load %arg0[%c1_14, %c1_15] : memref<2x8xi32, #tpu.memory_space<smem>>
    %15 = arith.index_cast %14 : i32 to index
    %c0_16 = arith.constant 0 : index
    %16 = vector.load %arg1[%15, %c0_16] : memref<50x32xf32, #tpu.memory_space<vmem>>, vector<1x32xf32>
    %c9 = arith.constant 9 : index
    %c0_17 = arith.constant 0 : index
    %17 = vector.load %arg12[%c9, %c0_17] : memref<64x32xf32, #tpu.memory_space<vmem>>, vector<1x32xf32>
    tpu.vector_store %arg12[%c9, %c0_17], %16 {strides = array<i32>} : memref<64x32xf32, #tpu.memory_space<vmem>>, vector<1x32xf32>,
    %c0_18 = arith.constant 0 : index
    %c2 = arith.constant 2 : index
    %18 = memref.load %arg0[%c0_18, %c2] : memref<2x8xi32, #tpu.memory_space<smem>>
    %19 = arith.index_cast %18 : i32 to index
    %c0_19 = arith.constant 0 : index
    %20 = vector.load %arg1[%19, %c0_19] : memref<50x32xf32, #tpu.memory_space<vmem>>, vector<1x32xf32>
    %c16 = arith.constant 16 : index
    %c0_20 = arith.constant 0 : index
    %21 = vector.load %arg12[%c16, %c0_20] : memref<64x32xf32, #tpu.memory_space<vmem>>, vector<1x32xf32>
    tpu.vector_store %arg12[%c16, %c0_20], %20 {strides = array<i32>} : memref<64x32xf32, #tpu.memory_space<vmem>>, vector<1x32xf32>,
    %c1_21 = arith.constant 1 : index
    %c2_22 = arith.constant 2 : index
    %22 = memref.load %arg0[%c1_21, %c2_22] : memref<2x8xi32, #tpu.memory_space<smem>>
    %23 = arith.index_cast %22 : i32 to index
    %c0_23 = arith.constant 0 : index
    %24 = vector.load %arg1[%23, %c0_23] : memref<50x32xf32, #tpu.memory_space<vmem>>, vector<1x32xf32>
    %c17 = arith.constant 17 : index
    %c0_24 = arith.constant 0 : index
    %25 = vector.load %arg12[%c17, %c0_24] : memref<64x32xf32, #tpu.memory_space<vmem>>, vector<1x32xf32>
    tpu.vector_store %arg12[%c17, %c0_24], %24 {strides = array<i32>} : memref<64x32xf32, #tpu.memory_space<vmem>>, vector<1x32xf32>,
    %c0_25 = arith.constant 0 : index
    %c3 = arith.constant 3 : index
    %26 = memref.load %arg0[%c0_25, %c3] : memref<2x8xi32, #tpu.memory_space<smem>>
    %27 = arith.index_cast %26 : i32 to index
    %c0_26 = arith.constant 0 : index
    %28 = vector.load %arg1[%27, %c0_26] : memref<50x32xf32, #tpu.memory_space<vmem>>, vector<1x32xf32>
    %c24 = arith.constant 24 : index
    %c0_27 = arith.constant 0 : index
    %29 = vector.load %arg12[%c24, %c0_27] : memref<64x32xf32, #tpu.memory_space<vmem>>, vector<1x32xf32>
    tpu.vector_store %arg12[%c24, %c0_27], %28 {strides = array<i32>} : memref<64x32xf32, #tpu.memory_space<vmem>>, vector<1x32xf32>,
    %c1_28 = arith.constant 1 : index
    %c3_29 = arith.constant 3 : index
    %30 = memref.load %arg0[%c1_28, %c3_29] : memref<2x8xi32, #tpu.memory_space<smem>>
    %31 = arith.index_cast %30 : i32 to index
    %c0_30 = arith.constant 0 : index
    %32 = vector.load %arg1[%31, %c0_30] : memref<50x32xf32, #tpu.memory_space<vmem>>, vector<1x32xf32>
    %c25 = arith.constant 25 : index
    %c0_31 = arith.constant 0 : index
    %33 = vector.load %arg12[%c25, %c0_31] : memref<64x32xf32, #tpu.memory_space<vmem>>, vector<1x32xf32>
    tpu.vector_store %arg12[%c25, %c0_31], %32 {strides = array<i32>} : memref<64x32xf32, #tpu.memory_space<vmem>>, vector<1x32xf32>,
    %c0_32 = arith.constant 0 : index
    %c4 = arith.constant 4 : index
    %34 = memref.load %arg0[%c0_32, %c4] : memref<2x8xi32, #tpu.memory_space<smem>>
    %35 = arith.index_cast %34 : i32 to index
    %c0_33 = arith.constant 0 : index
    %36 = vector.load %arg1[%35, %c0_33] : memref<50x32xf32, #tpu.memory_space<vmem>>, vector<1x32xf32>
    %c32 = arith.constant 32 : index
    %c0_34 = arith.constant 0 : index
    %37 = vector.load %arg12[%c32, %c0_34] : memref<64x32xf32, #tpu.memory_space<vmem>>, vector<1x32xf32>
    tpu.vector_store %arg12[%c32, %c0_34], %36 {strides = array<i32>} : memref<64x32xf32, #tpu.memory_space<vmem>>, vector<1x32xf32>,
    %c1_35 = arith.constant 1 : index
    %c4_36 = arith.constant 4 : index
    %38 = memref.load %arg0[%c1_35, %c4_36] : memref<2x8xi32, #tpu.memory_space<smem>>
    %39 = arith.index_cast %38 : i32 to index
    %c0_37 = arith.constant 0 : index
    %40 = vector.load %arg1[%39, %c0_37] : memref<50x32xf32, #tpu.memory_space<vmem>>, vector<1x32xf32>
    %c33 = arith.constant 33 : index
    %c0_38 = arith.constant 0 : index
    %41 = vector.load %arg12[%c33, %c0_38] : memref<64x32xf32, #tpu.memory_space<vmem>>, vector<1x32xf32>
    tpu.vector_store %arg12[%c33, %c0_38], %40 {strides = array<i32>} : memref<64x32xf32, #tpu.memory_space<vmem>>, vector<1x32xf32>,
    %c0_39 = arith.constant 0 : index
    %c5 = arith.constant 5 : index
    %42 = memref.load %arg0[%c0_39, %c5] : memref<2x8xi32, #tpu.memory_space<smem>>
    %43 = arith.index_cast %42 : i32 to index
    %c0_40 = arith.constant 0 : index
    %44 = vector.load %arg1[%43, %c0_40] : memref<50x32xf32, #tpu.memory_space<vmem>>, vector<1x32xf32>
    %c40 = arith.constant 40 : index
    %c0_41 = arith.constant 0 : index
    %45 = vector.load %arg12[%c40, %c0_41] : memref<64x32xf32, #tpu.memory_space<vmem>>, vector<1x32xf32>
    tpu.vector_store %arg12[%c40, %c0_41], %44 {strides = array<i32>} : memref<64x32xf32, #tpu.memory_space<vmem>>, vector<1x32xf32>,
    %c1_42 = arith.constant 1 : index
    %c5_43 = arith.constant 5 : index
    %46 = memref.load %arg0[%c1_42, %c5_43] : memref<2x8xi32, #tpu.memory_space<smem>>
    %47 = arith.index_cast %46 : i32 to index
    %c0_44 = arith.constant 0 : index
    %48 = vector.load %arg1[%47, %c0_44] : memref<50x32xf32, #tpu.memory_space<vmem>>, vector<1x32xf32>
    %c41 = arith.constant 41 : index
    %c0_45 = arith.constant 0 : index
    %49 = vector.load %arg12[%c41, %c0_45] : memref<64x32xf32, #tpu.memory_space<vmem>>, vector<1x32xf32>
    tpu.vector_store %arg12[%c41, %c0_45], %48 {strides = array<i32>} : memref<64x32xf32, #tpu.memory_space<vmem>>, vector<1x32xf32>,
    %c0_46 = arith.constant 0 : index
    %c6 = arith.constant 6 : index
    %50 = memref.load %arg0[%c0_46, %c6] : memref<2x8xi32, #tpu.memory_space<smem>>
    %51 = arith.index_cast %50 : i32 to index
    %c0_47 = arith.constant 0 : index
    %52 = vector.load %arg1[%51, %c0_47] : memref<50x32xf32, #tpu.memory_space<vmem>>, vector<1x32xf32>
    %c48 = arith.constant 48 : index
    %c0_48 = arith.constant 0 : index
    %53 = vector.load %arg12[%c48, %c0_48] : memref<64x32xf32, #tpu.memory_space<vmem>>, vector<1x32xf32>
    tpu.vector_store %arg12[%c48, %c0_48], %52 {strides = array<i32>} : memref<64x32xf32, #tpu.memory_space<vmem>>, vector<1x32xf32>,
    %c1_49 = arith.constant 1 : index
    %c6_50 = arith.constant 6 : index
    %54 = memref.load %arg0[%c1_49, %c6_50] : memref<2x8xi32, #tpu.memory_space<smem>>
    %55 = arith.index_cast %54 : i32 to index
    %c0_51 = arith.constant 0 : index
    %56 = vector.load %arg1[%55, %c0_51] : memref<50x32xf32, #tpu.memory_space<vmem>>, vector<1x32xf32>
    %c49 = arith.constant 49 : index
    %c0_52 = arith.constant 0 : index
    %57 = vector.load %arg12[%c49, %c0_52] : memref<64x32xf32, #tpu.memory_space<vmem>>, vector<1x32xf32>
    tpu.vector_store %arg12[%c49, %c0_52], %56 {strides = array<i32>} : memref<64x32xf32, #tpu.memory_space<vmem>>, vector<1x32xf32>,
    %c0_53 = arith.constant 0 : index
    %c7 = arith.constant 7 : index
    %58 = memref.load %arg0[%c0_53, %c7] : memref<2x8xi32, #tpu.memory_space<smem>>
    %59 = arith.index_cast %58 : i32 to index
    %c0_54 = arith.constant 0 : index
    %60 = vector.load %arg1[%59, %c0_54] : memref<50x32xf32, #tpu.memory_space<vmem>>, vector<1x32xf32>
    %c56 = arith.constant 56 : index
    %c0_55 = arith.constant 0 : index
    %61 = vector.load %arg12[%c56, %c0_55] : memref<64x32xf32, #tpu.memory_space<vmem>>, vector<1x32xf32>
    tpu.vector_store %arg12[%c56, %c0_55], %60 {strides = array<i32>} : memref<64x32xf32, #tpu.memory_space<vmem>>, vector<1x32xf32>,
    %c1_56 = arith.constant 1 : index
    %c7_57 = arith.constant 7 : index
    %62 = memref.load %arg0[%c1_56, %c7_57] : memref<2x8xi32, #tpu.memory_space<smem>>
    %63 = arith.index_cast %62 : i32 to index
    %c0_58 = arith.constant 0 : index
    %64 = vector.load %arg1[%63, %c0_58] : memref<50x32xf32, #tpu.memory_space<vmem>>, vector<1x32xf32>
    %c57 = arith.constant 57 : index
    %c0_59 = arith.constant 0 : index
    %65 = vector.load %arg12[%c57, %c0_59] : memref<64x32xf32, #tpu.memory_space<vmem>>, vector<1x32xf32>
    tpu.vector_store %arg12[%c57, %c0_59], %64 {strides = array<i32>} : memref<64x32xf32, #tpu.memory_space<vmem>>, vector<1x32xf32>,
    %c0_60 = arith.constant 0 : index
    %c0_61 = arith.constant 0 : index
    %66 = vector.load %arg12[%c0_60, %c0_61] : memref<64x32xf32, #tpu.memory_space<vmem>>, vector<64x32xf32>
    %67 = arith.truncf %66 : vector<64x32xf32> to vector<64x32xbf16>
    %c0_62 = arith.constant 0 : index
    %c0_63 = arith.constant 0 : index
    %68 = vector.load %arg2[%c0_62, %c0_63] : memref<32x256xbf16, #tpu.memory_space<vmem>>, vector<32x256xbf16>
    %cst_64 = arith.constant dense<0.000000e+00> : vector<64x256xf32>
    %69 = tpu.matmul %67, %68, %cst_64 {dimension_numbers = #tpu.dot_dimension_numbers<[1], [0], [0], [1], [0, 0, 1, 1], [], []>} : vector<64x32xbf16>, vector<32x256xbf16>, vector<64x256xf32> -> vector<64x256xf32>
    %c0_65 = arith.constant 0 : index
    %c0_66 = arith.constant 0 : index
    %70 = vector.load %arg4[%c0_65, %c0_66] : memref<1x256xf32, #tpu.memory_space<vmem>>, vector<1x256xf32>
    %71 = vector.broadcast %70 : vector<1x256xf32> to vector<64x256xf32>
    %72 = arith.addf %69, %71 : vector<64x256xf32>
    %c0_67 = arith.constant 0 : index
    %c0_68 = arith.constant 0 : index
    %73 = vector.load %arg3[%c0_67, %c0_68] : memref<64x256xbf16, #tpu.memory_space<vmem>>, vector<64x256xbf16>
    %cst_69 = arith.constant 0.000000e+00 : f32
    %74 = vector.broadcast %cst_69 : f32 to vector<8x32xf32>
    %cst_70 = arith.constant 0.000000e+00 : f32
    %75 = vector.broadcast %cst_70 : f32 to vector<8x32xf32>
    %76 = vector.extract_strided_slice %72 {offsets = [0, 0], sizes = [8, 128], strides = [1, 1]} : vector<64x256xf32> to vector<8x128xf32>
    %77 = vector.extract_strided_slice %72 {offsets = [56, 128], sizes = [8, 128], strides = [1, 1]} : vector<64x256xf32> to vector<8x128xf32>
    %78 = vector.extract_strided_slice %76 {offsets = [0, 0], sizes = [8, 32], strides = [1, 1]} : vector<8x128xf32> to vector<8x32xf32>
    %79 = arith.negf %78 : vector<8x32xf32>
    %80 = math.exp %79 : vector<8x32xf32>
    %cst_71 = arith.constant 1.000000e+00 : f32
    %81 = vector.broadcast %cst_71 : f32 to vector<8x32xf32>
    %82 = arith.addf %81, %80 : vector<8x32xf32>
    %83 = arith.divf %81, %82 : vector<8x32xf32>
    %84 = vector.extract_strided_slice %76 {offsets = [0, 32], sizes = [8, 32], strides = [1, 1]} : vector<8x128xf32> to vector<8x32xf32>
    %85 = arith.negf %84 : vector<8x32xf32>
    %86 = math.exp %85 : vector<8x32xf32>
    %cst_72 = arith.constant 1.000000e+00 : f32
    %87 = vector.broadcast %cst_72 : f32 to vector<8x32xf32>
    %88 = arith.addf %87, %86 : vector<8x32xf32>
    %89 = arith.divf %87, %88 : vector<8x32xf32>
    %90 = vector.extract_strided_slice %76 {offsets = [0, 64], sizes = [8, 32], strides = [1, 1]} : vector<8x128xf32> to vector<8x32xf32>
    %91 = math.tanh %90 : vector<8x32xf32>
    %92 = vector.extract_strided_slice %76 {offsets = [0, 96], sizes = [8, 32], strides = [1, 1]} : vector<8x128xf32> to vector<8x32xf32>
    %93 = arith.negf %92 : vector<8x32xf32>
    %94 = math.exp %93 : vector<8x32xf32>
    %cst_73 = arith.constant 1.000000e+00 : f32
    %95 = vector.broadcast %cst_73 : f32 to vector<8x32xf32>
    %96 = arith.addf %95, %94 : vector<8x32xf32>
    %97 = arith.divf %95, %96 : vector<8x32xf32>
    %98 = arith.mulf %89, %74 : vector<8x32xf32>
    %99 = arith.mulf %83, %91 : vector<8x32xf32>
    %100 = arith.addf %98, %99 : vector<8x32xf32>
    %101 = math.tanh %100 : vector<8x32xf32>
    %102 = arith.mulf %97, %101 : vector<8x32xf32>
    %103 = vector.extract_strided_slice %77 {offsets = [0, 0], sizes = [8, 32], strides = [1, 1]} : vector<8x128xf32> to vector<8x32xf32>
    %104 = arith.negf %103 : vector<8x32xf32>
    %105 = math.exp %104 : vector<8x32xf32>
    %cst_74 = arith.constant 1.000000e+00 : f32
    %106 = vector.broadcast %cst_74 : f32 to vector<8x32xf32>
    %107 = arith.addf %106, %105 : vector<8x32xf32>
    %108 = arith.divf %106, %107 : vector<8x32xf32>
    %109 = vector.extract_strided_slice %77 {offsets = [0, 32], sizes = [8, 32], strides = [1, 1]} : vector<8x128xf32> to vector<8x32xf32>
    %110 = arith.negf %109 : vector<8x32xf32>
    %111 = math.exp %110 : vector<8x32xf32>
    %cst_75 = arith.constant 1.000000e+00 : f32
    %112 = vector.broadcast %cst_75 : f32 to vector<8x32xf32>
    %113 = arith.addf %112, %111 : vector<8x32xf32>
    %114 = arith.divf %112, %113 : vector<8x32xf32>
    %115 = vector.extract_strided_slice %77 {offsets = [0, 64], sizes = [8, 32], strides = [1, 1]} : vector<8x128xf32> to vector<8x32xf32>
    %116 = math.tanh %115 : vector<8x32xf32>
    %117 = vector.extract_strided_slice %77 {offsets = [0, 96], sizes = [8, 32], strides = [1, 1]} : vector<8x128xf32> to vector<8x32xf32>
    %118 = arith.negf %117 : vector<8x32xf32>
    %119 = math.exp %118 : vector<8x32xf32>
    %cst_76 = arith.constant 1.000000e+00 : f32
    %120 = vector.broadcast %cst_76 : f32 to vector<8x32xf32>
    %121 = arith.addf %120, %119 : vector<8x32xf32>
    %122 = arith.divf %120, %121 : vector<8x32xf32>
    %123 = arith.mulf %114, %75 : vector<8x32xf32>
    %124 = arith.mulf %108, %116 : vector<8x32xf32>
    %125 = arith.addf %123, %124 : vector<8x32xf32>
    %126 = math.tanh %125 : vector<8x32xf32>
    %127 = arith.mulf %122, %126 : vector<8x32xf32>
    %c0_77 = arith.constant 0 : index
    %c0_78 = arith.constant 0 : index
    %128 = vector.load %arg13[%c0_77, %c0_78] : memref<64x64xf32, #tpu.memory_space<vmem>>, vector<8x32xf32>
    tpu.vector_store %arg13[%c0_77, %c0_78], %102 {strides = array<i32>} : memref<64x64xf32, #tpu.memory_space<vmem>>, vector<8x32xf32>,
    %c56_79 = arith.constant 56 : index
    %c32_80 = arith.constant 32 : index
    %129 = vector.load %arg13[%c56_79, %c32_80] : memref<64x64xf32, #tpu.memory_space<vmem>>, vector<8x32xf32>
    tpu.vector_store %arg13[%c56_79, %c32_80], %127 {strides = array<i32>} : memref<64x64xf32, #tpu.memory_space<vmem>>, vector<8x32xf32>,
    %130 = tpu.concatenate %102, %127 in 1 : vector<8x32xf32>, vector<8x32xf32> -> vector<8x64xf32>
    %131 = vector.extract_strided_slice %72 {offsets = [8, 0], sizes = [8, 128], strides = [1, 1]} : vector<64x256xf32> to vector<8x128xf32>
    %132 = vector.extract_strided_slice %72 {offsets = [48, 128], sizes = [8, 128], strides = [1, 1]} : vector<64x256xf32> to vector<8x128xf32>
    %133 = arith.truncf %130 : vector<8x64xf32> to vector<8x64xbf16>
    %cst_81 = arith.constant dense<0.000000e+00> : vector<8x256xf32>
    %134 = tpu.matmul %133, %73, %cst_81 {dimension_numbers = #tpu.dot_dimension_numbers<[1], [0], [0], [1], [0, 0, 1, 1], [], []>} : vector<8x64xbf16>, vector<64x256xbf16>, vector<8x256xf32> -> vector<8x256xf32>
    %135 = vector.extract_strided_slice %134 {offsets = [0, 0], sizes = [8, 128], strides = [1, 1]} : vector<8x256xf32> to vector<8x128xf32>
    %136 = arith.addf %131, %135 : vector<8x128xf32>
    %137 = vector.extract_strided_slice %134 {offsets = [0, 128], sizes = [8, 128], strides = [1, 1]} : vector<8x256xf32> to vector<8x128xf32>
    %138 = arith.addf %132, %137 : vector<8x128xf32>
    %139 = vector.extract_strided_slice %136 {offsets = [0, 0], sizes = [8, 32], strides = [1, 1]} : vector<8x128xf32> to vector<8x32xf32>
    %140 = arith.negf %139 : vector<8x32xf32>
    %141 = math.exp %140 : vector<8x32xf32>
    %cst_82 = arith.constant 1.000000e+00 : f32
    %142 = vector.broadcast %cst_82 : f32 to vector<8x32xf32>
    %143 = arith.addf %142, %141 : vector<8x32xf32>
    %144 = arith.divf %142, %143 : vector<8x32xf32>
    %145 = vector.extract_strided_slice %136 {offsets = [0, 32], sizes = [8, 32], strides = [1, 1]} : vector<8x128xf32> to vector<8x32xf32>
    %146 = arith.negf %145 : vector<8x32xf32>
    %147 = math.exp %146 : vector<8x32xf32>
    %cst_83 = arith.constant 1.000000e+00 : f32
    %148 = vector.broadcast %cst_83 : f32 to vector<8x32xf32>
    %149 = arith.addf %148, %147 : vector<8x32xf32>
    %150 = arith.divf %148, %149 : vector<8x32xf32>
    %151 = vector.extract_strided_slice %136 {offsets = [0, 64], sizes = [8, 32], strides = [1, 1]} : vector<8x128xf32> to vector<8x32xf32>
    %152 = math.tanh %151 : vector<8x32xf32>
    %153 = vector.extract_strided_slice %136 {offsets = [0, 96], sizes = [8, 32], strides = [1, 1]} : vector<8x128xf32> to vector<8x32xf32>
    %154 = arith.negf %153 : vector<8x32xf32>
    %155 = math.exp %154 : vector<8x32xf32>
    %cst_84 = arith.constant 1.000000e+00 : f32
    %156 = vector.broadcast %cst_84 : f32 to vector<8x32xf32>
    %157 = arith.addf %156, %155 : vector<8x32xf32>
    %158 = arith.divf %156, %157 : vector<8x32xf32>
    %159 = arith.mulf %150, %100 : vector<8x32xf32>
    %160 = arith.mulf %144, %152 : vector<8x32xf32>
    %161 = arith.addf %159, %160 : vector<8x32xf32>
    %162 = math.tanh %161 : vector<8x32xf32>
    %163 = arith.mulf %158, %162 : vector<8x32xf32>
    %164 = vector.extract_strided_slice %138 {offsets = [0, 0], sizes = [8, 32], strides = [1, 1]} : vector<8x128xf32> to vector<8x32xf32>
    %165 = arith.negf %164 : vector<8x32xf32>
    %166 = math.exp %165 : vector<8x32xf32>
    %cst_85 = arith.constant 1.000000e+00 : f32
    %167 = vector.broadcast %cst_85 : f32 to vector<8x32xf32>
    %168 = arith.addf %167, %166 : vector<8x32xf32>
    %169 = arith.divf %167, %168 : vector<8x32xf32>
    %170 = vector.extract_strided_slice %138 {offsets = [0, 32], sizes = [8, 32], strides = [1, 1]} : vector<8x128xf32> to vector<8x32xf32>
    %171 = arith.negf %170 : vector<8x32xf32>
    %172 = math.exp %171 : vector<8x32xf32>
    %cst_86 = arith.constant 1.000000e+00 : f32
    %173 = vector.broadcast %cst_86 : f32 to vector<8x32xf32>
    %174 = arith.addf %173, %172 : vector<8x32xf32>
    %175 = arith.divf %173, %174 : vector<8x32xf32>
    %176 = vector.extract_strided_slice %138 {offsets = [0, 64], sizes = [8, 32], strides = [1, 1]} : vector<8x128xf32> to vector<8x32xf32>
    %177 = math.tanh %176 : vector<8x32xf32>
    %178 = vector.extract_strided_slice %138 {offsets = [0, 96], sizes = [8, 32], strides = [1, 1]} : vector<8x128xf32> to vector<8x32xf32>
    %179 = arith.negf %178 : vector<8x32xf32>
    %180 = math.exp %179 : vector<8x32xf32>
    %cst_87 = arith.constant 1.000000e+00 : f32
    %181 = vector.broadcast %cst_87 : f32 to vector<8x32xf32>
    %182 = arith.addf %181, %180 : vector<8x32xf32>
    %183 = arith.divf %181, %182 : vector<8x32xf32>
    %184 = arith.mulf %175, %125 : vector<8x32xf32>
    %185 = arith.mulf %169, %177 : vector<8x32xf32>
    %186 = arith.addf %184, %185 : vector<8x32xf32>
    %187 = math.tanh %186 : vector<8x32xf32>
    %188 = arith.mulf %183, %187 : vector<8x32xf32>
    %c8_88 = arith.constant 8 : index
    %c0_89 = arith.constant 0 : index
    %189 = vector.load %arg13[%c8_88, %c0_89] : memref<64x64xf32, #tpu.memory_space<vmem>>, vector<8x32xf32>
    tpu.vector_store %arg13[%c8_88, %c0_89], %163 {strides = array<i32>} : memref<64x64xf32, #tpu.memory_space<vmem>>, vector<8x32xf32>,
    %c48_90 = arith.constant 48 : index
    %c32_91 = arith.constant 32 : index
    %190 = vector.load %arg13[%c48_90, %c32_91] : memref<64x64xf32, #tpu.memory_space<vmem>>, vector<8x32xf32>
    tpu.vector_store %arg13[%c48_90, %c32_91], %188 {strides = array<i32>} : memref<64x64xf32, #tpu.memory_space<vmem>>, vector<8x32xf32>,
    %191 = tpu.concatenate %163, %188 in 1 : vector<8x32xf32>, vector<8x32xf32> -> vector<8x64xf32>
    %192 = vector.extract_strided_slice %72 {offsets = [16, 0], sizes = [8, 128], strides = [1, 1]} : vector<64x256xf32> to vector<8x128xf32>
    %193 = vector.extract_strided_slice %72 {offsets = [40, 128], sizes = [8, 128], strides = [1, 1]} : vector<64x256xf32> to vector<8x128xf32>
    %194 = arith.truncf %191 : vector<8x64xf32> to vector<8x64xbf16>
    %cst_92 = arith.constant dense<0.000000e+00> : vector<8x256xf32>
    %195 = tpu.matmul %194, %73, %cst_92 {dimension_numbers = #tpu.dot_dimension_numbers<[1], [0], [0], [1], [0, 0, 1, 1], [], []>} : vector<8x64xbf16>, vector<64x256xbf16>, vector<8x256xf32> -> vector<8x256xf32>
    %196 = vector.extract_strided_slice %195 {offsets = [0, 0], sizes = [8, 128], strides = [1, 1]} : vector<8x256xf32> to vector<8x128xf32>
    %197 = arith.addf %192, %196 : vector<8x128xf32>
    %198 = vector.extract_strided_slice %195 {offsets = [0, 128], sizes = [8, 128], strides = [1, 1]} : vector<8x256xf32> to vector<8x128xf32>
    %199 = arith.addf %193, %198 : vector<8x128xf32>
    %200 = vector.extract_strided_slice %197 {offsets = [0, 0], sizes = [8, 32], strides = [1, 1]} : vector<8x128xf32> to vector<8x32xf32>
    %201 = arith.negf %200 : vector<8x32xf32>
    %202 = math.exp %201 : vector<8x32xf32>
    %cst_93 = arith.constant 1.000000e+00 : f32
    %203 = vector.broadcast %cst_93 : f32 to vector<8x32xf32>
    %204 = arith.addf %203, %202 : vector<8x32xf32>
    %205 = arith.divf %203, %204 : vector<8x32xf32>
    %206 = vector.extract_strided_slice %197 {offsets = [0, 32], sizes = [8, 32], strides = [1, 1]} : vector<8x128xf32> to vector<8x32xf32>
    %207 = arith.negf %206 : vector<8x32xf32>
    %208 = math.exp %207 : vector<8x32xf32>
    %cst_94 = arith.constant 1.000000e+00 : f32
    %209 = vector.broadcast %cst_94 : f32 to vector<8x32xf32>
    %210 = arith.addf %209, %208 : vector<8x32xf32>
    %211 = arith.divf %209, %210 : vector<8x32xf32>
    %212 = vector.extract_strided_slice %197 {offsets = [0, 64], sizes = [8, 32], strides = [1, 1]} : vector<8x128xf32> to vector<8x32xf32>
    %213 = math.tanh %212 : vector<8x32xf32>
    %214 = vector.extract_strided_slice %197 {offsets = [0, 96], sizes = [8, 32], strides = [1, 1]} : vector<8x128xf32> to vector<8x32xf32>
    %215 = arith.negf %214 : vector<8x32xf32>
    %216 = math.exp %215 : vector<8x32xf32>
    %cst_95 = arith.constant 1.000000e+00 : f32
    %217 = vector.broadcast %cst_95 : f32 to vector<8x32xf32>
    %218 = arith.addf %217, %216 : vector<8x32xf32>
    %219 = arith.divf %217, %218 : vector<8x32xf32>
    %220 = arith.mulf %211, %161 : vector<8x32xf32>
    %221 = arith.mulf %205, %213 : vector<8x32xf32>
    %222 = arith.addf %220, %221 : vector<8x32xf32>
    %223 = math.tanh %222 : vector<8x32xf32>
    %224 = arith.mulf %219, %223 : vector<8x32xf32>
    %225 = vector.extract_strided_slice %199 {offsets = [0, 0], sizes = [8, 32], strides = [1, 1]} : vector<8x128xf32> to vector<8x32xf32>
    %226 = arith.negf %225 : vector<8x32xf32>
    %227 = math.exp %226 : vector<8x32xf32>
    %cst_96 = arith.constant 1.000000e+00 : f32
    %228 = vector.broadcast %cst_96 : f32 to vector<8x32xf32>
    %229 = arith.addf %228, %227 : vector<8x32xf32>
    %230 = arith.divf %228, %229 : vector<8x32xf32>
    %231 = vector.extract_strided_slice %199 {offsets = [0, 32], sizes = [8, 32], strides = [1, 1]} : vector<8x128xf32> to vector<8x32xf32>
    %232 = arith.negf %231 : vector<8x32xf32>
    %233 = math.exp %232 : vector<8x32xf32>
    %cst_97 = arith.constant 1.000000e+00 : f32
    %234 = vector.broadcast %cst_97 : f32 to vector<8x32xf32>
    %235 = arith.addf %234, %233 : vector<8x32xf32>
    %236 = arith.divf %234, %235 : vector<8x32xf32>
    %237 = vector.extract_strided_slice %199 {offsets = [0, 64], sizes = [8, 32], strides = [1, 1]} : vector<8x128xf32> to vector<8x32xf32>
    %238 = math.tanh %237 : vector<8x32xf32>
    %239 = vector.extract_strided_slice %199 {offsets = [0, 96], sizes = [8, 32], strides = [1, 1]} : vector<8x128xf32> to vector<8x32xf32>
    %240 = arith.negf %239 : vector<8x32xf32>
    %241 = math.exp %240 : vector<8x32xf32>
    %cst_98 = arith.constant 1.000000e+00 : f32
    %242 = vector.broadcast %cst_98 : f32 to vector<8x32xf32>
    %243 = arith.addf %242, %241 : vector<8x32xf32>
    %244 = arith.divf %242, %243 : vector<8x32xf32>
    %245 = arith.mulf %236, %186 : vector<8x32xf32>
    %246 = arith.mulf %230, %238 : vector<8x32xf32>
    %247 = arith.addf %245, %246 : vector<8x32xf32>
    %248 = math.tanh %247 : vector<8x32xf32>
    %249 = arith.mulf %244, %248 : vector<8x32xf32>
    %c16_99 = arith.constant 16 : index
    %c0_100 = arith.constant 0 : index
    %250 = vector.load %arg13[%c16_99, %c0_100] : memref<64x64xf32, #tpu.memory_space<vmem>>, vector<8x32xf32>
    tpu.vector_store %arg13[%c16_99, %c0_100], %224 {strides = array<i32>} : memref<64x64xf32, #tpu.memory_space<vmem>>, vector<8x32xf32>,
    %c40_101 = arith.constant 40 : index
    %c32_102 = arith.constant 32 : index
    %251 = vector.load %arg13[%c40_101, %c32_102] : memref<64x64xf32, #tpu.memory_space<vmem>>, vector<8x32xf32>
    tpu.vector_store %arg13[%c40_101, %c32_102], %249 {strides = array<i32>} : memref<64x64xf32, #tpu.memory_space<vmem>>, vector<8x32xf32>,
    %252 = tpu.concatenate %224, %249 in 1 : vector<8x32xf32>, vector<8x32xf32> -> vector<8x64xf32>
    %253 = vector.extract_strided_slice %72 {offsets = [24, 0], sizes = [8, 128], strides = [1, 1]} : vector<64x256xf32> to vector<8x128xf32>
    %254 = vector.extract_strided_slice %72 {offsets = [32, 128], sizes = [8, 128], strides = [1, 1]} : vector<64x256xf32> to vector<8x128xf32>
    %255 = arith.truncf %252 : vector<8x64xf32> to vector<8x64xbf16>
    %cst_103 = arith.constant dense<0.000000e+00> : vector<8x256xf32>
    %256 = tpu.matmul %255, %73, %cst_103 {dimension_numbers = #tpu.dot_dimension_numbers<[1], [0], [0], [1], [0, 0, 1, 1], [], []>} : vector<8x64xbf16>, vector<64x256xbf16>, vector<8x256xf32> -> vector<8x256xf32>
    %257 = vector.extract_strided_slice %256 {offsets = [0, 0], sizes = [8, 128], strides = [1, 1]} : vector<8x256xf32> to vector<8x128xf32>
    %258 = arith.addf %253, %257 : vector<8x128xf32>
    %259 = vector.extract_strided_slice %256 {offsets = [0, 128], sizes = [8, 128], strides = [1, 1]} : vector<8x256xf32> to vector<8x128xf32>
    %260 = arith.addf %254, %259 : vector<8x128xf32>
    %261 = vector.extract_strided_slice %258 {offsets = [0, 0], sizes = [8, 32], strides = [1, 1]} : vector<8x128xf32> to vector<8x32xf32>
    %262 = arith.negf %261 : vector<8x32xf32>
    %263 = math.exp %262 : vector<8x32xf32>
    %cst_104 = arith.constant 1.000000e+00 : f32
    %264 = vector.broadcast %cst_104 : f32 to vector<8x32xf32>
    %265 = arith.addf %264, %263 : vector<8x32xf32>
    %266 = arith.divf %264, %265 : vector<8x32xf32>
    %267 = vector.extract_strided_slice %258 {offsets = [0, 32], sizes = [8, 32], strides = [1, 1]} : vector<8x128xf32> to vector<8x32xf32>
    %268 = arith.negf %267 : vector<8x32xf32>
    %269 = math.exp %268 : vector<8x32xf32>
    %cst_105 = arith.constant 1.000000e+00 : f32
    %270 = vector.broadcast %cst_105 : f32 to vector<8x32xf32>
    %271 = arith.addf %270, %269 : vector<8x32xf32>
    %272 = arith.divf %270, %271 : vector<8x32xf32>
    %273 = vector.extract_strided_slice %258 {offsets = [0, 64], sizes = [8, 32], strides = [1, 1]} : vector<8x128xf32> to vector<8x32xf32>
    %274 = math.tanh %273 : vector<8x32xf32>
    %275 = vector.extract_strided_slice %258 {offsets = [0, 96], sizes = [8, 32], strides = [1, 1]} : vector<8x128xf32> to vector<8x32xf32>
    %276 = arith.negf %275 : vector<8x32xf32>
    %277 = math.exp %276 : vector<8x32xf32>
    %cst_106 = arith.constant 1.000000e+00 : f32
    %278 = vector.broadcast %cst_106 : f32 to vector<8x32xf32>
    %279 = arith.addf %278, %277 : vector<8x32xf32>
    %280 = arith.divf %278, %279 : vector<8x32xf32>
    %281 = arith.mulf %272, %222 : vector<8x32xf32>
    %282 = arith.mulf %266, %274 : vector<8x32xf32>
    %283 = arith.addf %281, %282 : vector<8x32xf32>
    %284 = math.tanh %283 : vector<8x32xf32>
    %285 = arith.mulf %280, %284 : vector<8x32xf32>
    %286 = vector.extract_strided_slice %260 {offsets = [0, 0], sizes = [8, 32], strides = [1, 1]} : vector<8x128xf32> to vector<8x32xf32>
    %287 = arith.negf %286 : vector<8x32xf32>
    %288 = math.exp %287 : vector<8x32xf32>
    %cst_107 = arith.constant 1.000000e+00 : f32
    %289 = vector.broadcast %cst_107 : f32 to vector<8x32xf32>
    %290 = arith.addf %289, %288 : vector<8x32xf32>
    %291 = arith.divf %289, %290 : vector<8x32xf32>
    %292 = vector.extract_strided_slice %260 {offsets = [0, 32], sizes = [8, 32], strides = [1, 1]} : vector<8x128xf32> to vector<8x32xf32>
    %293 = arith.negf %292 : vector<8x32xf32>
    %294 = math.exp %293 : vector<8x32xf32>
    %cst_108 = arith.constant 1.000000e+00 : f32
    %295 = vector.broadcast %cst_108 : f32 to vector<8x32xf32>
    %296 = arith.addf %295, %294 : vector<8x32xf32>
    %297 = arith.divf %295, %296 : vector<8x32xf32>
    %298 = vector.extract_strided_slice %260 {offsets = [0, 64], sizes = [8, 32], strides = [1, 1]} : vector<8x128xf32> to vector<8x32xf32>
    %299 = math.tanh %298 : vector<8x32xf32>
    %300 = vector.extract_strided_slice %260 {offsets = [0, 96], sizes = [8, 32], strides = [1, 1]} : vector<8x128xf32> to vector<8x32xf32>
    %301 = arith.negf %300 : vector<8x32xf32>
    %302 = math.exp %301 : vector<8x32xf32>
    %cst_109 = arith.constant 1.000000e+00 : f32
    %303 = vector.broadcast %cst_109 : f32 to vector<8x32xf32>
    %304 = arith.addf %303, %302 : vector<8x32xf32>
    %305 = arith.divf %303, %304 : vector<8x32xf32>
    %306 = arith.mulf %297, %247 : vector<8x32xf32>
    %307 = arith.mulf %291, %299 : vector<8x32xf32>
    %308 = arith.addf %306, %307 : vector<8x32xf32>
    %309 = math.tanh %308 : vector<8x32xf32>
    %310 = arith.mulf %305, %309 : vector<8x32xf32>
    %c24_110 = arith.constant 24 : index
    %c0_111 = arith.constant 0 : index
    %311 = vector.load %arg13[%c24_110, %c0_111] : memref<64x64xf32, #tpu.memory_space<vmem>>, vector<8x32xf32>
    tpu.vector_store %arg13[%c24_110, %c0_111], %285 {strides = array<i32>} : memref<64x64xf32, #tpu.memory_space<vmem>>, vector<8x32xf32>,
    %c32_112 = arith.constant 32 : index
    %c32_113 = arith.constant 32 : index
    %312 = vector.load %arg13[%c32_112, %c32_113] : memref<64x64xf32, #tpu.memory_space<vmem>>, vector<8x32xf32>
    tpu.vector_store %arg13[%c32_112, %c32_113], %310 {strides = array<i32>} : memref<64x64xf32, #tpu.memory_space<vmem>>, vector<8x32xf32>,
    %313 = tpu.concatenate %285, %310 in 1 : vector<8x32xf32>, vector<8x32xf32> -> vector<8x64xf32>
    %314 = vector.extract_strided_slice %72 {offsets = [32, 0], sizes = [8, 128], strides = [1, 1]} : vector<64x256xf32> to vector<8x128xf32>
    %315 = vector.extract_strided_slice %72 {offsets = [24, 128], sizes = [8, 128], strides = [1, 1]} : vector<64x256xf32> to vector<8x128xf32>
    %316 = arith.truncf %313 : vector<8x64xf32> to vector<8x64xbf16>
    %cst_114 = arith.constant dense<0.000000e+00> : vector<8x256xf32>
    %317 = tpu.matmul %316, %73, %cst_114 {dimension_numbers = #tpu.dot_dimension_numbers<[1], [0], [0], [1], [0, 0, 1, 1], [], []>} : vector<8x64xbf16>, vector<64x256xbf16>, vector<8x256xf32> -> vector<8x256xf32>
    %318 = vector.extract_strided_slice %317 {offsets = [0, 0], sizes = [8, 128], strides = [1, 1]} : vector<8x256xf32> to vector<8x128xf32>
    %319 = arith.addf %314, %318 : vector<8x128xf32>
    %320 = vector.extract_strided_slice %317 {offsets = [0, 128], sizes = [8, 128], strides = [1, 1]} : vector<8x256xf32> to vector<8x128xf32>
    %321 = arith.addf %315, %320 : vector<8x128xf32>
    %322 = vector.extract_strided_slice %319 {offsets = [0, 0], sizes = [8, 32], strides = [1, 1]} : vector<8x128xf32> to vector<8x32xf32>
    %323 = arith.negf %322 : vector<8x32xf32>
    %324 = math.exp %323 : vector<8x32xf32>
    %cst_115 = arith.constant 1.000000e+00 : f32
    %325 = vector.broadcast %cst_115 : f32 to vector<8x32xf32>
    %326 = arith.addf %325, %324 : vector<8x32xf32>
    %327 = arith.divf %325, %326 : vector<8x32xf32>
    %328 = vector.extract_strided_slice %319 {offsets = [0, 32], sizes = [8, 32], strides = [1, 1]} : vector<8x128xf32> to vector<8x32xf32>
    %329 = arith.negf %328 : vector<8x32xf32>
    %330 = math.exp %329 : vector<8x32xf32>
    %cst_116 = arith.constant 1.000000e+00 : f32
    %331 = vector.broadcast %cst_116 : f32 to vector<8x32xf32>
    %332 = arith.addf %331, %330 : vector<8x32xf32>
    %333 = arith.divf %331, %332 : vector<8x32xf32>
    %334 = vector.extract_strided_slice %319 {offsets = [0, 64], sizes = [8, 32], strides = [1, 1]} : vector<8x128xf32> to vector<8x32xf32>
    %335 = math.tanh %334 : vector<8x32xf32>
    %336 = vector.extract_strided_slice %319 {offsets = [0, 96], sizes = [8, 32], strides = [1, 1]} : vector<8x128xf32> to vector<8x32xf32>
    %337 = arith.negf %336 : vector<8x32xf32>
    %338 = math.exp %337 : vector<8x32xf32>
    %cst_117 = arith.constant 1.000000e+00 : f32
    %339 = vector.broadcast %cst_117 : f32 to vector<8x32xf32>
    %340 = arith.addf %339, %338 : vector<8x32xf32>
    %341 = arith.divf %339, %340 : vector<8x32xf32>
    %342 = arith.mulf %333, %283 : vector<8x32xf32>
    %343 = arith.mulf %327, %335 : vector<8x32xf32>
    %344 = arith.addf %342, %343 : vector<8x32xf32>
    %345 = math.tanh %344 : vector<8x32xf32>
    %346 = arith.mulf %341, %345 : vector<8x32xf32>
    %347 = vector.extract_strided_slice %321 {offsets = [0, 0], sizes = [8, 32], strides = [1, 1]} : vector<8x128xf32> to vector<8x32xf32>
    %348 = arith.negf %347 : vector<8x32xf32>
    %349 = math.exp %348 : vector<8x32xf32>
    %cst_118 = arith.constant 1.000000e+00 : f32
    %350 = vector.broadcast %cst_118 : f32 to vector<8x32xf32>
    %351 = arith.addf %350, %349 : vector<8x32xf32>
    %352 = arith.divf %350, %351 : vector<8x32xf32>
    %353 = vector.extract_strided_slice %321 {offsets = [0, 32], sizes = [8, 32], strides = [1, 1]} : vector<8x128xf32> to vector<8x32xf32>
    %354 = arith.negf %353 : vector<8x32xf32>
    %355 = math.exp %354 : vector<8x32xf32>
    %cst_119 = arith.constant 1.000000e+00 : f32
    %356 = vector.broadcast %cst_119 : f32 to vector<8x32xf32>
    %357 = arith.addf %356, %355 : vector<8x32xf32>
    %358 = arith.divf %356, %357 : vector<8x32xf32>
    %359 = vector.extract_strided_slice %321 {offsets = [0, 64], sizes = [8, 32], strides = [1, 1]} : vector<8x128xf32> to vector<8x32xf32>
    %360 = math.tanh %359 : vector<8x32xf32>
    %361 = vector.extract_strided_slice %321 {offsets = [0, 96], sizes = [8, 32], strides = [1, 1]} : vector<8x128xf32> to vector<8x32xf32>
    %362 = arith.negf %361 : vector<8x32xf32>
    %363 = math.exp %362 : vector<8x32xf32>
    %cst_120 = arith.constant 1.000000e+00 : f32
    %364 = vector.broadcast %cst_120 : f32 to vector<8x32xf32>
    %365 = arith.addf %364, %363 : vector<8x32xf32>
    %366 = arith.divf %364, %365 : vector<8x32xf32>
    %367 = arith.mulf %358, %308 : vector<8x32xf32>
    %368 = arith.mulf %352, %360 : vector<8x32xf32>
    %369 = arith.addf %367, %368 : vector<8x32xf32>
    %370 = math.tanh %369 : vector<8x32xf32>
    %371 = arith.mulf %366, %370 : vector<8x32xf32>
    %c32_121 = arith.constant 32 : index
    %c0_122 = arith.constant 0 : index
    %372 = vector.load %arg13[%c32_121, %c0_122] : memref<64x64xf32, #tpu.memory_space<vmem>>, vector<8x32xf32>
    tpu.vector_store %arg13[%c32_121, %c0_122], %346 {strides = array<i32>} : memref<64x64xf32, #tpu.memory_space<vmem>>, vector<8x32xf32>,
    %c24_123 = arith.constant 24 : index
    %c32_124 = arith.constant 32 : index
    %373 = vector.load %arg13[%c24_123, %c32_124] : memref<64x64xf32, #tpu.memory_space<vmem>>, vector<8x32xf32>
    tpu.vector_store %arg13[%c24_123, %c32_124], %371 {strides = array<i32>} : memref<64x64xf32, #tpu.memory_space<vmem>>, vector<8x32xf32>,
    %374 = tpu.concatenate %346, %371 in 1 : vector<8x32xf32>, vector<8x32xf32> -> vector<8x64xf32>
    %375 = vector.extract_strided_slice %72 {offsets = [40, 0], sizes = [8, 128], strides = [1, 1]} : vector<64x256xf32> to vector<8x128xf32>
    %376 = vector.extract_strided_slice %72 {offsets = [16, 128], sizes = [8, 128], strides = [1, 1]} : vector<64x256xf32> to vector<8x128xf32>
    %377 = arith.truncf %374 : vector<8x64xf32> to vector<8x64xbf16>
    %cst_125 = arith.constant dense<0.000000e+00> : vector<8x256xf32>
    %378 = tpu.matmul %377, %73, %cst_125 {dimension_numbers = #tpu.dot_dimension_numbers<[1], [0], [0], [1], [0, 0, 1, 1], [], []>} : vector<8x64xbf16>, vector<64x256xbf16>, vector<8x256xf32> -> vector<8x256xf32>
    %379 = vector.extract_strided_slice %378 {offsets = [0, 0], sizes = [8, 128], strides = [1, 1]} : vector<8x256xf32> to vector<8x128xf32>
    %380 = arith.addf %375, %379 : vector<8x128xf32>
    %381 = vector.extract_strided_slice %378 {offsets = [0, 128], sizes = [8, 128], strides = [1, 1]} : vector<8x256xf32> to vector<8x128xf32>
    %382 = arith.addf %376, %381 : vector<8x128xf32>
    %383 = vector.extract_strided_slice %380 {offsets = [0, 0], sizes = [8, 32], strides = [1, 1]} : vector<8x128xf32> to vector<8x32xf32>
    %384 = arith.negf %383 : vector<8x32xf32>
    %385 = math.exp %384 : vector<8x32xf32>
    %cst_126 = arith.constant 1.000000e+00 : f32
    %386 = vector.broadcast %cst_126 : f32 to vector<8x32xf32>
    %387 = arith.addf %386, %385 : vector<8x32xf32>
    %388 = arith.divf %386, %387 : vector<8x32xf32>
    %389 = vector.extract_strided_slice %380 {offsets = [0, 32], sizes = [8, 32], strides = [1, 1]} : vector<8x128xf32> to vector<8x32xf32>
    %390 = arith.negf %389 : vector<8x32xf32>
    %391 = math.exp %390 : vector<8x32xf32>
    %cst_127 = arith.constant 1.000000e+00 : f32
    %392 = vector.broadcast %cst_127 : f32 to vector<8x32xf32>
    %393 = arith.addf %392, %391 : vector<8x32xf32>
    %394 = arith.divf %392, %393 : vector<8x32xf32>
    %395 = vector.extract_strided_slice %380 {offsets = [0, 64], sizes = [8, 32], strides = [1, 1]} : vector<8x128xf32> to vector<8x32xf32>
    %396 = math.tanh %395 : vector<8x32xf32>
    %397 = vector.extract_strided_slice %380 {offsets = [0, 96], sizes = [8, 32], strides = [1, 1]} : vector<8x128xf32> to vector<8x32xf32>
    %398 = arith.negf %397 : vector<8x32xf32>
    %399 = math.exp %398 : vector<8x32xf32>
    %cst_128 = arith.constant 1.000000e+00 : f32
    %400 = vector.broadcast %cst_128 : f32 to vector<8x32xf32>
    %401 = arith.addf %400, %399 : vector<8x32xf32>
    %402 = arith.divf %400, %401 : vector<8x32xf32>
    %403 = arith.mulf %394, %344 : vector<8x32xf32>
    %404 = arith.mulf %388, %396 : vector<8x32xf32>
    %405 = arith.addf %403, %404 : vector<8x32xf32>
    %406 = math.tanh %405 : vector<8x32xf32>
    %407 = arith.mulf %402, %406 : vector<8x32xf32>
    %408 = vector.extract_strided_slice %382 {offsets = [0, 0], sizes = [8, 32], strides = [1, 1]} : vector<8x128xf32> to vector<8x32xf32>
    %409 = arith.negf %408 : vector<8x32xf32>
    %410 = math.exp %409 : vector<8x32xf32>
    %cst_129 = arith.constant 1.000000e+00 : f32
    %411 = vector.broadcast %cst_129 : f32 to vector<8x32xf32>
    %412 = arith.addf %411, %410 : vector<8x32xf32>
    %413 = arith.divf %411, %412 : vector<8x32xf32>
    %414 = vector.extract_strided_slice %382 {offsets = [0, 32], sizes = [8, 32], strides = [1, 1]} : vector<8x128xf32> to vector<8x32xf32>
    %415 = arith.negf %414 : vector<8x32xf32>
    %416 = math.exp %415 : vector<8x32xf32>
    %cst_130 = arith.constant 1.000000e+00 : f32
    %417 = vector.broadcast %cst_130 : f32 to vector<8x32xf32>
    %418 = arith.addf %417, %416 : vector<8x32xf32>
    %419 = arith.divf %417, %418 : vector<8x32xf32>
    %420 = vector.extract_strided_slice %382 {offsets = [0, 64], sizes = [8, 32], strides = [1, 1]} : vector<8x128xf32> to vector<8x32xf32>
    %421 = math.tanh %420 : vector<8x32xf32>
    %422 = vector.extract_strided_slice %382 {offsets = [0, 96], sizes = [8, 32], strides = [1, 1]} : vector<8x128xf32> to vector<8x32xf32>
    %423 = arith.negf %422 : vector<8x32xf32>
    %424 = math.exp %423 : vector<8x32xf32>
    %cst_131 = arith.constant 1.000000e+00 : f32
    %425 = vector.broadcast %cst_131 : f32 to vector<8x32xf32>
    %426 = arith.addf %425, %424 : vector<8x32xf32>
    %427 = arith.divf %425, %426 : vector<8x32xf32>
    %428 = arith.mulf %419, %369 : vector<8x32xf32>
    %429 = arith.mulf %413, %421 : vector<8x32xf32>
    %430 = arith.addf %428, %429 : vector<8x32xf32>
    %431 = math.tanh %430 : vector<8x32xf32>
    %432 = arith.mulf %427, %431 : vector<8x32xf32>
    %c40_132 = arith.constant 40 : index
    %c0_133 = arith.constant 0 : index
    %433 = vector.load %arg13[%c40_132, %c0_133] : memref<64x64xf32, #tpu.memory_space<vmem>>, vector<8x32xf32>
    tpu.vector_store %arg13[%c40_132, %c0_133], %407 {strides = array<i32>} : memref<64x64xf32, #tpu.memory_space<vmem>>, vector<8x32xf32>,
    %c16_134 = arith.constant 16 : index
    %c32_135 = arith.constant 32 : index
    %434 = vector.load %arg13[%c16_134, %c32_135] : memref<64x64xf32, #tpu.memory_space<vmem>>, vector<8x32xf32>
    tpu.vector_store %arg13[%c16_134, %c32_135], %432 {strides = array<i32>} : memref<64x64xf32, #tpu.memory_space<vmem>>, vector<8x32xf32>,
    %435 = tpu.concatenate %407, %432 in 1 : vector<8x32xf32>, vector<8x32xf32> -> vector<8x64xf32>
    %436 = vector.extract_strided_slice %72 {offsets = [48, 0], sizes = [8, 128], strides = [1, 1]} : vector<64x256xf32> to vector<8x128xf32>
    %437 = vector.extract_strided_slice %72 {offsets = [8, 128], sizes = [8, 128], strides = [1, 1]} : vector<64x256xf32> to vector<8x128xf32>
    %438 = arith.truncf %435 : vector<8x64xf32> to vector<8x64xbf16>
    %cst_136 = arith.constant dense<0.000000e+00> : vector<8x256xf32>
    %439 = tpu.matmul %438, %73, %cst_136 {dimension_numbers = #tpu.dot_dimension_numbers<[1], [0], [0], [1], [0, 0, 1, 1], [], []>} : vector<8x64xbf16>, vector<64x256xbf16>, vector<8x256xf32> -> vector<8x256xf32>
    %440 = vector.extract_strided_slice %439 {offsets = [0, 0], sizes = [8, 128], strides = [1, 1]} : vector<8x256xf32> to vector<8x128xf32>
    %441 = arith.addf %436, %440 : vector<8x128xf32>
    %442 = vector.extract_strided_slice %439 {offsets = [0, 128], sizes = [8, 128], strides = [1, 1]} : vector<8x256xf32> to vector<8x128xf32>
    %443 = arith.addf %437, %442 : vector<8x128xf32>
    %444 = vector.extract_strided_slice %441 {offsets = [0, 0], sizes = [8, 32], strides = [1, 1]} : vector<8x128xf32> to vector<8x32xf32>
    %445 = arith.negf %444 : vector<8x32xf32>
    %446 = math.exp %445 : vector<8x32xf32>
    %cst_137 = arith.constant 1.000000e+00 : f32
    %447 = vector.broadcast %cst_137 : f32 to vector<8x32xf32>
    %448 = arith.addf %447, %446 : vector<8x32xf32>
    %449 = arith.divf %447, %448 : vector<8x32xf32>
    %450 = vector.extract_strided_slice %441 {offsets = [0, 32], sizes = [8, 32], strides = [1, 1]} : vector<8x128xf32> to vector<8x32xf32>
    %451 = arith.negf %450 : vector<8x32xf32>
    %452 = math.exp %451 : vector<8x32xf32>
    %cst_138 = arith.constant 1.000000e+00 : f32
    %453 = vector.broadcast %cst_138 : f32 to vector<8x32xf32>
    %454 = arith.addf %453, %452 : vector<8x32xf32>
    %455 = arith.divf %453, %454 : vector<8x32xf32>
    %456 = vector.extract_strided_slice %441 {offsets = [0, 64], sizes = [8, 32], strides = [1, 1]} : vector<8x128xf32> to vector<8x32xf32>
    %457 = math.tanh %456 : vector<8x32xf32>
    %458 = vector.extract_strided_slice %441 {offsets = [0, 96], sizes = [8, 32], strides = [1, 1]} : vector<8x128xf32> to vector<8x32xf32>
    %459 = arith.negf %458 : vector<8x32xf32>
    %460 = math.exp %459 : vector<8x32xf32>
    %cst_139 = arith.constant 1.000000e+00 : f32
    %461 = vector.broadcast %cst_139 : f32 to vector<8x32xf32>
    %462 = arith.addf %461, %460 : vector<8x32xf32>
    %463 = arith.divf %461, %462 : vector<8x32xf32>
    %464 = arith.mulf %455, %405 : vector<8x32xf32>
    %465 = arith.mulf %449, %457 : vector<8x32xf32>
    %466 = arith.addf %464, %465 : vector<8x32xf32>
    %467 = math.tanh %466 : vector<8x32xf32>
    %468 = arith.mulf %463, %467 : vector<8x32xf32>
    %469 = vector.extract_strided_slice %443 {offsets = [0, 0], sizes = [8, 32], strides = [1, 1]} : vector<8x128xf32> to vector<8x32xf32>
    %470 = arith.negf %469 : vector<8x32xf32>
    %471 = math.exp %470 : vector<8x32xf32>
    %cst_140 = arith.constant 1.000000e+00 : f32
    %472 = vector.broadcast %cst_140 : f32 to vector<8x32xf32>
    %473 = arith.addf %472, %471 : vector<8x32xf32>
    %474 = arith.divf %472, %473 : vector<8x32xf32>
    %475 = vector.extract_strided_slice %443 {offsets = [0, 32], sizes = [8, 32], strides = [1, 1]} : vector<8x128xf32> to vector<8x32xf32>
    %476 = arith.negf %475 : vector<8x32xf32>
    %477 = math.exp %476 : vector<8x32xf32>
    %cst_141 = arith.constant 1.000000e+00 : f32
    %478 = vector.broadcast %cst_141 : f32 to vector<8x32xf32>
    %479 = arith.addf %478, %477 : vector<8x32xf32>
    %480 = arith.divf %478, %479 : vector<8x32xf32>
    %481 = vector.extract_strided_slice %443 {offsets = [0, 64], sizes = [8, 32], strides = [1, 1]} : vector<8x128xf32> to vector<8x32xf32>
    %482 = math.tanh %481 : vector<8x32xf32>
    %483 = vector.extract_strided_slice %443 {offsets = [0, 96], sizes = [8, 32], strides = [1, 1]} : vector<8x128xf32> to vector<8x32xf32>
    %484 = arith.negf %483 : vector<8x32xf32>
    %485 = math.exp %484 : vector<8x32xf32>
    %cst_142 = arith.constant 1.000000e+00 : f32
    %486 = vector.broadcast %cst_142 : f32 to vector<8x32xf32>
    %487 = arith.addf %486, %485 : vector<8x32xf32>
    %488 = arith.divf %486, %487 : vector<8x32xf32>
    %489 = arith.mulf %480, %430 : vector<8x32xf32>
    %490 = arith.mulf %474, %482 : vector<8x32xf32>
    %491 = arith.addf %489, %490 : vector<8x32xf32>
    %492 = math.tanh %491 : vector<8x32xf32>
    %493 = arith.mulf %488, %492 : vector<8x32xf32>
    %c48_143 = arith.constant 48 : index
    %c0_144 = arith.constant 0 : index
    %494 = vector.load %arg13[%c48_143, %c0_144] : memref<64x64xf32, #tpu.memory_space<vmem>>, vector<8x32xf32>
    tpu.vector_store %arg13[%c48_143, %c0_144], %468 {strides = array<i32>} : memref<64x64xf32, #tpu.memory_space<vmem>>, vector<8x32xf32>,
    %c8_145 = arith.constant 8 : index
    %c32_146 = arith.constant 32 : index
    %495 = vector.load %arg13[%c8_145, %c32_146] : memref<64x64xf32, #tpu.memory_space<vmem>>, vector<8x32xf32>
    tpu.vector_store %arg13[%c8_145, %c32_146], %493 {strides = array<i32>} : memref<64x64xf32, #tpu.memory_space<vmem>>, vector<8x32xf32>,
    %496 = tpu.concatenate %468, %493 in 1 : vector<8x32xf32>, vector<8x32xf32> -> vector<8x64xf32>
    %497 = vector.extract_strided_slice %72 {offsets = [56, 0], sizes = [8, 128], strides = [1, 1]} : vector<64x256xf32> to vector<8x128xf32>
    %498 = vector.extract_strided_slice %72 {offsets = [0, 128], sizes = [8, 128], strides = [1, 1]} : vector<64x256xf32> to vector<8x128xf32>
    %499 = arith.truncf %496 : vector<8x64xf32> to vector<8x64xbf16>
    %cst_147 = arith.constant dense<0.000000e+00> : vector<8x256xf32>
    %500 = tpu.matmul %499, %73, %cst_147 {dimension_numbers = #tpu.dot_dimension_numbers<[1], [0], [0], [1], [0, 0, 1, 1], [], []>} : vector<8x64xbf16>, vector<64x256xbf16>, vector<8x256xf32> -> vector<8x256xf32>
    %501 = vector.extract_strided_slice %500 {offsets = [0, 0], sizes = [8, 128], strides = [1, 1]} : vector<8x256xf32> to vector<8x128xf32>
    %502 = arith.addf %497, %501 : vector<8x128xf32>
    %503 = vector.extract_strided_slice %500 {offsets = [0, 128], sizes = [8, 128], strides = [1, 1]} : vector<8x256xf32> to vector<8x128xf32>
    %504 = arith.addf %498, %503 : vector<8x128xf32>
    %505 = vector.extract_strided_slice %502 {offsets = [0, 0], sizes = [8, 32], strides = [1, 1]} : vector<8x128xf32> to vector<8x32xf32>
    %506 = arith.negf %505 : vector<8x32xf32>
    %507 = math.exp %506 : vector<8x32xf32>
    %cst_148 = arith.constant 1.000000e+00 : f32
    %508 = vector.broadcast %cst_148 : f32 to vector<8x32xf32>
    %509 = arith.addf %508, %507 : vector<8x32xf32>
    %510 = arith.divf %508, %509 : vector<8x32xf32>
    %511 = vector.extract_strided_slice %502 {offsets = [0, 32], sizes = [8, 32], strides = [1, 1]} : vector<8x128xf32> to vector<8x32xf32>
    %512 = arith.negf %511 : vector<8x32xf32>
    %513 = math.exp %512 : vector<8x32xf32>
    %cst_149 = arith.constant 1.000000e+00 : f32
    %514 = vector.broadcast %cst_149 : f32 to vector<8x32xf32>
    %515 = arith.addf %514, %513 : vector<8x32xf32>
    %516 = arith.divf %514, %515 : vector<8x32xf32>
    %517 = vector.extract_strided_slice %502 {offsets = [0, 64], sizes = [8, 32], strides = [1, 1]} : vector<8x128xf32> to vector<8x32xf32>
    %518 = math.tanh %517 : vector<8x32xf32>
    %519 = vector.extract_strided_slice %502 {offsets = [0, 96], sizes = [8, 32], strides = [1, 1]} : vector<8x128xf32> to vector<8x32xf32>
    %520 = arith.negf %519 : vector<8x32xf32>
    %521 = math.exp %520 : vector<8x32xf32>
    %cst_150 = arith.constant 1.000000e+00 : f32
    %522 = vector.broadcast %cst_150 : f32 to vector<8x32xf32>
    %523 = arith.addf %522, %521 : vector<8x32xf32>
    %524 = arith.divf %522, %523 : vector<8x32xf32>
    %525 = arith.mulf %516, %466 : vector<8x32xf32>
    %526 = arith.mulf %510, %518 : vector<8x32xf32>
    %527 = arith.addf %525, %526 : vector<8x32xf32>
    %528 = math.tanh %527 : vector<8x32xf32>
    %529 = arith.mulf %524, %528 : vector<8x32xf32>
    %530 = vector.extract_strided_slice %504 {offsets = [0, 0], sizes = [8, 32], strides = [1, 1]} : vector<8x128xf32> to vector<8x32xf32>
    %531 = arith.negf %530 : vector<8x32xf32>
    %532 = math.exp %531 : vector<8x32xf32>
    %cst_151 = arith.constant 1.000000e+00 : f32
    %533 = vector.broadcast %cst_151 : f32 to vector<8x32xf32>
    %534 = arith.addf %533, %532 : vector<8x32xf32>
    %535 = arith.divf %533, %534 : vector<8x32xf32>
    %536 = vector.extract_strided_slice %504 {offsets = [0, 32], sizes = [8, 32], strides = [1, 1]} : vector<8x128xf32> to vector<8x32xf32>
    %537 = arith.negf %536 : vector<8x32xf32>
    %538 = math.exp %537 : vector<8x32xf32>
    %cst_152 = arith.constant 1.000000e+00 : f32
    %539 = vector.broadcast %cst_152 : f32 to vector<8x32xf32>
    %540 = arith.addf %539, %538 : vector<8x32xf32>
    %541 = arith.divf %539, %540 : vector<8x32xf32>
    %542 = vector.extract_strided_slice %504 {offsets = [0, 64], sizes = [8, 32], strides = [1, 1]} : vector<8x128xf32> to vector<8x32xf32>
    %543 = math.tanh %542 : vector<8x32xf32>
    %544 = vector.extract_strided_slice %504 {offsets = [0, 96], sizes = [8, 32], strides = [1, 1]} : vector<8x128xf32> to vector<8x32xf32>
    %545 = arith.negf %544 : vector<8x32xf32>
    %546 = math.exp %545 : vector<8x32xf32>
    %cst_153 = arith.constant 1.000000e+00 : f32
    %547 = vector.broadcast %cst_153 : f32 to vector<8x32xf32>
    %548 = arith.addf %547, %546 : vector<8x32xf32>
    %549 = arith.divf %547, %548 : vector<8x32xf32>
    %550 = arith.mulf %541, %491 : vector<8x32xf32>
    %551 = arith.mulf %535, %543 : vector<8x32xf32>
    %552 = arith.addf %550, %551 : vector<8x32xf32>
    %553 = math.tanh %552 : vector<8x32xf32>
    %554 = arith.mulf %549, %553 : vector<8x32xf32>
    %c56_154 = arith.constant 56 : index
    %c0_155 = arith.constant 0 : index
    %555 = vector.load %arg13[%c56_154, %c0_155] : memref<64x64xf32, #tpu.memory_space<vmem>>, vector<8x32xf32>
    tpu.vector_store %arg13[%c56_154, %c0_155], %529 {strides = array<i32>} : memref<64x64xf32, #tpu.memory_space<vmem>>, vector<8x32xf32>,
    %c0_156 = arith.constant 0 : index
    %c32_157 = arith.constant 32 : index
    %556 = vector.load %arg13[%c0_156, %c32_157] : memref<64x64xf32, #tpu.memory_space<vmem>>, vector<8x32xf32>
    tpu.vector_store %arg13[%c0_156, %c32_157], %554 {strides = array<i32>} : memref<64x64xf32, #tpu.memory_space<vmem>>, vector<8x32xf32>,
    %c0_158 = arith.constant 0 : index
    %c0_159 = arith.constant 0 : index
    %557 = vector.load %arg13[%c0_158, %c0_159] : memref<64x64xf32, #tpu.memory_space<vmem>>, vector<64x64xf32>
    %558 = arith.truncf %557 : vector<64x64xf32> to vector<64x64xbf16>
    %c0_160 = arith.constant 0 : index
    %c0_161 = arith.constant 0 : index
    %559 = vector.load %arg5[%c0_160, %c0_161] : memref<64x256xbf16, #tpu.memory_space<vmem>>, vector<64x256xbf16>
    %cst_162 = arith.constant dense<0.000000e+00> : vector<64x256xf32>
    %560 = tpu.matmul %558, %559, %cst_162 {dimension_numbers = #tpu.dot_dimension_numbers<[1], [0], [0], [1], [0, 0, 1, 1], [], []>} : vector<64x64xbf16>, vector<64x256xbf16>, vector<64x256xf32> -> vector<64x256xf32>
    %c0_163 = arith.constant 0 : index
    %c0_164 = arith.constant 0 : index
    %561 = vector.load %arg7[%c0_163, %c0_164] : memref<1x256xf32, #tpu.memory_space<vmem>>, vector<1x256xf32>
    %562 = vector.broadcast %561 : vector<1x256xf32> to vector<64x256xf32>
    %563 = arith.addf %560, %562 : vector<64x256xf32>
    %c0_165 = arith.constant 0 : index
    %c0_166 = arith.constant 0 : index
    %564 = vector.load %arg6[%c0_165, %c0_166] : memref<64x256xbf16, #tpu.memory_space<vmem>>, vector<64x256xbf16>
    %cst_167 = arith.constant 0.000000e+00 : f32
    %565 = vector.broadcast %cst_167 : f32 to vector<8x32xf32>
    %cst_168 = arith.constant 0.000000e+00 : f32
    %566 = vector.broadcast %cst_168 : f32 to vector<8x32xf32>
    %567 = vector.extract_strided_slice %563 {offsets = [0, 0], sizes = [8, 128], strides = [1, 1]} : vector<64x256xf32> to vector<8x128xf32>
    %568 = vector.extract_strided_slice %563 {offsets = [56, 128], sizes = [8, 128], strides = [1, 1]} : vector<64x256xf32> to vector<8x128xf32>
    %569 = vector.extract_strided_slice %567 {offsets = [0, 0], sizes = [8, 32], strides = [1, 1]} : vector<8x128xf32> to vector<8x32xf32>
    %570 = arith.negf %569 : vector<8x32xf32>
    %571 = math.exp %570 : vector<8x32xf32>
    %cst_169 = arith.constant 1.000000e+00 : f32
    %572 = vector.broadcast %cst_169 : f32 to vector<8x32xf32>
    %573 = arith.addf %572, %571 : vector<8x32xf32>
    %574 = arith.divf %572, %573 : vector<8x32xf32>
    %575 = vector.extract_strided_slice %567 {offsets = [0, 32], sizes = [8, 32], strides = [1, 1]} : vector<8x128xf32> to vector<8x32xf32>
    %576 = arith.negf %575 : vector<8x32xf32>
    %577 = math.exp %576 : vector<8x32xf32>
    %cst_170 = arith.constant 1.000000e+00 : f32
    %578 = vector.broadcast %cst_170 : f32 to vector<8x32xf32>
    %579 = arith.addf %578, %577 : vector<8x32xf32>
    %580 = arith.divf %578, %579 : vector<8x32xf32>
    %581 = vector.extract_strided_slice %567 {offsets = [0, 64], sizes = [8, 32], strides = [1, 1]} : vector<8x128xf32> to vector<8x32xf32>
    %582 = math.tanh %581 : vector<8x32xf32>
    %583 = vector.extract_strided_slice %567 {offsets = [0, 96], sizes = [8, 32], strides = [1, 1]} : vector<8x128xf32> to vector<8x32xf32>
    %584 = arith.negf %583 : vector<8x32xf32>
    %585 = math.exp %584 : vector<8x32xf32>
    %cst_171 = arith.constant 1.000000e+00 : f32
    %586 = vector.broadcast %cst_171 : f32 to vector<8x32xf32>
    %587 = arith.addf %586, %585 : vector<8x32xf32>
    %588 = arith.divf %586, %587 : vector<8x32xf32>
    %589 = arith.mulf %580, %565 : vector<8x32xf32>
    %590 = arith.mulf %574, %582 : vector<8x32xf32>
    %591 = arith.addf %589, %590 : vector<8x32xf32>
    %592 = math.tanh %591 : vector<8x32xf32>
    %593 = arith.mulf %588, %592 : vector<8x32xf32>
    %594 = vector.extract_strided_slice %568 {offsets = [0, 0], sizes = [8, 32], strides = [1, 1]} : vector<8x128xf32> to vector<8x32xf32>
    %595 = arith.negf %594 : vector<8x32xf32>
    %596 = math.exp %595 : vector<8x32xf32>
    %cst_172 = arith.constant 1.000000e+00 : f32
    %597 = vector.broadcast %cst_172 : f32 to vector<8x32xf32>
    %598 = arith.addf %597, %596 : vector<8x32xf32>
    %599 = arith.divf %597, %598 : vector<8x32xf32>
    %600 = vector.extract_strided_slice %568 {offsets = [0, 32], sizes = [8, 32], strides = [1, 1]} : vector<8x128xf32> to vector<8x32xf32>
    %601 = arith.negf %600 : vector<8x32xf32>
    %602 = math.exp %601 : vector<8x32xf32>
    %cst_173 = arith.constant 1.000000e+00 : f32
    %603 = vector.broadcast %cst_173 : f32 to vector<8x32xf32>
    %604 = arith.addf %603, %602 : vector<8x32xf32>
    %605 = arith.divf %603, %604 : vector<8x32xf32>
    %606 = vector.extract_strided_slice %568 {offsets = [0, 64], sizes = [8, 32], strides = [1, 1]} : vector<8x128xf32> to vector<8x32xf32>
    %607 = math.tanh %606 : vector<8x32xf32>
    %608 = vector.extract_strided_slice %568 {offsets = [0, 96], sizes = [8, 32], strides = [1, 1]} : vector<8x128xf32> to vector<8x32xf32>
    %609 = arith.negf %608 : vector<8x32xf32>
    %610 = math.exp %609 : vector<8x32xf32>
    %cst_174 = arith.constant 1.000000e+00 : f32
    %611 = vector.broadcast %cst_174 : f32 to vector<8x32xf32>
    %612 = arith.addf %611, %610 : vector<8x32xf32>
    %613 = arith.divf %611, %612 : vector<8x32xf32>
    %614 = arith.mulf %605, %566 : vector<8x32xf32>
    %615 = arith.mulf %599, %607 : vector<8x32xf32>
    %616 = arith.addf %614, %615 : vector<8x32xf32>
    %617 = math.tanh %616 : vector<8x32xf32>
    %618 = arith.mulf %613, %617 : vector<8x32xf32>
    %c0_175 = arith.constant 0 : index
    %c0_176 = arith.constant 0 : index
    %619 = vector.load %arg14[%c0_175, %c0_176] : memref<64x64xf32, #tpu.memory_space<vmem>>, vector<8x32xf32>
    tpu.vector_store %arg14[%c0_175, %c0_176], %593 {strides = array<i32>} : memref<64x64xf32, #tpu.memory_space<vmem>>, vector<8x32xf32>,
    %c56_177 = arith.constant 56 : index
    %c32_178 = arith.constant 32 : index
    %620 = vector.load %arg14[%c56_177, %c32_178] : memref<64x64xf32, #tpu.memory_space<vmem>>, vector<8x32xf32>
    tpu.vector_store %arg14[%c56_177, %c32_178], %618 {strides = array<i32>} : memref<64x64xf32, #tpu.memory_space<vmem>>, vector<8x32xf32>,
    %621 = tpu.concatenate %593, %618 in 1 : vector<8x32xf32>, vector<8x32xf32> -> vector<8x64xf32>
    %622 = vector.extract_strided_slice %563 {offsets = [8, 0], sizes = [8, 128], strides = [1, 1]} : vector<64x256xf32> to vector<8x128xf32>
    %623 = vector.extract_strided_slice %563 {offsets = [48, 128], sizes = [8, 128], strides = [1, 1]} : vector<64x256xf32> to vector<8x128xf32>
    %624 = arith.truncf %621 : vector<8x64xf32> to vector<8x64xbf16>
    %cst_179 = arith.constant dense<0.000000e+00> : vector<8x256xf32>
    %625 = tpu.matmul %624, %564, %cst_179 {dimension_numbers = #tpu.dot_dimension_numbers<[1], [0], [0], [1], [0, 0, 1, 1], [], []>} : vector<8x64xbf16>, vector<64x256xbf16>, vector<8x256xf32> -> vector<8x256xf32>
    %626 = vector.extract_strided_slice %625 {offsets = [0, 0], sizes = [8, 128], strides = [1, 1]} : vector<8x256xf32> to vector<8x128xf32>
    %627 = arith.addf %622, %626 : vector<8x128xf32>
    %628 = vector.extract_strided_slice %625 {offsets = [0, 128], sizes = [8, 128], strides = [1, 1]} : vector<8x256xf32> to vector<8x128xf32>
    %629 = arith.addf %623, %628 : vector<8x128xf32>
    %630 = vector.extract_strided_slice %627 {offsets = [0, 0], sizes = [8, 32], strides = [1, 1]} : vector<8x128xf32> to vector<8x32xf32>
    %631 = arith.negf %630 : vector<8x32xf32>
    %632 = math.exp %631 : vector<8x32xf32>
    %cst_180 = arith.constant 1.000000e+00 : f32
    %633 = vector.broadcast %cst_180 : f32 to vector<8x32xf32>
    %634 = arith.addf %633, %632 : vector<8x32xf32>
    %635 = arith.divf %633, %634 : vector<8x32xf32>
    %636 = vector.extract_strided_slice %627 {offsets = [0, 32], sizes = [8, 32], strides = [1, 1]} : vector<8x128xf32> to vector<8x32xf32>
    %637 = arith.negf %636 : vector<8x32xf32>
    %638 = math.exp %637 : vector<8x32xf32>
    %cst_181 = arith.constant 1.000000e+00 : f32
    %639 = vector.broadcast %cst_181 : f32 to vector<8x32xf32>
    %640 = arith.addf %639, %638 : vector<8x32xf32>
    %641 = arith.divf %639, %640 : vector<8x32xf32>
    %642 = vector.extract_strided_slice %627 {offsets = [0, 64], sizes = [8, 32], strides = [1, 1]} : vector<8x128xf32> to vector<8x32xf32>
    %643 = math.tanh %642 : vector<8x32xf32>
    %644 = vector.extract_strided_slice %627 {offsets = [0, 96], sizes = [8, 32], strides = [1, 1]} : vector<8x128xf32> to vector<8x32xf32>
    %645 = arith.negf %644 : vector<8x32xf32>
    %646 = math.exp %645 : vector<8x32xf32>
    %cst_182 = arith.constant 1.000000e+00 : f32
    %647 = vector.broadcast %cst_182 : f32 to vector<8x32xf32>
    %648 = arith.addf %647, %646 : vector<8x32xf32>
    %649 = arith.divf %647, %648 : vector<8x32xf32>
    %650 = arith.mulf %641, %591 : vector<8x32xf32>
    %651 = arith.mulf %635, %643 : vector<8x32xf32>
    %652 = arith.addf %650, %651 : vector<8x32xf32>
    %653 = math.tanh %652 : vector<8x32xf32>
    %654 = arith.mulf %649, %653 : vector<8x32xf32>
    %655 = vector.extract_strided_slice %629 {offsets = [0, 0], sizes = [8, 32], strides = [1, 1]} : vector<8x128xf32> to vector<8x32xf32>
    %656 = arith.negf %655 : vector<8x32xf32>
    %657 = math.exp %656 : vector<8x32xf32>
    %cst_183 = arith.constant 1.000000e+00 : f32
    %658 = vector.broadcast %cst_183 : f32 to vector<8x32xf32>
    %659 = arith.addf %658, %657 : vector<8x32xf32>
    %660 = arith.divf %658, %659 : vector<8x32xf32>
    %661 = vector.extract_strided_slice %629 {offsets = [0, 32], sizes = [8, 32], strides = [1, 1]} : vector<8x128xf32> to vector<8x32xf32>
    %662 = arith.negf %661 : vector<8x32xf32>
    %663 = math.exp %662 : vector<8x32xf32>
    %cst_184 = arith.constant 1.000000e+00 : f32
    %664 = vector.broadcast %cst_184 : f32 to vector<8x32xf32>
    %665 = arith.addf %664, %663 : vector<8x32xf32>
    %666 = arith.divf %664, %665 : vector<8x32xf32>
    %667 = vector.extract_strided_slice %629 {offsets = [0, 64], sizes = [8, 32], strides = [1, 1]} : vector<8x128xf32> to vector<8x32xf32>
    %668 = math.tanh %667 : vector<8x32xf32>
    %669 = vector.extract_strided_slice %629 {offsets = [0, 96], sizes = [8, 32], strides = [1, 1]} : vector<8x128xf32> to vector<8x32xf32>
    %670 = arith.negf %669 : vector<8x32xf32>
    %671 = math.exp %670 : vector<8x32xf32>
    %cst_185 = arith.constant 1.000000e+00 : f32
    %672 = vector.broadcast %cst_185 : f32 to vector<8x32xf32>
    %673 = arith.addf %672, %671 : vector<8x32xf32>
    %674 = arith.divf %672, %673 : vector<8x32xf32>
    %675 = arith.mulf %666, %616 : vector<8x32xf32>
    %676 = arith.mulf %660, %668 : vector<8x32xf32>
    %677 = arith.addf %675, %676 : vector<8x32xf32>
    %678 = math.tanh %677 : vector<8x32xf32>
    %679 = arith.mulf %674, %678 : vector<8x32xf32>
    %c8_186 = arith.constant 8 : index
    %c0_187 = arith.constant 0 : index
    %680 = vector.load %arg14[%c8_186, %c0_187] : memref<64x64xf32, #tpu.memory_space<vmem>>, vector<8x32xf32>
    tpu.vector_store %arg14[%c8_186, %c0_187], %654 {strides = array<i32>} : memref<64x64xf32, #tpu.memory_space<vmem>>, vector<8x32xf32>,
    %c48_188 = arith.constant 48 : index
    %c32_189 = arith.constant 32 : index
    %681 = vector.load %arg14[%c48_188, %c32_189] : memref<64x64xf32, #tpu.memory_space<vmem>>, vector<8x32xf32>
    tpu.vector_store %arg14[%c48_188, %c32_189], %679 {strides = array<i32>} : memref<64x64xf32, #tpu.memory_space<vmem>>, vector<8x32xf32>,
    %682 = tpu.concatenate %654, %679 in 1 : vector<8x32xf32>, vector<8x32xf32> -> vector<8x64xf32>
    %683 = vector.extract_strided_slice %563 {offsets = [16, 0], sizes = [8, 128], strides = [1, 1]} : vector<64x256xf32> to vector<8x128xf32>
    %684 = vector.extract_strided_slice %563 {offsets = [40, 128], sizes = [8, 128], strides = [1, 1]} : vector<64x256xf32> to vector<8x128xf32>
    %685 = arith.truncf %682 : vector<8x64xf32> to vector<8x64xbf16>
    %cst_190 = arith.constant dense<0.000000e+00> : vector<8x256xf32>
    %686 = tpu.matmul %685, %564, %cst_190 {dimension_numbers = #tpu.dot_dimension_numbers<[1], [0], [0], [1], [0, 0, 1, 1], [], []>} : vector<8x64xbf16>, vector<64x256xbf16>, vector<8x256xf32> -> vector<8x256xf32>
    %687 = vector.extract_strided_slice %686 {offsets = [0, 0], sizes = [8, 128], strides = [1, 1]} : vector<8x256xf32> to vector<8x128xf32>
    %688 = arith.addf %683, %687 : vector<8x128xf32>
    %689 = vector.extract_strided_slice %686 {offsets = [0, 128], sizes = [8, 128], strides = [1, 1]} : vector<8x256xf32> to vector<8x128xf32>
    %690 = arith.addf %684, %689 : vector<8x128xf32>
    %691 = vector.extract_strided_slice %688 {offsets = [0, 0], sizes = [8, 32], strides = [1, 1]} : vector<8x128xf32> to vector<8x32xf32>
    %692 = arith.negf %691 : vector<8x32xf32>
    %693 = math.exp %692 : vector<8x32xf32>
    %cst_191 = arith.constant 1.000000e+00 : f32
    %694 = vector.broadcast %cst_191 : f32 to vector<8x32xf32>
    %695 = arith.addf %694, %693 : vector<8x32xf32>
    %696 = arith.divf %694, %695 : vector<8x32xf32>
    %697 = vector.extract_strided_slice %688 {offsets = [0, 32], sizes = [8, 32], strides = [1, 1]} : vector<8x128xf32> to vector<8x32xf32>
    %698 = arith.negf %697 : vector<8x32xf32>
    %699 = math.exp %698 : vector<8x32xf32>
    %cst_192 = arith.constant 1.000000e+00 : f32
    %700 = vector.broadcast %cst_192 : f32 to vector<8x32xf32>
    %701 = arith.addf %700, %699 : vector<8x32xf32>
    %702 = arith.divf %700, %701 : vector<8x32xf32>
    %703 = vector.extract_strided_slice %688 {offsets = [0, 64], sizes = [8, 32], strides = [1, 1]} : vector<8x128xf32> to vector<8x32xf32>
    %704 = math.tanh %703 : vector<8x32xf32>
    %705 = vector.extract_strided_slice %688 {offsets = [0, 96], sizes = [8, 32], strides = [1, 1]} : vector<8x128xf32> to vector<8x32xf32>
    %706 = arith.negf %705 : vector<8x32xf32>
    %707 = math.exp %706 : vector<8x32xf32>
    %cst_193 = arith.constant 1.000000e+00 : f32
    %708 = vector.broadcast %cst_193 : f32 to vector<8x32xf32>
    %709 = arith.addf %708, %707 : vector<8x32xf32>
    %710 = arith.divf %708, %709 : vector<8x32xf32>
    %711 = arith.mulf %702, %652 : vector<8x32xf32>
    %712 = arith.mulf %696, %704 : vector<8x32xf32>
    %713 = arith.addf %711, %712 : vector<8x32xf32>
    %714 = math.tanh %713 : vector<8x32xf32>
    %715 = arith.mulf %710, %714 : vector<8x32xf32>
    %716 = vector.extract_strided_slice %690 {offsets = [0, 0], sizes = [8, 32], strides = [1, 1]} : vector<8x128xf32> to vector<8x32xf32>
    %717 = arith.negf %716 : vector<8x32xf32>
    %718 = math.exp %717 : vector<8x32xf32>
    %cst_194 = arith.constant 1.000000e+00 : f32
    %719 = vector.broadcast %cst_194 : f32 to vector<8x32xf32>
    %720 = arith.addf %719, %718 : vector<8x32xf32>
    %721 = arith.divf %719, %720 : vector<8x32xf32>
    %722 = vector.extract_strided_slice %690 {offsets = [0, 32], sizes = [8, 32], strides = [1, 1]} : vector<8x128xf32> to vector<8x32xf32>
    %723 = arith.negf %722 : vector<8x32xf32>
    %724 = math.exp %723 : vector<8x32xf32>
    %cst_195 = arith.constant 1.000000e+00 : f32
    %725 = vector.broadcast %cst_195 : f32 to vector<8x32xf32>
    %726 = arith.addf %725, %724 : vector<8x32xf32>
    %727 = arith.divf %725, %726 : vector<8x32xf32>
    %728 = vector.extract_strided_slice %690 {offsets = [0, 64], sizes = [8, 32], strides = [1, 1]} : vector<8x128xf32> to vector<8x32xf32>
    %729 = math.tanh %728 : vector<8x32xf32>
    %730 = vector.extract_strided_slice %690 {offsets = [0, 96], sizes = [8, 32], strides = [1, 1]} : vector<8x128xf32> to vector<8x32xf32>
    %731 = arith.negf %730 : vector<8x32xf32>
    %732 = math.exp %731 : vector<8x32xf32>
    %cst_196 = arith.constant 1.000000e+00 : f32
    %733 = vector.broadcast %cst_196 : f32 to vector<8x32xf32>
    %734 = arith.addf %733, %732 : vector<8x32xf32>
    %735 = arith.divf %733, %734 : vector<8x32xf32>
    %736 = arith.mulf %727, %677 : vector<8x32xf32>
    %737 = arith.mulf %721, %729 : vector<8x32xf32>
    %738 = arith.addf %736, %737 : vector<8x32xf32>
    %739 = math.tanh %738 : vector<8x32xf32>
    %740 = arith.mulf %735, %739 : vector<8x32xf32>
    %c16_197 = arith.constant 16 : index
    %c0_198 = arith.constant 0 : index
    %741 = vector.load %arg14[%c16_197, %c0_198] : memref<64x64xf32, #tpu.memory_space<vmem>>, vector<8x32xf32>
    tpu.vector_store %arg14[%c16_197, %c0_198], %715 {strides = array<i32>} : memref<64x64xf32, #tpu.memory_space<vmem>>, vector<8x32xf32>,
    %c40_199 = arith.constant 40 : index
    %c32_200 = arith.constant 32 : index
    %742 = vector.load %arg14[%c40_199, %c32_200] : memref<64x64xf32, #tpu.memory_space<vmem>>, vector<8x32xf32>
    tpu.vector_store %arg14[%c40_199, %c32_200], %740 {strides = array<i32>} : memref<64x64xf32, #tpu.memory_space<vmem>>, vector<8x32xf32>,
    %743 = tpu.concatenate %715, %740 in 1 : vector<8x32xf32>, vector<8x32xf32> -> vector<8x64xf32>
    %744 = vector.extract_strided_slice %563 {offsets = [24, 0], sizes = [8, 128], strides = [1, 1]} : vector<64x256xf32> to vector<8x128xf32>
    %745 = vector.extract_strided_slice %563 {offsets = [32, 128], sizes = [8, 128], strides = [1, 1]} : vector<64x256xf32> to vector<8x128xf32>
    %746 = arith.truncf %743 : vector<8x64xf32> to vector<8x64xbf16>
    %cst_201 = arith.constant dense<0.000000e+00> : vector<8x256xf32>
    %747 = tpu.matmul %746, %564, %cst_201 {dimension_numbers = #tpu.dot_dimension_numbers<[1], [0], [0], [1], [0, 0, 1, 1], [], []>} : vector<8x64xbf16>, vector<64x256xbf16>, vector<8x256xf32> -> vector<8x256xf32>
    %748 = vector.extract_strided_slice %747 {offsets = [0, 0], sizes = [8, 128], strides = [1, 1]} : vector<8x256xf32> to vector<8x128xf32>
    %749 = arith.addf %744, %748 : vector<8x128xf32>
    %750 = vector.extract_strided_slice %747 {offsets = [0, 128], sizes = [8, 128], strides = [1, 1]} : vector<8x256xf32> to vector<8x128xf32>
    %751 = arith.addf %745, %750 : vector<8x128xf32>
    %752 = vector.extract_strided_slice %749 {offsets = [0, 0], sizes = [8, 32], strides = [1, 1]} : vector<8x128xf32> to vector<8x32xf32>
    %753 = arith.negf %752 : vector<8x32xf32>
    %754 = math.exp %753 : vector<8x32xf32>
    %cst_202 = arith.constant 1.000000e+00 : f32
    %755 = vector.broadcast %cst_202 : f32 to vector<8x32xf32>
    %756 = arith.addf %755, %754 : vector<8x32xf32>
    %757 = arith.divf %755, %756 : vector<8x32xf32>
    %758 = vector.extract_strided_slice %749 {offsets = [0, 32], sizes = [8, 32], strides = [1, 1]} : vector<8x128xf32> to vector<8x32xf32>
    %759 = arith.negf %758 : vector<8x32xf32>
    %760 = math.exp %759 : vector<8x32xf32>
    %cst_203 = arith.constant 1.000000e+00 : f32
    %761 = vector.broadcast %cst_203 : f32 to vector<8x32xf32>
    %762 = arith.addf %761, %760 : vector<8x32xf32>
    %763 = arith.divf %761, %762 : vector<8x32xf32>
    %764 = vector.extract_strided_slice %749 {offsets = [0, 64], sizes = [8, 32], strides = [1, 1]} : vector<8x128xf32> to vector<8x32xf32>
    %765 = math.tanh %764 : vector<8x32xf32>
    %766 = vector.extract_strided_slice %749 {offsets = [0, 96], sizes = [8, 32], strides = [1, 1]} : vector<8x128xf32> to vector<8x32xf32>
    %767 = arith.negf %766 : vector<8x32xf32>
    %768 = math.exp %767 : vector<8x32xf32>
    %cst_204 = arith.constant 1.000000e+00 : f32
    %769 = vector.broadcast %cst_204 : f32 to vector<8x32xf32>
    %770 = arith.addf %769, %768 : vector<8x32xf32>
    %771 = arith.divf %769, %770 : vector<8x32xf32>
    %772 = arith.mulf %763, %713 : vector<8x32xf32>
    %773 = arith.mulf %757, %765 : vector<8x32xf32>
    %774 = arith.addf %772, %773 : vector<8x32xf32>
    %775 = math.tanh %774 : vector<8x32xf32>
    %776 = arith.mulf %771, %775 : vector<8x32xf32>
    %777 = vector.extract_strided_slice %751 {offsets = [0, 0], sizes = [8, 32], strides = [1, 1]} : vector<8x128xf32> to vector<8x32xf32>
    %778 = arith.negf %777 : vector<8x32xf32>
    %779 = math.exp %778 : vector<8x32xf32>
    %cst_205 = arith.constant 1.000000e+00 : f32
    %780 = vector.broadcast %cst_205 : f32 to vector<8x32xf32>
    %781 = arith.addf %780, %779 : vector<8x32xf32>
    %782 = arith.divf %780, %781 : vector<8x32xf32>
    %783 = vector.extract_strided_slice %751 {offsets = [0, 32], sizes = [8, 32], strides = [1, 1]} : vector<8x128xf32> to vector<8x32xf32>
    %784 = arith.negf %783 : vector<8x32xf32>
    %785 = math.exp %784 : vector<8x32xf32>
    %cst_206 = arith.constant 1.000000e+00 : f32
    %786 = vector.broadcast %cst_206 : f32 to vector<8x32xf32>
    %787 = arith.addf %786, %785 : vector<8x32xf32>
    %788 = arith.divf %786, %787 : vector<8x32xf32>
    %789 = vector.extract_strided_slice %751 {offsets = [0, 64], sizes = [8, 32], strides = [1, 1]} : vector<8x128xf32> to vector<8x32xf32>
    %790 = math.tanh %789 : vector<8x32xf32>
    %791 = vector.extract_strided_slice %751 {offsets = [0, 96], sizes = [8, 32], strides = [1, 1]} : vector<8x128xf32> to vector<8x32xf32>
    %792 = arith.negf %791 : vector<8x32xf32>
    %793 = math.exp %792 : vector<8x32xf32>
    %cst_207 = arith.constant 1.000000e+00 : f32
    %794 = vector.broadcast %cst_207 : f32 to vector<8x32xf32>
    %795 = arith.addf %794, %793 : vector<8x32xf32>
    %796 = arith.divf %794, %795 : vector<8x32xf32>
    %797 = arith.mulf %788, %738 : vector<8x32xf32>
    %798 = arith.mulf %782, %790 : vector<8x32xf32>
    %799 = arith.addf %797, %798 : vector<8x32xf32>
    %800 = math.tanh %799 : vector<8x32xf32>
    %801 = arith.mulf %796, %800 : vector<8x32xf32>
    %c24_208 = arith.constant 24 : index
    %c0_209 = arith.constant 0 : index
    %802 = vector.load %arg14[%c24_208, %c0_209] : memref<64x64xf32, #tpu.memory_space<vmem>>, vector<8x32xf32>
    tpu.vector_store %arg14[%c24_208, %c0_209], %776 {strides = array<i32>} : memref<64x64xf32, #tpu.memory_space<vmem>>, vector<8x32xf32>,
    %c32_210 = arith.constant 32 : index
    %c32_211 = arith.constant 32 : index
    %803 = vector.load %arg14[%c32_210, %c32_211] : memref<64x64xf32, #tpu.memory_space<vmem>>, vector<8x32xf32>
    tpu.vector_store %arg14[%c32_210, %c32_211], %801 {strides = array<i32>} : memref<64x64xf32, #tpu.memory_space<vmem>>, vector<8x32xf32>,
    %804 = tpu.concatenate %776, %801 in 1 : vector<8x32xf32>, vector<8x32xf32> -> vector<8x64xf32>
    %805 = vector.extract_strided_slice %563 {offsets = [32, 0], sizes = [8, 128], strides = [1, 1]} : vector<64x256xf32> to vector<8x128xf32>
    %806 = vector.extract_strided_slice %563 {offsets = [24, 128], sizes = [8, 128], strides = [1, 1]} : vector<64x256xf32> to vector<8x128xf32>
    %807 = arith.truncf %804 : vector<8x64xf32> to vector<8x64xbf16>
    %cst_212 = arith.constant dense<0.000000e+00> : vector<8x256xf32>
    %808 = tpu.matmul %807, %564, %cst_212 {dimension_numbers = #tpu.dot_dimension_numbers<[1], [0], [0], [1], [0, 0, 1, 1], [], []>} : vector<8x64xbf16>, vector<64x256xbf16>, vector<8x256xf32> -> vector<8x256xf32>
    %809 = vector.extract_strided_slice %808 {offsets = [0, 0], sizes = [8, 128], strides = [1, 1]} : vector<8x256xf32> to vector<8x128xf32>
    %810 = arith.addf %805, %809 : vector<8x128xf32>
    %811 = vector.extract_strided_slice %808 {offsets = [0, 128], sizes = [8, 128], strides = [1, 1]} : vector<8x256xf32> to vector<8x128xf32>
    %812 = arith.addf %806, %811 : vector<8x128xf32>
    %813 = vector.extract_strided_slice %810 {offsets = [0, 0], sizes = [8, 32], strides = [1, 1]} : vector<8x128xf32> to vector<8x32xf32>
    %814 = arith.negf %813 : vector<8x32xf32>
    %815 = math.exp %814 : vector<8x32xf32>
    %cst_213 = arith.constant 1.000000e+00 : f32
    %816 = vector.broadcast %cst_213 : f32 to vector<8x32xf32>
    %817 = arith.addf %816, %815 : vector<8x32xf32>
    %818 = arith.divf %816, %817 : vector<8x32xf32>
    %819 = vector.extract_strided_slice %810 {offsets = [0, 32], sizes = [8, 32], strides = [1, 1]} : vector<8x128xf32> to vector<8x32xf32>
    %820 = arith.negf %819 : vector<8x32xf32>
    %821 = math.exp %820 : vector<8x32xf32>
    %cst_214 = arith.constant 1.000000e+00 : f32
    %822 = vector.broadcast %cst_214 : f32 to vector<8x32xf32>
    %823 = arith.addf %822, %821 : vector<8x32xf32>
    %824 = arith.divf %822, %823 : vector<8x32xf32>
    %825 = vector.extract_strided_slice %810 {offsets = [0, 64], sizes = [8, 32], strides = [1, 1]} : vector<8x128xf32> to vector<8x32xf32>
    %826 = math.tanh %825 : vector<8x32xf32>
    %827 = vector.extract_strided_slice %810 {offsets = [0, 96], sizes = [8, 32], strides = [1, 1]} : vector<8x128xf32> to vector<8x32xf32>
    %828 = arith.negf %827 : vector<8x32xf32>
    %829 = math.exp %828 : vector<8x32xf32>
    %cst_215 = arith.constant 1.000000e+00 : f32
    %830 = vector.broadcast %cst_215 : f32 to vector<8x32xf32>
    %831 = arith.addf %830, %829 : vector<8x32xf32>
    %832 = arith.divf %830, %831 : vector<8x32xf32>
    %833 = arith.mulf %824, %774 : vector<8x32xf32>
    %834 = arith.mulf %818, %826 : vector<8x32xf32>
    %835 = arith.addf %833, %834 : vector<8x32xf32>
    %836 = math.tanh %835 : vector<8x32xf32>
    %837 = arith.mulf %832, %836 : vector<8x32xf32>
    %838 = vector.extract_strided_slice %812 {offsets = [0, 0], sizes = [8, 32], strides = [1, 1]} : vector<8x128xf32> to vector<8x32xf32>
    %839 = arith.negf %838 : vector<8x32xf32>
    %840 = math.exp %839 : vector<8x32xf32>
    %cst_216 = arith.constant 1.000000e+00 : f32
    %841 = vector.broadcast %cst_216 : f32 to vector<8x32xf32>
    %842 = arith.addf %841, %840 : vector<8x32xf32>
    %843 = arith.divf %841, %842 : vector<8x32xf32>
    %844 = vector.extract_strided_slice %812 {offsets = [0, 32], sizes = [8, 32], strides = [1, 1]} : vector<8x128xf32> to vector<8x32xf32>
    %845 = arith.negf %844 : vector<8x32xf32>
    %846 = math.exp %845 : vector<8x32xf32>
    %cst_217 = arith.constant 1.000000e+00 : f32
    %847 = vector.broadcast %cst_217 : f32 to vector<8x32xf32>
    %848 = arith.addf %847, %846 : vector<8x32xf32>
    %849 = arith.divf %847, %848 : vector<8x32xf32>
    %850 = vector.extract_strided_slice %812 {offsets = [0, 64], sizes = [8, 32], strides = [1, 1]} : vector<8x128xf32> to vector<8x32xf32>
    %851 = math.tanh %850 : vector<8x32xf32>
    %852 = vector.extract_strided_slice %812 {offsets = [0, 96], sizes = [8, 32], strides = [1, 1]} : vector<8x128xf32> to vector<8x32xf32>
    %853 = arith.negf %852 : vector<8x32xf32>
    %854 = math.exp %853 : vector<8x32xf32>
    %cst_218 = arith.constant 1.000000e+00 : f32
    %855 = vector.broadcast %cst_218 : f32 to vector<8x32xf32>
    %856 = arith.addf %855, %854 : vector<8x32xf32>
    %857 = arith.divf %855, %856 : vector<8x32xf32>
    %858 = arith.mulf %849, %799 : vector<8x32xf32>
    %859 = arith.mulf %843, %851 : vector<8x32xf32>
    %860 = arith.addf %858, %859 : vector<8x32xf32>
    %861 = math.tanh %860 : vector<8x32xf32>
    %862 = arith.mulf %857, %861 : vector<8x32xf32>
    %c32_219 = arith.constant 32 : index
    %c0_220 = arith.constant 0 : index
    %863 = vector.load %arg14[%c32_219, %c0_220] : memref<64x64xf32, #tpu.memory_space<vmem>>, vector<8x32xf32>
    tpu.vector_store %arg14[%c32_219, %c0_220], %837 {strides = array<i32>} : memref<64x64xf32, #tpu.memory_space<vmem>>, vector<8x32xf32>,
    %c24_221 = arith.constant 24 : index
    %c32_222 = arith.constant 32 : index
    %864 = vector.load %arg14[%c24_221, %c32_222] : memref<64x64xf32, #tpu.memory_space<vmem>>, vector<8x32xf32>
    tpu.vector_store %arg14[%c24_221, %c32_222], %862 {strides = array<i32>} : memref<64x64xf32, #tpu.memory_space<vmem>>, vector<8x32xf32>,
    %865 = tpu.concatenate %837, %862 in 1 : vector<8x32xf32>, vector<8x32xf32> -> vector<8x64xf32>
    %866 = vector.extract_strided_slice %563 {offsets = [40, 0], sizes = [8, 128], strides = [1, 1]} : vector<64x256xf32> to vector<8x128xf32>
    %867 = vector.extract_strided_slice %563 {offsets = [16, 128], sizes = [8, 128], strides = [1, 1]} : vector<64x256xf32> to vector<8x128xf32>
    %868 = arith.truncf %865 : vector<8x64xf32> to vector<8x64xbf16>
    %cst_223 = arith.constant dense<0.000000e+00> : vector<8x256xf32>
    %869 = tpu.matmul %868, %564, %cst_223 {dimension_numbers = #tpu.dot_dimension_numbers<[1], [0], [0], [1], [0, 0, 1, 1], [], []>} : vector<8x64xbf16>, vector<64x256xbf16>, vector<8x256xf32> -> vector<8x256xf32>
    %870 = vector.extract_strided_slice %869 {offsets = [0, 0], sizes = [8, 128], strides = [1, 1]} : vector<8x256xf32> to vector<8x128xf32>
    %871 = arith.addf %866, %870 : vector<8x128xf32>
    %872 = vector.extract_strided_slice %869 {offsets = [0, 128], sizes = [8, 128], strides = [1, 1]} : vector<8x256xf32> to vector<8x128xf32>
    %873 = arith.addf %867, %872 : vector<8x128xf32>
    %874 = vector.extract_strided_slice %871 {offsets = [0, 0], sizes = [8, 32], strides = [1, 1]} : vector<8x128xf32> to vector<8x32xf32>
    %875 = arith.negf %874 : vector<8x32xf32>
    %876 = math.exp %875 : vector<8x32xf32>
    %cst_224 = arith.constant 1.000000e+00 : f32
    %877 = vector.broadcast %cst_224 : f32 to vector<8x32xf32>
    %878 = arith.addf %877, %876 : vector<8x32xf32>
    %879 = arith.divf %877, %878 : vector<8x32xf32>
    %880 = vector.extract_strided_slice %871 {offsets = [0, 32], sizes = [8, 32], strides = [1, 1]} : vector<8x128xf32> to vector<8x32xf32>
    %881 = arith.negf %880 : vector<8x32xf32>
    %882 = math.exp %881 : vector<8x32xf32>
    %cst_225 = arith.constant 1.000000e+00 : f32
    %883 = vector.broadcast %cst_225 : f32 to vector<8x32xf32>
    %884 = arith.addf %883, %882 : vector<8x32xf32>
    %885 = arith.divf %883, %884 : vector<8x32xf32>
    %886 = vector.extract_strided_slice %871 {offsets = [0, 64], sizes = [8, 32], strides = [1, 1]} : vector<8x128xf32> to vector<8x32xf32>
    %887 = math.tanh %886 : vector<8x32xf32>
    %888 = vector.extract_strided_slice %871 {offsets = [0, 96], sizes = [8, 32], strides = [1, 1]} : vector<8x128xf32> to vector<8x32xf32>
    %889 = arith.negf %888 : vector<8x32xf32>
    %890 = math.exp %889 : vector<8x32xf32>
    %cst_226 = arith.constant 1.000000e+00 : f32
    %891 = vector.broadcast %cst_226 : f32 to vector<8x32xf32>
    %892 = arith.addf %891, %890 : vector<8x32xf32>
    %893 = arith.divf %891, %892 : vector<8x32xf32>
    %894 = arith.mulf %885, %835 : vector<8x32xf32>
    %895 = arith.mulf %879, %887 : vector<8x32xf32>
    %896 = arith.addf %894, %895 : vector<8x32xf32>
    %897 = math.tanh %896 : vector<8x32xf32>
    %898 = arith.mulf %893, %897 : vector<8x32xf32>
    %899 = vector.extract_strided_slice %873 {offsets = [0, 0], sizes = [8, 32], strides = [1, 1]} : vector<8x128xf32> to vector<8x32xf32>
    %900 = arith.negf %899 : vector<8x32xf32>
    %901 = math.exp %900 : vector<8x32xf32>
    %cst_227 = arith.constant 1.000000e+00 : f32
    %902 = vector.broadcast %cst_227 : f32 to vector<8x32xf32>
    %903 = arith.addf %902, %901 : vector<8x32xf32>
    %904 = arith.divf %902, %903 : vector<8x32xf32>
    %905 = vector.extract_strided_slice %873 {offsets = [0, 32], sizes = [8, 32], strides = [1, 1]} : vector<8x128xf32> to vector<8x32xf32>
    %906 = arith.negf %905 : vector<8x32xf32>
    %907 = math.exp %906 : vector<8x32xf32>
    %cst_228 = arith.constant 1.000000e+00 : f32
    %908 = vector.broadcast %cst_228 : f32 to vector<8x32xf32>
    %909 = arith.addf %908, %907 : vector<8x32xf32>
    %910 = arith.divf %908, %909 : vector<8x32xf32>
    %911 = vector.extract_strided_slice %873 {offsets = [0, 64], sizes = [8, 32], strides = [1, 1]} : vector<8x128xf32> to vector<8x32xf32>
    %912 = math.tanh %911 : vector<8x32xf32>
    %913 = vector.extract_strided_slice %873 {offsets = [0, 96], sizes = [8, 32], strides = [1, 1]} : vector<8x128xf32> to vector<8x32xf32>
    %914 = arith.negf %913 : vector<8x32xf32>
    %915 = math.exp %914 : vector<8x32xf32>
    %cst_229 = arith.constant 1.000000e+00 : f32
    %916 = vector.broadcast %cst_229 : f32 to vector<8x32xf32>
    %917 = arith.addf %916, %915 : vector<8x32xf32>
    %918 = arith.divf %916, %917 : vector<8x32xf32>
    %919 = arith.mulf %910, %860 : vector<8x32xf32>
    %920 = arith.mulf %904, %912 : vector<8x32xf32>
    %921 = arith.addf %919, %920 : vector<8x32xf32>
    %922 = math.tanh %921 : vector<8x32xf32>
    %923 = arith.mulf %918, %922 : vector<8x32xf32>
    %c40_230 = arith.constant 40 : index
    %c0_231 = arith.constant 0 : index
    %924 = vector.load %arg14[%c40_230, %c0_231] : memref<64x64xf32, #tpu.memory_space<vmem>>, vector<8x32xf32>
    tpu.vector_store %arg14[%c40_230, %c0_231], %898 {strides = array<i32>} : memref<64x64xf32, #tpu.memory_space<vmem>>, vector<8x32xf32>,
    %c16_232 = arith.constant 16 : index
    %c32_233 = arith.constant 32 : index
    %925 = vector.load %arg14[%c16_232, %c32_233] : memref<64x64xf32, #tpu.memory_space<vmem>>, vector<8x32xf32>
    tpu.vector_store %arg14[%c16_232, %c32_233], %923 {strides = array<i32>} : memref<64x64xf32, #tpu.memory_space<vmem>>, vector<8x32xf32>,
    %926 = tpu.concatenate %898, %923 in 1 : vector<8x32xf32>, vector<8x32xf32> -> vector<8x64xf32>
    %927 = vector.extract_strided_slice %563 {offsets = [48, 0], sizes = [8, 128], strides = [1, 1]} : vector<64x256xf32> to vector<8x128xf32>
    %928 = vector.extract_strided_slice %563 {offsets = [8, 128], sizes = [8, 128], strides = [1, 1]} : vector<64x256xf32> to vector<8x128xf32>
    %929 = arith.truncf %926 : vector<8x64xf32> to vector<8x64xbf16>
    %cst_234 = arith.constant dense<0.000000e+00> : vector<8x256xf32>
    %930 = tpu.matmul %929, %564, %cst_234 {dimension_numbers = #tpu.dot_dimension_numbers<[1], [0], [0], [1], [0, 0, 1, 1], [], []>} : vector<8x64xbf16>, vector<64x256xbf16>, vector<8x256xf32> -> vector<8x256xf32>
    %931 = vector.extract_strided_slice %930 {offsets = [0, 0], sizes = [8, 128], strides = [1, 1]} : vector<8x256xf32> to vector<8x128xf32>
    %932 = arith.addf %927, %931 : vector<8x128xf32>
    %933 = vector.extract_strided_slice %930 {offsets = [0, 128], sizes = [8, 128], strides = [1, 1]} : vector<8x256xf32> to vector<8x128xf32>
    %934 = arith.addf %928, %933 : vector<8x128xf32>
    %935 = vector.extract_strided_slice %932 {offsets = [0, 0], sizes = [8, 32], strides = [1, 1]} : vector<8x128xf32> to vector<8x32xf32>
    %936 = arith.negf %935 : vector<8x32xf32>
    %937 = math.exp %936 : vector<8x32xf32>
    %cst_235 = arith.constant 1.000000e+00 : f32
    %938 = vector.broadcast %cst_235 : f32 to vector<8x32xf32>
    %939 = arith.addf %938, %937 : vector<8x32xf32>
    %940 = arith.divf %938, %939 : vector<8x32xf32>
    %941 = vector.extract_strided_slice %932 {offsets = [0, 32], sizes = [8, 32], strides = [1, 1]} : vector<8x128xf32> to vector<8x32xf32>
    %942 = arith.negf %941 : vector<8x32xf32>
    %943 = math.exp %942 : vector<8x32xf32>
    %cst_236 = arith.constant 1.000000e+00 : f32
    %944 = vector.broadcast %cst_236 : f32 to vector<8x32xf32>
    %945 = arith.addf %944, %943 : vector<8x32xf32>
    %946 = arith.divf %944, %945 : vector<8x32xf32>
    %947 = vector.extract_strided_slice %932 {offsets = [0, 64], sizes = [8, 32], strides = [1, 1]} : vector<8x128xf32> to vector<8x32xf32>
    %948 = math.tanh %947 : vector<8x32xf32>
    %949 = vector.extract_strided_slice %932 {offsets = [0, 96], sizes = [8, 32], strides = [1, 1]} : vector<8x128xf32> to vector<8x32xf32>
    %950 = arith.negf %949 : vector<8x32xf32>
    %951 = math.exp %950 : vector<8x32xf32>
    %cst_237 = arith.constant 1.000000e+00 : f32
    %952 = vector.broadcast %cst_237 : f32 to vector<8x32xf32>
    %953 = arith.addf %952, %951 : vector<8x32xf32>
    %954 = arith.divf %952, %953 : vector<8x32xf32>
    %955 = arith.mulf %946, %896 : vector<8x32xf32>
    %956 = arith.mulf %940, %948 : vector<8x32xf32>
    %957 = arith.addf %955, %956 : vector<8x32xf32>
    %958 = math.tanh %957 : vector<8x32xf32>
    %959 = arith.mulf %954, %958 : vector<8x32xf32>
    %960 = vector.extract_strided_slice %934 {offsets = [0, 0], sizes = [8, 32], strides = [1, 1]} : vector<8x128xf32> to vector<8x32xf32>
    %961 = arith.negf %960 : vector<8x32xf32>
    %962 = math.exp %961 : vector<8x32xf32>
    %cst_238 = arith.constant 1.000000e+00 : f32
    %963 = vector.broadcast %cst_238 : f32 to vector<8x32xf32>
    %964 = arith.addf %963, %962 : vector<8x32xf32>
    %965 = arith.divf %963, %964 : vector<8x32xf32>
    %966 = vector.extract_strided_slice %934 {offsets = [0, 32], sizes = [8, 32], strides = [1, 1]} : vector<8x128xf32> to vector<8x32xf32>
    %967 = arith.negf %966 : vector<8x32xf32>
    %968 = math.exp %967 : vector<8x32xf32>
    %cst_239 = arith.constant 1.000000e+00 : f32
    %969 = vector.broadcast %cst_239 : f32 to vector<8x32xf32>
    %970 = arith.addf %969, %968 : vector<8x32xf32>
    %971 = arith.divf %969, %970 : vector<8x32xf32>
    %972 = vector.extract_strided_slice %934 {offsets = [0, 64], sizes = [8, 32], strides = [1, 1]} : vector<8x128xf32> to vector<8x32xf32>
    %973 = math.tanh %972 : vector<8x32xf32>
    %974 = vector.extract_strided_slice %934 {offsets = [0, 96], sizes = [8, 32], strides = [1, 1]} : vector<8x128xf32> to vector<8x32xf32>
    %975 = arith.negf %974 : vector<8x32xf32>
    %976 = math.exp %975 : vector<8x32xf32>
    %cst_240 = arith.constant 1.000000e+00 : f32
    %977 = vector.broadcast %cst_240 : f32 to vector<8x32xf32>
    %978 = arith.addf %977, %976 : vector<8x32xf32>
    %979 = arith.divf %977, %978 : vector<8x32xf32>
    %980 = arith.mulf %971, %921 : vector<8x32xf32>
    %981 = arith.mulf %965, %973 : vector<8x32xf32>
    %982 = arith.addf %980, %981 : vector<8x32xf32>
    %983 = math.tanh %982 : vector<8x32xf32>
    %984 = arith.mulf %979, %983 : vector<8x32xf32>
    %c48_241 = arith.constant 48 : index
    %c0_242 = arith.constant 0 : index
    %985 = vector.load %arg14[%c48_241, %c0_242] : memref<64x64xf32, #tpu.memory_space<vmem>>, vector<8x32xf32>
    tpu.vector_store %arg14[%c48_241, %c0_242], %959 {strides = array<i32>} : memref<64x64xf32, #tpu.memory_space<vmem>>, vector<8x32xf32>,
    %c8_243 = arith.constant 8 : index
    %c32_244 = arith.constant 32 : index
    %986 = vector.load %arg14[%c8_243, %c32_244] : memref<64x64xf32, #tpu.memory_space<vmem>>, vector<8x32xf32>
    tpu.vector_store %arg14[%c8_243, %c32_244], %984 {strides = array<i32>} : memref<64x64xf32, #tpu.memory_space<vmem>>, vector<8x32xf32>,
    %987 = tpu.concatenate %959, %984 in 1 : vector<8x32xf32>, vector<8x32xf32> -> vector<8x64xf32>
    %988 = vector.extract_strided_slice %563 {offsets = [56, 0], sizes = [8, 128], strides = [1, 1]} : vector<64x256xf32> to vector<8x128xf32>
    %989 = vector.extract_strided_slice %563 {offsets = [0, 128], sizes = [8, 128], strides = [1, 1]} : vector<64x256xf32> to vector<8x128xf32>
    %990 = arith.truncf %987 : vector<8x64xf32> to vector<8x64xbf16>
    %cst_245 = arith.constant dense<0.000000e+00> : vector<8x256xf32>
    %991 = tpu.matmul %990, %564, %cst_245 {dimension_numbers = #tpu.dot_dimension_numbers<[1], [0], [0], [1], [0, 0, 1, 1], [], []>} : vector<8x64xbf16>, vector<64x256xbf16>, vector<8x256xf32> -> vector<8x256xf32>
    %992 = vector.extract_strided_slice %991 {offsets = [0, 0], sizes = [8, 128], strides = [1, 1]} : vector<8x256xf32> to vector<8x128xf32>
    %993 = arith.addf %988, %992 : vector<8x128xf32>
    %994 = vector.extract_strided_slice %991 {offsets = [0, 128], sizes = [8, 128], strides = [1, 1]} : vector<8x256xf32> to vector<8x128xf32>
    %995 = arith.addf %989, %994 : vector<8x128xf32>
    %996 = vector.extract_strided_slice %993 {offsets = [0, 0], sizes = [8, 32], strides = [1, 1]} : vector<8x128xf32> to vector<8x32xf32>
    %997 = arith.negf %996 : vector<8x32xf32>
    %998 = math.exp %997 : vector<8x32xf32>
    %cst_246 = arith.constant 1.000000e+00 : f32
    %999 = vector.broadcast %cst_246 : f32 to vector<8x32xf32>
    %1000 = arith.addf %999, %998 : vector<8x32xf32>
    %1001 = arith.divf %999, %1000 : vector<8x32xf32>
    %1002 = vector.extract_strided_slice %993 {offsets = [0, 32], sizes = [8, 32], strides = [1, 1]} : vector<8x128xf32> to vector<8x32xf32>
    %1003 = arith.negf %1002 : vector<8x32xf32>
    %1004 = math.exp %1003 : vector<8x32xf32>
    %cst_247 = arith.constant 1.000000e+00 : f32
    %1005 = vector.broadcast %cst_247 : f32 to vector<8x32xf32>
    %1006 = arith.addf %1005, %1004 : vector<8x32xf32>
    %1007 = arith.divf %1005, %1006 : vector<8x32xf32>
    %1008 = vector.extract_strided_slice %993 {offsets = [0, 64], sizes = [8, 32], strides = [1, 1]} : vector<8x128xf32> to vector<8x32xf32>
    %1009 = math.tanh %1008 : vector<8x32xf32>
    %1010 = vector.extract_strided_slice %993 {offsets = [0, 96], sizes = [8, 32], strides = [1, 1]} : vector<8x128xf32> to vector<8x32xf32>
    %1011 = arith.negf %1010 : vector<8x32xf32>
    %1012 = math.exp %1011 : vector<8x32xf32>
    %cst_248 = arith.constant 1.000000e+00 : f32
    %1013 = vector.broadcast %cst_248 : f32 to vector<8x32xf32>
    %1014 = arith.addf %1013, %1012 : vector<8x32xf32>
    %1015 = arith.divf %1013, %1014 : vector<8x32xf32>
    %1016 = arith.mulf %1007, %957 : vector<8x32xf32>
    %1017 = arith.mulf %1001, %1009 : vector<8x32xf32>
    %1018 = arith.addf %1016, %1017 : vector<8x32xf32>
    %1019 = math.tanh %1018 : vector<8x32xf32>
    %1020 = arith.mulf %1015, %1019 : vector<8x32xf32>
    %1021 = vector.extract_strided_slice %995 {offsets = [0, 0], sizes = [8, 32], strides = [1, 1]} : vector<8x128xf32> to vector<8x32xf32>
    %1022 = arith.negf %1021 : vector<8x32xf32>
    %1023 = math.exp %1022 : vector<8x32xf32>
    %cst_249 = arith.constant 1.000000e+00 : f32
    %1024 = vector.broadcast %cst_249 : f32 to vector<8x32xf32>
    %1025 = arith.addf %1024, %1023 : vector<8x32xf32>
    %1026 = arith.divf %1024, %1025 : vector<8x32xf32>
    %1027 = vector.extract_strided_slice %995 {offsets = [0, 32], sizes = [8, 32], strides = [1, 1]} : vector<8x128xf32> to vector<8x32xf32>
    %1028 = arith.negf %1027 : vector<8x32xf32>
    %1029 = math.exp %1028 : vector<8x32xf32>
    %cst_250 = arith.constant 1.000000e+00 : f32
    %1030 = vector.broadcast %cst_250 : f32 to vector<8x32xf32>
    %1031 = arith.addf %1030, %1029 : vector<8x32xf32>
    %1032 = arith.divf %1030, %1031 : vector<8x32xf32>
    %1033 = vector.extract_strided_slice %995 {offsets = [0, 64], sizes = [8, 32], strides = [1, 1]} : vector<8x128xf32> to vector<8x32xf32>
    %1034 = math.tanh %1033 : vector<8x32xf32>
    %1035 = vector.extract_strided_slice %995 {offsets = [0, 96], sizes = [8, 32], strides = [1, 1]} : vector<8x128xf32> to vector<8x32xf32>
    %1036 = arith.negf %1035 : vector<8x32xf32>
    %1037 = math.exp %1036 : vector<8x32xf32>
    %cst_251 = arith.constant 1.000000e+00 : f32
    %1038 = vector.broadcast %cst_251 : f32 to vector<8x32xf32>
    %1039 = arith.addf %1038, %1037 : vector<8x32xf32>
    %1040 = arith.divf %1038, %1039 : vector<8x32xf32>
    %1041 = arith.mulf %1032, %982 : vector<8x32xf32>
    %1042 = arith.mulf %1026, %1034 : vector<8x32xf32>
    %1043 = arith.addf %1041, %1042 : vector<8x32xf32>
    %1044 = math.tanh %1043 : vector<8x32xf32>
    %1045 = arith.mulf %1040, %1044 : vector<8x32xf32>
    %c56_252 = arith.constant 56 : index
    %c0_253 = arith.constant 0 : index
    %1046 = vector.load %arg14[%c56_252, %c0_253] : memref<64x64xf32, #tpu.memory_space<vmem>>, vector<8x32xf32>
    tpu.vector_store %arg14[%c56_252, %c0_253], %1020 {strides = array<i32>} : memref<64x64xf32, #tpu.memory_space<vmem>>, vector<8x32xf32>,
    %c0_254 = arith.constant 0 : index
    %c32_255 = arith.constant 32 : index
    %1047 = vector.load %arg14[%c0_254, %c32_255] : memref<64x64xf32, #tpu.memory_space<vmem>>, vector<8x32xf32>
    tpu.vector_store %arg14[%c0_254, %c32_255], %1045 {strides = array<i32>} : memref<64x64xf32, #tpu.memory_space<vmem>>, vector<8x32xf32>,
    %c0_256 = arith.constant 0 : index
    %c0_257 = arith.constant 0 : index
    %1048 = vector.load %arg14[%c0_256, %c0_257] : memref<64x64xf32, #tpu.memory_space<vmem>>, vector<64x64xf32>
    %1049 = arith.truncf %1048 : vector<64x64xf32> to vector<64x64xbf16>
    %c0_258 = arith.constant 0 : index
    %c0_259 = arith.constant 0 : index
    %1050 = vector.load %arg8[%c0_258, %c0_259] : memref<64x2xbf16, #tpu.memory_space<vmem>>, vector<64x2xbf16>
    %cst_260 = arith.constant dense<0.000000e+00> : vector<64x2xf32>
    %1051 = tpu.matmul %1049, %1050, %cst_260 {dimension_numbers = #tpu.dot_dimension_numbers<[1], [0], [0], [1], [0, 0, 1, 1], [], []>} : vector<64x64xbf16>, vector<64x2xbf16>, vector<64x2xf32> -> vector<64x2xf32>
    %1052 = vector.extract_strided_slice %1051 {offsets = [0, 0], sizes = [64, 1], strides = [1, 1]} : vector<64x2xf32> to vector<64x1xf32>
    %c0_261 = arith.constant 0 : index
    %1053 = memref.load %arg9[%c0_261] : memref<1xf32, #tpu.memory_space<smem>>
    %1054 = vector.broadcast %1053 : f32 to vector<64x1xf32>
    %1055 = arith.addf %1052, %1054 : vector<64x1xf32>
    %1056 = vector.extract_strided_slice %1051 {offsets = [0, 1], sizes = [64, 1], strides = [1, 1]} : vector<64x2xf32> to vector<64x1xf32>
    %1057 = vector.extract_strided_slice %1055 {offsets = [0, 0], sizes = [8, 1], strides = [1, 1]} : vector<64x1xf32> to vector<8x1xf32>
    %1058 = vector.extract_strided_slice %1055 {offsets = [8, 0], sizes = [8, 1], strides = [1, 1]} : vector<64x1xf32> to vector<8x1xf32>
    %1059 = vector.extract_strided_slice %1055 {offsets = [16, 0], sizes = [8, 1], strides = [1, 1]} : vector<64x1xf32> to vector<8x1xf32>
    %1060 = vector.extract_strided_slice %1055 {offsets = [24, 0], sizes = [8, 1], strides = [1, 1]} : vector<64x1xf32> to vector<8x1xf32>
    %1061 = vector.extract_strided_slice %1055 {offsets = [32, 0], sizes = [8, 1], strides = [1, 1]} : vector<64x1xf32> to vector<8x1xf32>
    %1062 = vector.extract_strided_slice %1055 {offsets = [40, 0], sizes = [8, 1], strides = [1, 1]} : vector<64x1xf32> to vector<8x1xf32>
    %1063 = vector.extract_strided_slice %1055 {offsets = [48, 0], sizes = [8, 1], strides = [1, 1]} : vector<64x1xf32> to vector<8x1xf32>
    %1064 = vector.extract_strided_slice %1055 {offsets = [56, 0], sizes = [8, 1], strides = [1, 1]} : vector<64x1xf32> to vector<8x1xf32>
    %1065 = tpu.concatenate %1057, %1058, %1059, %1060, %1061, %1062, %1063, %1064 in 1 : vector<8x1xf32>, vector<8x1xf32>, vector<8x1xf32>, vector<8x1xf32>, vector<8x1xf32>, vector<8x1xf32>, vector<8x1xf32>, vector<8x1xf32> -> vector<8x8xf32>
    %1066 = vector.extract_strided_slice %1056 {offsets = [0, 0], sizes = [8, 1], strides = [1, 1]} : vector<64x1xf32> to vector<8x1xf32>
    %1067 = vector.extract_strided_slice %1056 {offsets = [8, 0], sizes = [8, 1], strides = [1, 1]} : vector<64x1xf32> to vector<8x1xf32>
    %1068 = vector.extract_strided_slice %1056 {offsets = [16, 0], sizes = [8, 1], strides = [1, 1]} : vector<64x1xf32> to vector<8x1xf32>
    %1069 = vector.extract_strided_slice %1056 {offsets = [24, 0], sizes = [8, 1], strides = [1, 1]} : vector<64x1xf32> to vector<8x1xf32>
    %1070 = vector.extract_strided_slice %1056 {offsets = [32, 0], sizes = [8, 1], strides = [1, 1]} : vector<64x1xf32> to vector<8x1xf32>
    %1071 = vector.extract_strided_slice %1056 {offsets = [40, 0], sizes = [8, 1], strides = [1, 1]} : vector<64x1xf32> to vector<8x1xf32>
    %1072 = vector.extract_strided_slice %1056 {offsets = [48, 0], sizes = [8, 1], strides = [1, 1]} : vector<64x1xf32> to vector<8x1xf32>
    %1073 = vector.extract_strided_slice %1056 {offsets = [56, 0], sizes = [8, 1], strides = [1, 1]} : vector<64x1xf32> to vector<8x1xf32>
    %1074 = tpu.concatenate %1066, %1067, %1068, %1069, %1070, %1071, %1072, %1073 in 1 : vector<8x1xf32>, vector<8x1xf32>, vector<8x1xf32>, vector<8x1xf32>, vector<8x1xf32>, vector<8x1xf32>, vector<8x1xf32>, vector<8x1xf32> -> vector<8x8xf32>
    %cst_262 = arith.constant dense<0xFF800000> : vector<8xf32>
    %1075 = vector.multi_reduction <maximumf>, %1065, %cst_262 [1] : vector<8x8xf32> to vector<8xf32>
    %1076 = vector.shape_cast %1075 : vector<8xf32> to vector<8x1xf32>
    %1077 = vector.broadcast %1076 : vector<8x1xf32> to vector<8x8xf32>
    %1078 = arith.subf %1065, %1077 : vector<8x8xf32>
    %1079 = math.exp %1078 : vector<8x8xf32>
    %cst_263 = arith.constant dense<0.000000e+00> : vector<8xf32>
    %1080 = vector.multi_reduction <add>, %1079, %cst_263 [1] : vector<8x8xf32> to vector<8xf32>
    %1081 = vector.shape_cast %1080 : vector<8xf32> to vector<8x1xf32>
    %1082 = tpu.reciprocal %1081 {approx = true} : vector<8x1xf32> -> vector<8x1xf32>
    %1083 = vector.broadcast %1082 : vector<8x1xf32> to vector<8x8xf32>
    %1084 = arith.mulf %1079, %1083 : vector<8x8xf32>
    %1085 = arith.mulf %1084, %1074 : vector<8x8xf32>
    %cst_264 = arith.constant dense<0.000000e+00> : vector<8xf32>
    %1086 = vector.multi_reduction <add>, %1085, %cst_264 [1] : vector<8x8xf32> to vector<8xf32>
    %1087 = vector.shape_cast %1086 : vector<8xf32> to vector<8x1xf32>
    %c0_265 = arith.constant 0 : index
    %1088 = memref.load %arg10[%c0_265] : memref<1xf32, #tpu.memory_space<smem>>
    %1089 = vector.broadcast %1088 : f32 to vector<8x1xf32>
    %1090 = arith.addf %1087, %1089 : vector<8x1xf32>
    %cst_266 = arith.constant 0.000000e+00 : f32
    %1091 = vector.broadcast %cst_266 : f32 to vector<8x119xf32>
    %1092 = tpu.concatenate %1090, %1084, %1091 in 1 : vector<8x1xf32>, vector<8x8xf32>, vector<8x119xf32> -> vector<8x128xf32>
    %c0_267 = arith.constant 0 : index
    %c0_268 = arith.constant 0 : index
    %1093 = vector.load %arg11[%c0_267, %c0_268] : memref<8x128xf32, #tpu.memory_space<vmem>>, vector<8x128xf32>
    tpu.vector_store %arg11[%c0_267, %c0_268], %1092 {strides = array<i32>} : memref<8x128xf32, #tpu.memory_space<vmem>>, vector<8x128xf32>,
    return
  }
}

</mosaic_0001>

<bundles_post_ra>
// kernel: tpu_custom_call.1
= control target key start
LH: loop header
LB: loop body
LE: loop exit
PB: predicated region body
PF: predicated region fallthrough
CT: control target
= control target key end

     0   :  { %18 = vsyncpa [#allocation10], 0  ;;  %s3723_s0 = inlined_call_operand.hbm [shape: s32[2,8], index: 0, kind: input, shape index: {}]   ;;  %s3724_s1 = inlined_call_operand.vmem [shape: f32[50,32], index: 1, kind: input, shape index: {}]   ;;  %s3725_s2 = inlined_call_operand.hbm [shape: bf16[32,256], index: 2, kind: input, shape index: {}]   ;;  %s3726_s3 = inlined_call_operand.vmem [shape: bf16[64,256], index: 3, kind: input, shape index: {}]   ;;  %s3727_s4 = inlined_call_operand.vmem [shape: f32[1,256], index: 4, kind: input, shape index: {}]   ;;  %s3728_s5 = inlined_call_operand.vmem [shape: bf16[64,256], index: 5, kind: input, shape index: {}]   ;;  %s3729_s6 = inlined_call_operand.hbm [shape: bf16[64,256], index: 6, kind: input, shape index: {}]   ;;  %s3730_s7 = inlined_call_operand.vmem [shape: f32[1,256], index: 7, kind: input, shape index: {}]   ;;  %s3731_s8 = inlined_call_operand.vmem [shape: bf16[64,2], index: 8, kind: input, shape index: {}]   ;;  %s3732_s9 = inlined_call_operand.<no memory space> [shape: f32[1], index: 9, kind: input, shape index: {}]   ;;  %s3733_s10 = inlined_call_operand.<no memory space> [shape: f32[1], index: 10, kind: input, shape index: {}]   ;;  %s3734_s11 = inlined_call_operand.hbm [shape: f32[8,128], index: 11, kind: output, shape index: {}]  }
   0x1   :  { %19 = vsyncpa [#allocation8], 0 }
   0x2   :  { %20 = vsyncpa [#allocation13], 0 }
   0x3   :  { %21 = vsyncpa [#allocation9], 0  ;;  %s2943_s17 = smov [#allocation7]   ;;  %s2944_s20 = smov [#allocation11]  }
   0x4   :  { %29 = dma.hbm_to_smem %s3723_s0, 32, %s2943_s17, [#allocation10]  }
   0x5   :  { %s37_s21 = sshll.u32 %s2944_s20, 4  ;;  %s38_s21 = int_to_ptr.vmem [resolvable:$true] %s37_s21 }
   0x6   :  { %s2883_s22 = scalar_lea.vmem %s38_s21, 512  ;;  %p2888_p1 = scmp.lt.s32.totalorder %s38_s21, %s38_s21 }
   0x7   :  { %p2884_p0 = scmp.ne.s32.totalorder %s38_s21, %s2883_s22  ;;  %p2889_p2 = scmp.lt.s32.totalorder %s2883_s22, %s2883_s22 }
   0x9   :  { %p2890_p3 = por %p2889_p2, %p2888_p1 }
   0xb   :  { %p2891_p4 = pnand %p2890_p3, %p2884_p0 }
   0xd   :  { %2894 = shalt.err (!%p2891_p4)
}
   0xe   :  { %s2945_s23 = smov 128   ;;  %s2946_s24 = smov 8  }
   0xf   :  { %43 = dma.hbm_to_vmem [thread:$0]  %s3725_s2, 512, %s38_s21, [#allocation8], %s2945_s23, %s2945_s23, %s2946_s24  }
  0x10   :  { %s2947_s27 = smov [#allocation12]  }
  0x11   :  { %s55_s28 = sshll.u32 %s2947_s27, 4  ;;  %s56_s28 = int_to_ptr.vmem [resolvable:$true] %s55_s28 }
  0x12   :  { %s2903_s0 = scalar_lea.vmem %s56_s28, 1024  ;;  %p2908_p6 = scmp.lt.s32.totalorder %s56_s28, %s56_s28 }
  0x13   :  { %p2904_p5 = scmp.ne.s32.totalorder %s56_s28, %s2903_s0  ;;  %p2909_p7 = scmp.lt.s32.totalorder %s2903_s0, %s2903_s0 }
  0x15   :  { %p2910_p8 = por %p2909_p7, %p2908_p6 }
  0x17   :  { %p2911_p9 = pnand %p2910_p8, %p2904_p5 }
  0x19   :  { %2914 = shalt.err (!%p2911_p9)
}
  0x1a   :  { %61 = dma.hbm_to_vmem [thread:$0]  %s3729_s6, 1024, %s56_s28, [#allocation13], %s2945_s23, %s2945_s23, %s2946_s24  }
  0x1b   :  { %2935 = dma.done.wait [#allocation10], 32  }
  0x1c   :  { %2936 = vsyncadd [#allocation10], 4294967264 }
  0x1d   :  { %2937 = dma.done.wait [#allocation8], 512  }
  0x1e   :  { %2938 = vsyncadd [#allocation8], 4294966784 }
  0x1f   :  { %2939 = dma.done.wait [#allocation13], 1024  }
  0x20   :  { %2940 = vsyncadd [#allocation13], 4294966272 }
  0x21   :  { %79 = sfence }
  0x22   :  { %v2562_v0 = vld [vmem:[#allocation11 + $0x14] ss:$8 sps:$4 sm:$0xff]   ;;  %vm81_vm0 = vcmask 261120   ;;  %v2564_v1 = vld [vmem:[#allocation11 + $0x10] ss:$8 sps:$4 sm:$0xff]   ;;  %v2948_v2 = vmov 0   ;;  %v173_v27 = vlaneseq }
  0x23   :  { %247 = vmatprep.mubr.bf16.mxu0 %v2948_v2  ;;  %267 = vmatprep.mubr.bf16.mxu1 %v2948_v2  ;;  %v2565_v3 = vld [vmem:[#allocation11 + $0x4] ss:$8 sps:$4 sm:$0xff]   ;;  %v2949_v4 = vmov 0.0   ;;  %s90_s2 = sld [smem:[#allocation7]]  ;;  %v2567_v5 = vld [vmem:[#allocation11] ss:$8 sps:$4 sm:$0xff]  }
  0x24   :  { %227 = vmatprep.subr.bf16.mxu0 %v2562_v0  ;;  %2540 = vmatprep.subr.bf16.mxu1 %v2562_v0  ;;  %82 = vst.msk [vmem:[#allocation2] sm:$0xff] %vm81_vm0, %v2949_v4  ;;  %83 = vst.msk [vmem:[#allocation2 + $0x8] sm:$0xff] %vm81_vm0, %v2949_v4  ;;  %s2411_s6 = sld [smem:[#allocation7 + $0x80]]  ;;  %vm93_vm1 = vcmask 253952   ;;  %v3094_v28 = vshrl.u32 %v173_v27, 7  ;;  %vm353_vm2 = vcmask 523520  }
  0x25   :  { %84 = vst.msk [vmem:[#allocation2 + $0x10] sm:$0xff] %vm81_vm0, %v2949_v4  ;;  %85 = vst.msk [vmem:[#allocation2 + $0x18] sm:$0xff] %vm81_vm0, %v2949_v4  ;;  %228 = vmatpush1.bf16.msra.mxu0 %v2564_v1  ;;  %2542 = vmatpush1.bf16.msra.mxu1 %v2564_v1  ;;  %s2412_s12 = sld [smem:[#allocation7 + $0x1]]  ;;  %v171_v30 = vld [vmem:[%s3727_s4] sm:$0x3]  ;;  %s2950_s4 = smov 64  }
  0x26   :  { %86 = vst.msk [vmem:[#allocation2 + $0x20] sm:$0xff] %vm81_vm0, %v2949_v4  ;;  %87 = vst.msk [vmem:[#allocation2 + $0x28] sm:$0xff] %vm81_vm0, %v2949_v4  ;;  %229 = vmatprep.subr.bf16.mxu0 %v2565_v3  ;;  %2541 = vmatprep.subr.bf16.mxu1 %v2565_v3  ;;  %s2413_s13 = sld [smem:[#allocation7 + $0x81]]  ;;  %v175_v29 = vsub.s32 0, %v3094_v28  ;;  %v179_v39 = vsub.s32 1, %v3094_v28  ;;  %vm397_vm3 = vcmask 523264  }
  0x27   :  { %88 = vst.msk [vmem:[#allocation2 + $0x30] sm:$0xff] %vm81_vm0, %v2949_v4  ;;  %89 = vst.msk [vmem:[#allocation2 + $0x38] sm:$0xff] %vm81_vm0, %v2949_v4  ;;  %s2418_s14 = sld [smem:[#allocation7 + $0x4]]  ;;  %v3140_v4 = vld [vmem:[%s3726_s3 + $0x34] ss:$8 sps:$4 sm:$0xff]   ;;  %vm2302_vm4 = vcmask 7168  }
  0x28   :  { %s2419_s15 = sld [smem:[#allocation7 + $0x84]]  ;;  %v3102_v31 = vrot.slane %v171_v30, %v175_v29  ;;  %v3122_v43 = vrot.slane %v171_v30, %v179_v39  ;;  %vm2304_vm5 = vcmask 15360   ;;  %vm2306_vm6 = vcmask 23552  }
  0x29   :  { %230 = vmatpush1.bf16.msra.mxu0 %v2567_v5  ;;  %2543 = vmatpush1.bf16.msra.mxu1 %v2567_v5  ;;  %s91_s18 = scalar_lea.vmem %s3724_s1, %s90_s2  ;;  %s2420_s19 = sld [smem:[#allocation7 + $0x5]]  ;;  %v3145_v5 = vld [vmem:[%s3726_s3 + $0x30] ss:$8 sps:$4 sm:$0xff]   ;;  %vm2308_vm7 = vcmask 31744   ;;  %vm2310_vm8 = vcmask 39936   ;;  %vm2312_vm9 = vcmask 48128  }
  0x2a   :  { %v92_v6 = vld [vmem:[%s91_s18] sm:$0x1]  ;;  %s96_s22 = scalar_lea.vmem %s3724_s1, %s2411_s6  ;;  %s2421_s23 = sld [smem:[#allocation7 + $0x85]]  ;;  %409 = vmatprep.subr.bf16.mxu1 %v3140_v4  ;;  %621 = vmatprep.subr.bf16.mxu0 %v3140_v4  ;;  %vm2314_vm10 = vcmask 56320   ;;  %vm2351_vm11 = vcmask 64512   ;;  %vm2375_vm12 = vcmask 72704  }
  0x2b   :  { %94 = vst.msk [vmem:[#allocation2] sm:$0x1] %vm93_vm1, %v92_v6  ;;  %v97_v7 = vld [vmem:[%s96_s22] sm:$0x1]  ;;  %s100_s26 = scalar_lea.vmem %s3724_s1, %s2412_s12  ;;  %s2422_s27 = sld [smem:[#allocation7 + $0x6]] }
  0x2c   :  { %98 = vst.msk [vmem:[#allocation2 + $0x1] sm:$0x1] %vm93_vm1, %v97_v7  ;;  %v101_v8 = vld [vmem:[%s100_s26] sm:$0x1]  ;;  %s104_s29 = scalar_lea.vmem %s3724_s1, %s2413_s13  ;;  %s2423_s30 = sld [smem:[#allocation7 + $0x86]] }
  0x2d   :  { %102 = vst.msk [vmem:[#allocation2 + $0x8] sm:$0x1] %vm93_vm1, %v101_v8  ;;  %v105_v9 = vld [vmem:[%s104_s29] sm:$0x1]  ;;  %s124_s16 = scalar_lea.vmem %s3724_s1, %s2418_s14  ;;  %s2424_s17 = sld [smem:[#allocation7 + $0x7]] }
  0x2e   :  { %106 = vst.msk [vmem:[#allocation2 + $0x9] sm:$0x1] %vm93_vm1, %v105_v9  ;;  %v125_v10 = vld [vmem:[%s124_s16] sm:$0x1]  ;;  %s128_s20 = scalar_lea.vmem %s3724_s1, %s2419_s15  ;;  %s2425_s21 = sld [smem:[#allocation7 + $0x87]] }
  0x2f   :  { %126 = vst.msk [vmem:[#allocation2 + $0x20] sm:$0x1] %vm93_vm1, %v125_v10  ;;  %v129_v11 = vld [vmem:[%s128_s20] sm:$0x1]  ;;  %s132_s24 = scalar_lea.vmem %s3724_s1, %s2420_s19  ;;  %s2951_s20 = smov 32  }
  0x30   :  { %130 = vst.msk [vmem:[#allocation2 + $0x21] sm:$0x1] %vm93_vm1, %v129_v11  ;;  %v133_v12 = vld [vmem:[%s132_s24] sm:$0x1]  ;;  %s136_s26 = scalar_lea.vmem %s3724_s1, %s2421_s23  ;;  %v3150_v6 = vld [vmem:[%s3726_s3 + $0x24] ss:$8 sps:$4 sm:$0xff]  }
  0x31   :  { %134 = vst.msk [vmem:[#allocation2 + $0x28] sm:$0x1] %vm93_vm1, %v133_v12  ;;  %v137_v13 = vld [vmem:[%s136_s26] sm:$0x1]  ;;  %s140_s0 = scalar_lea.vmem %s3724_s1, %s2422_s27  ;;  %v3165_v8 = vld [vmem:[%s3726_s3 + $0x14] ss:$8 sps:$4 sm:$0xff]  }
  0x32   :  { %138 = vst.msk [vmem:[#allocation2 + $0x29] sm:$0x1] %vm93_vm1, %v137_v13  ;;  %v141_v14 = vld [vmem:[%s140_s0] sm:$0x1]  ;;  %s144_s19 = scalar_lea.vmem %s3724_s1, %s2423_s30  ;;  %v3172_v9 = vld [vmem:[%s3726_s3 + $0x10] ss:$8 sps:$4 sm:$0xff]  }
  0x33   :  { %v155_v15 = vld [vmem:[#allocation2] sm:$0xff]  ;;  %142 = vst.msk [vmem:[#allocation2 + $0x30] sm:$0x1] %vm93_vm1, %v141_v14  ;;  %s148_s16 = scalar_lea.vmem %s3724_s1, %s2424_s17  ;;  %s2415_s12 = sld [smem:[#allocation7 + $0x82]] }
  0x34   :  { %v145_v16 = vld [vmem:[%s144_s19] sm:$0x1]  ;;  %s152_s18 = scalar_lea.vmem %s3724_s1, %s2425_s21  ;;  %v3179_v10 = vld [vmem:[%s3726_s3 + $0x4] ss:$8 sps:$4 sm:$0xff]   ;;  %s2416_s27 = sld [smem:[#allocation7 + $0x3]] }
  0x35   :  { %146 = vst.msk [vmem:[#allocation2 + $0x31] sm:$0x1] %vm93_vm1, %v145_v16  ;;  %v149_v17 = vld [vmem:[%s148_s16] sm:$0x1]  ;;  %v156_v18 = vld [vmem:[#allocation2 + $0x8] sm:$0xff]  ;;  %s2953_s29 = smov 3  }
  0x36   :  { %150 = vst.msk [vmem:[#allocation2 + $0x38] sm:$0x1] %vm93_vm1, %v149_v17  ;;  %v153_v19 = vld [vmem:[%s152_s18] sm:$0x1]  ;;  %v163_v20 = vpack.c.bf16 %v156_v18, %v155_v15  ;;  %s2417_s18 = sld [smem:[#allocation7 + $0x83]]  ;;  %s2954_s2 = smov 1  }
  0x37   :  { %154 = vst.msk [vmem:[#allocation2 + $0x39] sm:$0x1] %vm93_vm1, %v153_v19  ;;  %v159_v21 = vld [vmem:[#allocation2 + $0x20] sm:$0xff]  ;;  %s2956_s19 = smov 6   ;;  %s2957_s6 = smov 5  }
  0x38   :  { %2430 = vmatmul.mubr.msk.bf16.vlgmr.msra.gmra.mxu0 %vm81_vm0, %v163_v20  ;;  %v3158_v7 = vld [vmem:[%s3726_s3 + $0x20] ss:$8 sps:$4 sm:$0xff]   ;;  %s2958_s23 = smov 7   ;;  %s2959_s16 = smov 127  }
  0x39   :  { %v160_v22 = vld [vmem:[#allocation2 + $0x28] sm:$0xff]  ;;  %257 = vmatprep.mubr.bf16.mxu0 %v2948_v2  ;;  %622 = vmatpush1.bf16.msra.mxu0 %v3145_v5  ;;  %s112_s24 = scalar_lea.vmem %s3724_s1, %s2415_s12 }
  0x3a   :  { %v165_v23 = vpack.c.bf16 %v160_v22, %v159_v21  ;;  %623 = vmatprep.subr.bf16.mxu0 %v3150_v6  ;;  %v3186_v13 = vld [vmem:[%s3726_s3] ss:$8 sps:$4 sm:$0xff]   ;;  %s2414_s3 = sld [smem:[#allocation7 + $0x2]]  ;;  %s116_s26 = scalar_lea.vmem %s3724_s1, %s2416_s27 }
  0x3b   :  { %s2960_s27 = smov [#allocation14]  }
  0x3c   :  { %2432 = vmatmul.mubr.msk.bf16.vlgmr.msra.gmra.mxu1 %vm81_vm0, %v165_v23  ;;  %v161_v24 = vld [vmem:[#allocation2 + $0x30] sm:$0xff]  ;;  %s120_s0 = scalar_lea.vmem %s3724_s1, %s2417_s18  ;;  %s2384_s18 = sshll.u32 %s2960_s27, 4  ;;  %s2385_s18 = int_to_ptr.vmem [resolvable:$true] %s2384_s18 }
  0x3d   :  { %277 = vmatprep.mubr.bf16.mxu1 %v2948_v2  ;;  %410 = vmatpush1.bf16.msra.mxu1 %v3145_v5  ;;  %s2915_s30 = scalar_lea.vmem %s2385_s18, 128  ;;  %p2920_p11 = scmp.lt.s32.totalorder %s2385_s18, %s2385_s18 }
  0x3e   :  { %v162_v25 = vld [vmem:[#allocation2 + $0x38] sm:$0xff]  ;;  %411 = vmatprep.subr.bf16.mxu1 %v3150_v6  ;;  %624 = vmatpush1.bf16.msra.mxu0 %v3158_v7  ;;  %p2916_p10 = scmp.ne.s32.totalorder %s2385_s18, %s2915_s30  ;;  %p2921_p12 = scmp.lt.s32.totalorder %s2915_s30, %s2915_s30 }
  0x3f   :  { %v166_v26 = vpack.c.bf16 %v162_v25, %v161_v24  ;;  %625 = vmatprep.subr.bf16.mxu0 %v3165_v8 }
  0x40   :  { %s108_s21 = scalar_lea.vmem %s3724_s1, %s2414_s3  ;;  %p2922_p13 = por %p2921_p12, %p2920_p11 }
  0x41   :  { %412 = vmatpush1.bf16.msra.mxu1 %v3158_v7 }
  0x42   :  { %413 = vmatprep.subr.bf16.mxu1 %v3165_v8  ;;  %626 = vmatpush1.bf16.msra.mxu0 %v3172_v9  ;;  %p2923_p0 = pnand %p2922_p13, %p2916_p10 }
  0x43   :  { %627 = vmatprep.subr.bf16.mxu0 %v3179_v10 }
  0x44   :  { %2433 = vmatmul.mubr.msk.bf16.gmra.mxu1 %vm81_vm0, %v166_v26 }
  0x45   :  { %433 = vmatprep.mubr.bf16.mxu1 %v2948_v2  ;;  %414 = vmatpush1.bf16.msra.mxu1 %v3172_v9 }
  0x46   :  { %415 = vmatprep.subr.bf16.mxu1 %v3179_v10  ;;  %628 = vmatpush1.bf16.msra.mxu0 %v3186_v13 }
  0x47   :  { %833 = vmatprep.subr.bf16.mxu0 %v3140_v4 }
  0x49   :  { %416 = vmatpush1.bf16.msra.mxu1 %v3186_v13 }
  0x4a   :  { %515 = vmatprep.subr.bf16.mxu1 %v3140_v4 }
  0xf8   :  { %v249_v32 = vpop.f32.mrf.mxu0 }
  0xf9   :  { %v250_v33 = vadd.f32 %v249_v32, %v3102_v31 }
  0xfa   :  { %v3210_v20 = vpop.f32.mrf.mxu0 }
  0xfb   :  { %2607 = vtanh.f32 %v250_v33  ;;  %v2434_v47 = vmul.f32 -1.442695, %v250_v33 }
  0xfc   :  { %v3105_v34 = vpop.f32.mrf.mxu1  ;;  %v253_v21 = vpop.f32.mrf.mxu0 }
  0xfd   :  { %v254_v22 = vadd.f32 %v253_v21, %v3102_v31 }
  0xfe   :  { %v3107_v35 = vpop.f32.mrf.mxu1 }
 0x100   :  { %v3109_v36 = vpop.f32.mrf.mxu1 }
 0x102   :  { %v3111_v37 = vpop.f32.mrf.mxu1 }
 0x104   :  { %v3113_v38 = vpop.f32.mrf.mxu1 }
 0x106   :  { %v3116_v40 = vpop.f32.mrf.mxu1 }
 0x107   :  { %v282_v24 = vadd.f32 %v3116_v40, %v3122_v43 }
 0x108   :  { %v2608_v41 = vpop.eup %2607  ;;  %v3118_v42 = vpop.f32.mrf.mxu1 }
 0x109   :  { %305 = vrot.lane.b32.xlu0 %v2608_v41, %s2950_s4 }
 0x10a   :  { %v285_v44 = vpop.f32.mrf.mxu1 }
 0x10b   :  { %v286_v45 = vadd.f32 %v285_v44, %v3122_v43 }
 0x10d   :  { %2609 = vtanh.f32 %v286_v45  ;;  %v2435_v49 = vmul.f32 -1.442695, %v286_v45 }
 0x10e   :  { %2611 = vpow2.f32 %v2434_v47 }
 0x10f   :  { %2613 = vpow2.f32 %v2435_v49 }
 0x11a   :  { %v2610_v46 = vpop.eup %2609 }
 0x11b   :  { %329 = vrot.lane.b32.xlu0 %v2610_v46, %s2950_s4  ;;  %v2612_v48 = vpop.eup %2611 }
 0x11c   :  { %v299_v50 = vadd.f32 1.0, %v2612_v48  ;;  %v2614_v51 = vpop.eup %2613 }
 0x11d   :  { %v323_v55 = vadd.f32 1.0, %v2614_v51 }
 0x11e   :  { %2615 = vrcp.f32 %v299_v50 }
 0x11f   :  { %2617 = vrcp.f32 %v323_v55 }
 0x12b   :  { %v2616_v52 = vpop.eup %2615 }
 0x12c   :  { %v2618_v56 = vpop.eup %2617  ;;  %v303_v59 = vmul.f32 0.0, %v2616_v52 }
 0x12d   :  { %v327_v63 = vmul.f32 0.0, %v2618_v56 }
 0x17b   :  { %v306_v53 = vpop.permute.xlu0 %305 }
 0x17c   :  { %v308_v54 = vmul.f32 %v2616_v52, %v306_v53 }
 0x17e   :  { %310 = vrot.lane.b32.xlu1 %v308_v54, %s2951_s20 }
 0x18d   :  { %v330_v57 = vpop.permute.xlu0 %329 }
 0x18e   :  { %v332_v58 = vmul.f32 %v2618_v56, %v330_v57 }
 0x190   :  { %334 = vrot.lane.b32.xlu1 %v332_v58, %s2951_s20 }
 0x1f0   :  { %v311_v60 = vpop.permute.xlu1 %310 }
 0x1f1   :  { %v3129_v61 = vadd.f32 %v311_v60, %v303_v59 }
 0x1f3   :  { %2619 = vtanh.f32 %v3129_v61 }
 0x200   :  { %v2620_v62 = vpop.eup %2619 }
 0x201   :  { %316 = vrot.lane.b32.xlu0 %v2620_v62, %s2950_s4  ;;  %v109_v62 = vld [vmem:[%s108_s21] sm:$0x1] }
 0x202   :  { %v335_v0 = vpop.permute.xlu1 %334  ;;  %110 = vst.msk [vmem:[#allocation2 + $0x10] sm:$0x1] %vm93_vm1, %v109_v62 }
 0x203   :  { %v3133_v1 = vadd.f32 %v335_v0, %v327_v63  ;;  %v113_v63 = vld [vmem:[%s112_s24] sm:$0x1] }
 0x204   :  { %114 = vst.msk [vmem:[#allocation2 + $0x11] sm:$0x1] %vm93_vm1, %v113_v63  ;;  %v117_v0 = vld [vmem:[%s116_s26] sm:$0x1] }
 0x205   :  { %2621 = vtanh.f32 %v3133_v1  ;;  %118 = vst.msk [vmem:[#allocation2 + $0x18] sm:$0x1] %vm93_vm1, %v117_v0 }
 0x212   :  { %v2622_v3 = vpop.eup %2621 }
 0x213   :  { %340 = vrot.lane.b32.xlu1 %v2622_v3, %s2950_s4  ;;  %v121_v3 = vld [vmem:[%s120_s0] sm:$0x1] }
 0x214   :  { %122 = vst.msk [vmem:[#allocation2 + $0x19] sm:$0x1] %vm93_vm1, %v121_v3 }
 0x273   :  { %v317_v11 = vpop.permute.xlu0 %316 }
 0x274   :  { %v319_v12 = vmul.f32 %v2616_v52, %v317_v11  ;;  %v157_v11 = vld [vmem:[#allocation2 + $0x10] sm:$0xff] }
 0x276   :  { %345 = vrot.lane.b32.xlu0 %v319_v12, %s2951_s20  ;;  %v158_v12 = vld [vmem:[#allocation2 + $0x18] sm:$0xff] }
 0x285   :  { %v341_v14 = vpop.permute.xlu1 %340 }
 0x286   :  { %v343_v15 = vmul.f32 %v2618_v56, %v341_v14  ;;  %v164_v14 = vpack.c.bf16 %v158_v12, %v157_v11 }
 0x288   :  { %350 = vrot.lane.b32.xlu1 %v343_v15, %s2950_s4  ;;  %2431 = vmatmul.mubr.msk.bf16.gmra.mxu0 %vm81_vm0, %v164_v14 }
 0x289   :  { %645 = vmatprep.mubr.bf16.mxu0 %v2948_v2 }
 0x2e8   :  { %v346_v16 = vpop.permute.xlu0 %345 }
 0x2e9   :  { %348 = vst.msk [vmem:[#allocation3] sm:$0xff] %vm81_vm0, %v346_v16 }
 0x2fa   :  { %v351_v17 = vpop.permute.xlu1 %350 }
 0x2fb   :  { %354 = vst.msk [vmem:[#allocation3 + $0x38] sm:$0xff] %vm353_vm2, %v351_v17  ;;  %v355_v18 = vsel %vm81_vm0, %v346_v16, %v351_v17 }
 0x2fc   :  { %v356_v19 = vpack.c.bf16 %v355_v18, %v355_v18 }
 0x2fe   :  { %2444 = vmatmul.mubr.msk.bf16.vlgmr.msra.gmra.mxu1 %vm397_vm3, %v356_v19 }
 0x2ff   :  { %516 = vmatpush1.bf16.msra.mxu1 %v3145_v5  ;;  %539 = vmatprep.mubr.bf16.mxu1 %v2948_v2 }
 0x300   :  { %517 = vmatprep.subr.bf16.mxu1 %v3150_v6 }
 0x303   :  { %518 = vmatpush1.bf16.msra.mxu1 %v3158_v7 }
 0x304   :  { %519 = vmatprep.subr.bf16.mxu1 %v3165_v8 }
 0x307   :  { %520 = vmatpush1.bf16.msra.mxu1 %v3172_v9 }
 0x308   :  { %521 = vmatprep.subr.bf16.mxu1 %v3179_v10 }
 0x30b   :  { %522 = vmatpush1.bf16.msra.mxu1 %v3186_v13 }
 0x30c   :  { %727 = vmatprep.subr.bf16.mxu1 %v3140_v4 }
 0x3be   :  { %v435_v23 = vpop.f32.mrf.mxu1 }
 0x3bf   :  { %v442_v25 = vadd.f32 %v435_v23, %v254_v22 }
 0x3c0   :  { %v437_v26 = vpop.f32.mrf.mxu1 }
 0x3c1   :  { %2623 = vtanh.f32 %v442_v25  ;;  %v443_v27 = vadd.f32 %v437_v26, %v282_v24  ;;  %v2445_v44 = vmul.f32 -1.442695, %v442_v25  ;;  %v3262_v24 = vpop.f32.mrf.mxu0 }
 0x3c2   :  { %v439_v30 = vpop.f32.mrf.mxu1 }
 0x3c3   :  { %2625 = vtanh.f32 %v443_v27  ;;  %v2446_v45 = vmul.f32 -1.442695, %v443_v27  ;;  %v259_v25 = vpop.f32.mrf.mxu0  ;;  %v276_v30 = vadd.f32 %v3111_v37, %v3122_v43 }
 0x3c4   :  { %v440_v32 = vpop.f32.mrf.mxu1  ;;  %2627 = vpow2.f32 %v2445_v44  ;;  %v260_v26 = vadd.f32 %v259_v25, %v3102_v31 }
 0x3c5   :  { %2629 = vpow2.f32 %v2446_v45 }
 0x3ce   :  { %v2624_v33 = vpop.eup %2623 }
 0x3cf   :  { %453 = vrot.lane.b32.xlu0 %v2624_v33, %s2950_s4 }
 0x3d0   :  { %v2626_v41 = vpop.eup %2625 }
 0x3d1   :  { %477 = vrot.lane.b32.xlu1 %v2626_v41, %s2950_s4  ;;  %v2628_v46 = vpop.eup %2627 }
 0x3d2   :  { %v2630_v47 = vpop.eup %2629  ;;  %v447_v40 = vadd.f32 1.0, %v2628_v46 }
 0x3d3   :  { %v471_v48 = vadd.f32 1.0, %v2630_v47 }
 0x3d4   :  { %2631 = vrcp.f32 %v447_v40 }
 0x3d5   :  { %2633 = vrcp.f32 %v471_v48 }
 0x3e1   :  { %v2632_v49 = vpop.eup %2631 }
 0x3e2   :  { %v2634_v52 = vpop.eup %2633  ;;  %v451_v55 = vmul.f32 %v2632_v49, %v3129_v61 }
 0x3e3   :  { %v475_v58 = vmul.f32 %v2634_v52, %v3133_v1 }
 0x441   :  { %v454_v50 = vpop.permute.xlu0 %453 }
 0x442   :  { %v456_v51 = vmul.f32 %v2632_v49, %v454_v50 }
 0x443   :  { %v478_v53 = vpop.permute.xlu1 %477 }
 0x444   :  { %458 = vrot.lane.b32.xlu0 %v456_v51, %s2951_s20  ;;  %v480_v54 = vmul.f32 %v2634_v52, %v478_v53 }
 0x446   :  { %482 = vrot.lane.b32.xlu1 %v480_v54, %s2951_s20 }
 0x4b6   :  { %v459_v56 = vpop.permute.xlu0 %458 }
 0x4b7   :  { %v3220_v57 = vadd.f32 %v459_v56, %v451_v55 }
 0x4b8   :  { %v483_v59 = vpop.permute.xlu1 %482 }
 0x4b9   :  { %2635 = vtanh.f32 %v3220_v57  ;;  %v3224_v60 = vadd.f32 %v483_v59, %v475_v58 }
 0x4bb   :  { %2637 = vtanh.f32 %v3224_v60 }
 0x4c6   :  { %v2636_v61 = vpop.eup %2635 }
 0x4c7   :  { %464 = vrot.lane.b32.xlu0 %v2636_v61, %s2950_s4 }
 0x4c8   :  { %v2638_v1 = vpop.eup %2637 }
 0x4c9   :  { %488 = vrot.lane.b32.xlu1 %v2638_v1, %s2950_s4 }
 0x539   :  { %v465_v15 = vpop.permute.xlu0 %464 }
 0x53a   :  { %v467_v16 = vmul.f32 %v2632_v49, %v465_v15 }
 0x53b   :  { %v489_v17 = vpop.permute.xlu1 %488 }
 0x53c   :  { %493 = vrot.lane.b32.xlu0 %v467_v16, %s2951_s20  ;;  %v491_v18 = vmul.f32 %v2634_v52, %v489_v17 }
 0x53e   :  { %498 = vrot.lane.b32.xlu1 %v491_v18, %s2950_s4 }
 0x5ae   :  { %v494_v19 = vpop.permute.xlu0 %493 }
 0x5af   :  { %496 = vst.msk [vmem:[#allocation3 + $0x8] sm:$0xff] %vm81_vm0, %v494_v19 }
 0x5b0   :  { %v499_v21 = vpop.permute.xlu1 %498 }
 0x5b1   :  { %501 = vst.msk [vmem:[#allocation3 + $0x30] sm:$0xff] %vm353_vm2, %v499_v21  ;;  %v502_v22 = vsel %vm81_vm0, %v494_v19, %v499_v21  ;;  %v3296_v19 = vpop.f32.mrf.mxu0 }
 0x5b2   :  { %v503_v23 = vpack.c.bf16 %v502_v22, %v502_v22 }
 0x5b3   :  { %v263_v21 = vpop.f32.mrf.mxu0 }
 0x5b4   :  { %2447 = vmatmul.mubr.msk.bf16.vlgmr.msra.gmra.mxu1 %vm397_vm3, %v503_v23  ;;  %v264_v23 = vadd.f32 %v263_v21, %v3102_v31 }
 0x5b5   :  { %728 = vmatpush1.bf16.msra.mxu1 %v3145_v5  ;;  %751 = vmatprep.mubr.bf16.mxu1 %v2948_v2  ;;  %v3298_v22 = vpop.f32.mrf.mxu0 }
 0x5b6   :  { %729 = vmatprep.subr.bf16.mxu1 %v3150_v6 }
 0x5b9   :  { %730 = vmatpush1.bf16.msra.mxu1 %v3158_v7 }
 0x5ba   :  { %731 = vmatprep.subr.bf16.mxu1 %v3165_v8 }
 0x5bd   :  { %732 = vmatpush1.bf16.msra.mxu1 %v3172_v9 }
 0x5be   :  { %733 = vmatprep.subr.bf16.mxu1 %v3179_v10 }
 0x5c1   :  { %734 = vmatpush1.bf16.msra.mxu1 %v3186_v13 }
 0x5c2   :  { %939 = vmatprep.subr.bf16.mxu1 %v3140_v4 }
 0x674   :  { %v541_v27 = vpop.f32.mrf.mxu1 }
 0x675   :  { %v548_v32 = vadd.f32 %v541_v27, %v260_v26  ;;  %v272_v26 = vadd.f32 %v3107_v35, %v3122_v43 }
 0x676   :  { %v543_v33 = vpop.f32.mrf.mxu1 }
 0x677   :  { %2639 = vtanh.f32 %v548_v32  ;;  %v549_v41 = vadd.f32 %v543_v33, %v276_v30  ;;  %v2448_v40 = vmul.f32 -1.442695, %v548_v32 }
 0x678   :  { %v545_v44 = vpop.f32.mrf.mxu1 }
 0x679   :  { %2641 = vtanh.f32 %v549_v41  ;;  %v2449_v48 = vmul.f32 -1.442695, %v549_v41 }
 0x67a   :  { %v546_v45 = vpop.f32.mrf.mxu1  ;;  %2643 = vpow2.f32 %v2448_v40 }
 0x67b   :  { %2645 = vpow2.f32 %v2449_v48 }
 0x684   :  { %v2640_v46 = vpop.eup %2639 }
 0x685   :  { %559 = vrot.lane.b32.xlu0 %v2640_v46, %s2950_s4 }
 0x686   :  { %v2642_v47 = vpop.eup %2641 }
 0x687   :  { %583 = vrot.lane.b32.xlu1 %v2642_v47, %s2950_s4  ;;  %v2644_v49 = vpop.eup %2643 }
 0x688   :  { %v2646_v50 = vpop.eup %2645  ;;  %v553_v37 = vadd.f32 1.0, %v2644_v49 }
 0x689   :  { %v577_v51 = vadd.f32 1.0, %v2646_v50 }
 0x68a   :  { %2647 = vrcp.f32 %v553_v37 }
 0x68b   :  { %2649 = vrcp.f32 %v577_v51 }
 0x697   :  { %v2648_v52 = vpop.eup %2647 }
 0x698   :  { %v2650_v55 = vpop.eup %2649  ;;  %v557_v59 = vmul.f32 %v2648_v52, %v3220_v57 }
 0x699   :  { %v581_v63 = vmul.f32 %v2650_v55, %v3224_v60 }
 0x6f7   :  { %v560_v53 = vpop.permute.xlu0 %559 }
 0x6f8   :  { %v562_v54 = vmul.f32 %v2648_v52, %v560_v53 }
 0x6f9   :  { %v584_v56 = vpop.permute.xlu1 %583 }
 0x6fa   :  { %564 = vrot.lane.b32.xlu0 %v562_v54, %s2951_s20  ;;  %v586_v58 = vmul.f32 %v2650_v55, %v584_v56 }
 0x6fc   :  { %588 = vrot.lane.b32.xlu1 %v586_v58, %s2951_s20 }
 0x76c   :  { %v565_v61 = vpop.permute.xlu0 %564 }
 0x76d   :  { %v3272_v62 = vadd.f32 %v565_v61, %v557_v59 }
 0x76e   :  { %v589_v0 = vpop.permute.xlu1 %588 }
 0x76f   :  { %2651 = vtanh.f32 %v3272_v62  ;;  %v3276_v1 = vadd.f32 %v589_v0, %v581_v63 }
 0x771   :  { %2653 = vtanh.f32 %v3276_v1 }
 0x77c   :  { %v2652_v3 = vpop.eup %2651 }
 0x77d   :  { %570 = vrot.lane.b32.xlu0 %v2652_v3, %s2950_s4 }
 0x77e   :  { %v2654_v11 = vpop.eup %2653 }
 0x77f   :  { %594 = vrot.lane.b32.xlu1 %v2654_v11, %s2950_s4 }
 0x7ef   :  { %v571_v12 = vpop.permute.xlu0 %570 }
 0x7f0   :  { %v573_v57 = vmul.f32 %v2648_v52, %v571_v12 }
 0x7f1   :  { %v595_v14 = vpop.permute.xlu1 %594 }
 0x7f2   :  { %599 = vrot.lane.b32.xlu0 %v573_v57, %s2951_s20  ;;  %v597_v15 = vmul.f32 %v2650_v55, %v595_v14 }
 0x7f4   :  { %604 = vrot.lane.b32.xlu1 %v597_v15, %s2950_s4 }
 0x864   :  { %v600_v60 = vpop.permute.xlu0 %599 }
 0x865   :  { %602 = vst.msk [vmem:[#allocation3 + $0x10] sm:$0xff] %vm81_vm0, %v600_v60 }
 0x866   :  { %v605_v16 = vpop.permute.xlu1 %604 }
 0x867   :  { %607 = vst.msk [vmem:[#allocation3 + $0x28] sm:$0xff] %vm353_vm2, %v605_v16  ;;  %v608_v17 = vsel %vm81_vm0, %v600_v60, %v605_v16  ;;  %v270_v60 = vadd.f32 %v3105_v34, %v3102_v31 }
 0x868   :  { %v609_v18 = vpack.c.bf16 %v608_v17, %v608_v17  ;;  %v266_v17 = vadd.f32 %v3298_v22, %v3122_v43 }
 0x86a   :  { %2450 = vmatmul.mubr.msk.bf16.vlgmr.msra.gmra.mxu0 %vm397_vm3, %v609_v18 }
 0x86b   :  { %834 = vmatpush1.bf16.msra.mxu0 %v3145_v5  ;;  %857 = vmatprep.mubr.bf16.mxu0 %v2948_v2 }
 0x86c   :  { %835 = vmatprep.subr.bf16.mxu0 %v3150_v6 }
 0x86f   :  { %836 = vmatpush1.bf16.msra.mxu0 %v3158_v7 }
 0x870   :  { %837 = vmatprep.subr.bf16.mxu0 %v3165_v8 }
 0x873   :  { %838 = vmatpush1.bf16.msra.mxu0 %v3172_v9 }
 0x874   :  { %839 = vmatprep.subr.bf16.mxu0 %v3179_v10 }
 0x877   :  { %840 = vmatpush1.bf16.msra.mxu0 %v3186_v13 }
 0x878   :  { %1045 = vmatprep.subr.bf16.mxu0 %v3140_v4 }
 0x92a   :  { %v647_v25 = vpop.f32.mrf.mxu0 }
 0x92b   :  { %v654_v27 = vadd.f32 %v647_v25, %v264_v23 }
 0x92c   :  { %v649_v30 = vpop.f32.mrf.mxu0 }
 0x92d   :  { %2655 = vtanh.f32 %v654_v27  ;;  %v655_v32 = vadd.f32 %v649_v30, %v272_v26  ;;  %v2451_v45 = vmul.f32 -1.442695, %v654_v27 }
 0x92e   :  { %v651_v33 = vpop.f32.mrf.mxu0 }
 0x92f   :  { %2657 = vtanh.f32 %v655_v32  ;;  %v2452_v46 = vmul.f32 -1.442695, %v655_v32 }
 0x930   :  { %v652_v41 = vpop.f32.mrf.mxu0  ;;  %2659 = vpow2.f32 %v2451_v45 }
 0x931   :  { %2661 = vpow2.f32 %v2452_v46 }
 0x93a   :  { %v2656_v44 = vpop.eup %2655 }
 0x93b   :  { %665 = vrot.lane.b32.xlu0 %v2656_v44, %s2950_s4 }
 0x93c   :  { %v2658_v4 = vpop.eup %2657 }
 0x93d   :  { %689 = vrot.lane.b32.xlu1 %v2658_v4, %s2950_s4  ;;  %v2660_v47 = vpop.eup %2659 }
 0x93e   :  { %v2662_v40 = vpop.eup %2661  ;;  %v659_v35 = vadd.f32 1.0, %v2660_v47 }
 0x93f   :  { %v683_v48 = vadd.f32 1.0, %v2662_v40 }
 0x940   :  { %2663 = vrcp.f32 %v659_v35 }
 0x941   :  { %2665 = vrcp.f32 %v683_v48 }
 0x94d   :  { %v2664_v49 = vpop.eup %2663 }
 0x94e   :  { %v2666_v51 = vpop.eup %2665  ;;  %v663_v54 = vmul.f32 %v2664_v49, %v3272_v62 }
 0x94f   :  { %v687_v58 = vmul.f32 %v2666_v51, %v3276_v1 }
 0x9ad   :  { %v666_v50 = vpop.permute.xlu0 %665 }
 0x9ae   :  { %v668_v37 = vmul.f32 %v2664_v49, %v666_v50 }
 0x9af   :  { %v690_v52 = vpop.permute.xlu1 %689 }
 0x9b0   :  { %670 = vrot.lane.b32.xlu0 %v668_v37, %s2951_s20  ;;  %v692_v53 = vmul.f32 %v2666_v51, %v690_v52 }
 0x9b2   :  { %694 = vrot.lane.b32.xlu1 %v692_v53, %s2951_s20 }
 0xa22   :  { %v671_v55 = vpop.permute.xlu0 %670 }
 0xa23   :  { %v3308_v56 = vadd.f32 %v671_v55, %v663_v54 }
 0xa24   :  { %v695_v59 = vpop.permute.xlu1 %694 }
 0xa25   :  { %2667 = vtanh.f32 %v3308_v56  ;;  %v697_v61 = vadd.f32 %v695_v59, %v687_v58 }
 0xa27   :  { %2669 = vtanh.f32 %v697_v61 }
 0xa32   :  { %v2668_v63 = vpop.eup %2667 }
 0xa33   :  { %676 = vrot.lane.b32.xlu0 %v2668_v63, %s2950_s4 }
 0xa34   :  { %v2670_v0 = vpop.eup %2669 }
 0xa35   :  { %700 = vrot.lane.b32.xlu1 %v2670_v0, %s2950_s4 }
 0xaa5   :  { %v677_v3 = vpop.permute.xlu0 %676 }
 0xaa6   :  { %v679_v11 = vmul.f32 %v2664_v49, %v677_v3 }
 0xaa7   :  { %v701_v12 = vpop.permute.xlu1 %700 }
 0xaa8   :  { %705 = vrot.lane.b32.xlu0 %v679_v11, %s2951_s20  ;;  %v703_v62 = vmul.f32 %v2666_v51, %v701_v12  ;;  %v274_v11 = vadd.f32 %v3109_v36, %v3102_v31 }
 0xaaa   :  { %710 = vrot.lane.b32.xlu1 %v703_v62, %s2950_s4 }
 0xb1a   :  { %v706_v1 = vpop.permute.xlu0 %705 }
 0xb1b   :  { %708 = vst.msk [vmem:[#allocation3 + $0x18] sm:$0xff] %vm81_vm0, %v706_v1 }
 0xb1c   :  { %v711_v57 = vpop.permute.xlu1 %710 }
 0xb1d   :  { %713 = vst.msk [vmem:[#allocation3 + $0x20] sm:$0xff] %vm353_vm2, %v711_v57  ;;  %v714_v14 = vsel %vm81_vm0, %v706_v1, %v711_v57 }
 0xb1e   :  { %v715_v15 = vpack.c.bf16 %v714_v14, %v714_v14 }
 0xb20   :  { %2453 = vmatmul.mubr.msk.bf16.vlgmr.msra.gmra.mxu1 %vm397_vm3, %v715_v15 }
 0xb21   :  { %940 = vmatpush1.bf16.msra.mxu1 %v3145_v5  ;;  %963 = vmatprep.mubr.bf16.mxu1 %v2948_v2 }
 0xb22   :  { %941 = vmatprep.subr.bf16.mxu1 %v3150_v6 }
 0xb25   :  { %942 = vmatpush1.bf16.msra.mxu1 %v3158_v7 }
 0xb26   :  { %943 = vmatprep.subr.bf16.mxu1 %v3165_v8 }
 0xb29   :  { %944 = vmatpush1.bf16.msra.mxu1 %v3172_v9 }
 0xb2a   :  { %945 = vmatprep.subr.bf16.mxu1 %v3179_v10 }
 0xb2d   :  { %946 = vmatpush1.bf16.msra.mxu1 %v3186_v13 }
 0xbe0   :  { %v753_v16 = vpop.f32.mrf.mxu1 }
 0xbe1   :  { %v760_v18 = vadd.f32 %v753_v16, %v270_v60 }
 0xbe2   :  { %v755_v21 = vpop.f32.mrf.mxu1 }
 0xbe3   :  { %2671 = vtanh.f32 %v760_v18  ;;  %v761_v23 = vadd.f32 %v755_v21, %v266_v17  ;;  %v2454_v32 = vmul.f32 -1.442695, %v760_v18 }
 0xbe4   :  { %v757_v25 = vpop.f32.mrf.mxu1 }
 0xbe5   :  { %2673 = vtanh.f32 %v761_v23  ;;  %v2455_v33 = vmul.f32 -1.442695, %v761_v23 }
 0xbe6   :  { %v758_v26 = vpop.f32.mrf.mxu1  ;;  %2675 = vpow2.f32 %v2454_v32 }
 0xbe7   :  { %2677 = vpow2.f32 %v2455_v33 }
 0xbf0   :  { %v2672_v27 = vpop.eup %2671 }
 0xbf1   :  { %771 = vrot.lane.b32.xlu0 %v2672_v27, %s2950_s4 }
 0xbf2   :  { %v2674_v30 = vpop.eup %2673 }
 0xbf3   :  { %795 = vrot.lane.b32.xlu1 %v2674_v30, %s2950_s4  ;;  %v2676_v34 = vpop.eup %2675 }
 0xbf4   :  { %v2678_v41 = vpop.eup %2677  ;;  %v765_v22 = vadd.f32 1.0, %v2676_v34 }
 0xbf5   :  { %v789_v44 = vadd.f32 1.0, %v2678_v41 }
 0xbf6   :  { %2679 = vrcp.f32 %v765_v22 }
 0xbf7   :  { %2681 = vrcp.f32 %v789_v44 }
 0xc03   :  { %v2680_v4 = vpop.eup %2679 }
 0xc04   :  { %v2682_v47 = vpop.eup %2681  ;;  %v769_v48 = vmul.f32 %v2680_v4, %v3308_v56 }
 0xc05   :  { %v793_v37 = vmul.f32 %v2682_v47, %v697_v61 }
 0xc63   :  { %v772_v45 = vpop.permute.xlu0 %771 }
 0xc64   :  { %v774_v46 = vmul.f32 %v2680_v4, %v772_v45 }
 0xc65   :  { %v796_v40 = vpop.permute.xlu1 %795 }
 0xc66   :  { %776 = vrot.lane.b32.xlu0 %v774_v46, %s2951_s20  ;;  %v798_v35 = vmul.f32 %v2682_v47, %v796_v40 }
 0xc68   :  { %800 = vrot.lane.b32.xlu1 %v798_v35, %s2951_s20 }
 0xcd8   :  { %v777_v49 = vpop.permute.xlu0 %776 }
 0xcd9   :  { %v3337_v50 = vadd.f32 %v777_v49, %v769_v48  ;;  %v280_v48 = vadd.f32 %v3113_v38, %v3102_v31 }
 0xcda   :  { %v801_v51 = vpop.permute.xlu1 %800 }
 0xcdb   :  { %2683 = vtanh.f32 %v3337_v50  ;;  %v803_v52 = vadd.f32 %v801_v51, %v793_v37 }
 0xcdd   :  { %2685 = vtanh.f32 %v803_v52 }
 0xce8   :  { %v2684_v53 = vpop.eup %2683 }
 0xce9   :  { %782 = vrot.lane.b32.xlu0 %v2684_v53, %s2950_s4 }
 0xcea   :  { %v2686_v54 = vpop.eup %2685 }
 0xceb   :  { %806 = vrot.lane.b32.xlu1 %v2686_v54, %s2950_s4 }
 0xd5b   :  { %v783_v55 = vpop.permute.xlu0 %782 }
 0xd5c   :  { %v785_v58 = vmul.f32 %v2680_v4, %v783_v55 }
 0xd5d   :  { %v807_v59 = vpop.permute.xlu1 %806 }
 0xd5e   :  { %811 = vrot.lane.b32.xlu0 %v785_v58, %s2951_s20  ;;  %v809_v56 = vmul.f32 %v2682_v47, %v807_v59 }
 0xd60   :  { %816 = vrot.lane.b32.xlu1 %v809_v56, %s2950_s4 }
 0xdd0   :  { %v812_v61 = vpop.permute.xlu0 %811 }
 0xdd1   :  { %814 = vst.msk [vmem:[#allocation3 + $0x20] sm:$0xff] %vm81_vm0, %v812_v61 }
 0xdd2   :  { %v817_v63 = vpop.permute.xlu1 %816 }
 0xdd3   :  { %819 = vst.msk [vmem:[#allocation3 + $0x18] sm:$0xff] %vm353_vm2, %v817_v63  ;;  %v820_v0 = vsel %vm81_vm0, %v812_v61, %v817_v63 }
 0xdd4   :  { %v821_v3 = vpack.c.bf16 %v820_v0, %v820_v0 }
 0xdd6   :  { %2456 = vmatmul.mubr.msk.bf16.vlgmr.msra.gmra.mxu0 %vm397_vm3, %v821_v3 }
 0xdd7   :  { %1046 = vmatpush1.bf16.msra.mxu0 %v3145_v5  ;;  %1069 = vmatprep.mubr.bf16.mxu0 %v2948_v2  ;;  %v262_v5 = vadd.f32 %v3296_v19, %v3122_v43 }
 0xdd8   :  { %1047 = vmatprep.subr.bf16.mxu0 %v3150_v6 }
 0xddb   :  { %1048 = vmatpush1.bf16.msra.mxu0 %v3158_v7 }
 0xddc   :  { %1049 = vmatprep.subr.bf16.mxu0 %v3165_v8 }
 0xddf   :  { %1050 = vmatpush1.bf16.msra.mxu0 %v3172_v9 }
 0xde0   :  { %1051 = vmatprep.subr.bf16.mxu0 %v3179_v10 }
 0xde3   :  { %1052 = vmatpush1.bf16.msra.mxu0 %v3186_v13 }
 0xe96   :  { %v859_v12 = vpop.f32.mrf.mxu0 }
 0xe97   :  { %v866_v62 = vadd.f32 %v859_v12, %v274_v11 }
 0xe98   :  { %v861_v1 = vpop.f32.mrf.mxu0 }
 0xe99   :  { %2687 = vtanh.f32 %v866_v62  ;;  %v867_v6 = vadd.f32 %v861_v1, %v262_v5  ;;  %v2457_v10 = vmul.f32 -1.442695, %v866_v62 }
 0xe9a   :  { %v863_v7 = vpop.f32.mrf.mxu0 }
 0xe9b   :  { %2689 = vtanh.f32 %v867_v6  ;;  %v2458_v13 = vmul.f32 -1.442695, %v867_v6 }
 0xe9c   :  { %v864_v8 = vpop.f32.mrf.mxu0  ;;  %2691 = vpow2.f32 %v2457_v10 }
 0xe9d   :  { %2693 = vpow2.f32 %v2458_v13 }
 0xea6   :  { %v2688_v57 = vpop.eup %2687 }
 0xea7   :  { %877 = vrot.lane.b32.xlu0 %v2688_v57, %s2950_s4 }
 0xea8   :  { %v2690_v9 = vpop.eup %2689 }
 0xea9   :  { %901 = vrot.lane.b32.xlu1 %v2690_v9, %s2950_s4  ;;  %v2692_v36 = vpop.eup %2691 }
 0xeaa   :  { %v2694_v14 = vpop.eup %2693  ;;  %v871_v19 = vadd.f32 1.0, %v2692_v36 }
 0xeab   :  { %v895_v15 = vadd.f32 1.0, %v2694_v14 }
 0xeac   :  { %2695 = vrcp.f32 %v871_v19 }
 0xead   :  { %2697 = vrcp.f32 %v895_v15 }
 0xeb9   :  { %v2696_v60 = vpop.eup %2695 }
 0xeba   :  { %v2698_v18 = vpop.eup %2697  ;;  %v875_v25 = vmul.f32 %v2696_v60, %v3337_v50  ;;  %v256_v50 = vadd.f32 %v3262_v24, %v3122_v43 }
 0xebb   :  { %v899_v30 = vmul.f32 %v2698_v18, %v803_v52 }
 0xf19   :  { %v878_v16 = vpop.permute.xlu0 %877 }
 0xf1a   :  { %v880_v17 = vmul.f32 %v2696_v60, %v878_v16 }
 0xf1b   :  { %v902_v21 = vpop.permute.xlu1 %901 }
 0xf1c   :  { %882 = vrot.lane.b32.xlu0 %v880_v17, %s2951_s20  ;;  %v904_v23 = vmul.f32 %v2698_v18, %v902_v21  ;;  %v284_v21 = vadd.f32 %v3118_v42, %v3102_v31 }
 0xf1e   :  { %906 = vrot.lane.b32.xlu1 %v904_v23, %s2951_s20 }
 0xf8e   :  { %v883_v26 = vpop.permute.xlu0 %882 }
 0xf8f   :  { %v885_v27 = vadd.f32 %v883_v26, %v875_v25  ;;  %v252_v25 = vadd.f32 %v3210_v20, %v3122_v43 }
 0xf90   :  { %v907_v32 = vpop.permute.xlu1 %906 }
 0xf91   :  { %2699 = vtanh.f32 %v885_v27  ;;  %v909_v33 = vadd.f32 %v907_v32, %v899_v30 }
 0xf93   :  { %2701 = vtanh.f32 %v909_v33 }
 0xf9e   :  { %v2700_v34 = vpop.eup %2699 }
 0xf9f   :  { %888 = vrot.lane.b32.xlu0 %v2700_v34, %s2950_s4 }
 0xfa0   :  { %v2702_v41 = vpop.eup %2701 }
 0xfa1   :  { %912 = vrot.lane.b32.xlu1 %v2702_v41, %s2950_s4 }
0x1011   :  { %v889_v22 = vpop.permute.xlu0 %888 }
0x1012   :  { %v891_v44 = vmul.f32 %v2696_v60, %v889_v22 }
0x1013   :  { %v913_v4 = vpop.permute.xlu1 %912 }
0x1014   :  { %917 = vrot.lane.b32.xlu0 %v891_v44, %s2951_s20  ;;  %v915_v45 = vmul.f32 %v2698_v18, %v913_v4 }
0x1016   :  { %922 = vrot.lane.b32.xlu1 %v915_v45, %s2950_s4 }
0x1086   :  { %v918_v46 = vpop.permute.xlu0 %917 }
0x1087   :  { %920 = vst.msk [vmem:[#allocation3 + $0x28] sm:$0xff] %vm81_vm0, %v918_v46 }
0x1088   :  { %v923_v47 = vpop.permute.xlu1 %922 }
0x1089   :  { %925 = vst.msk [vmem:[#allocation3 + $0x10] sm:$0xff] %vm353_vm2, %v923_v47  ;;  %v926_v40 = vsel %vm81_vm0, %v918_v46, %v923_v47 }
0x108a   :  { %v927_v35 = vpack.c.bf16 %v926_v40, %v926_v40 }
0x108c   :  { %2459 = vmatmul.mubr.msk.bf16.vlgmr.msra.gmra.mxu1 %vm397_vm3, %v927_v35 }
0x108d   :  { %1254 = vmatprep.mubr.bf16.mxu1 %v2948_v2 }
0x114c   :  { %v965_v49 = vpop.f32.mrf.mxu1 }
0x114d   :  { %v972_v37 = vadd.f32 %v965_v49, %v280_v48 }
0x114e   :  { %v967_v51 = vpop.f32.mrf.mxu1 }
0x114f   :  { %2703 = vtanh.f32 %v972_v37  ;;  %v973_v52 = vadd.f32 %v967_v51, %v256_v50  ;;  %v2460_v59 = vmul.f32 -1.442695, %v972_v37 }
0x1150   :  { %v969_v53 = vpop.f32.mrf.mxu1 }
0x1151   :  { %2705 = vtanh.f32 %v973_v52  ;;  %v2461_v56 = vmul.f32 -1.442695, %v973_v52  ;;  %v2580_v53 = vld [vmem:[%s3728_s5 + $0x30] ss:$8 sps:$4 sm:$0xff]  }
0x1152   :  { %v970_v54 = vpop.f32.mrf.mxu1  ;;  %2707 = vpow2.f32 %v2460_v59  ;;  %v2585_v59 = vld [vmem:[%s3728_s5 + $0x24] ss:$8 sps:$4 sm:$0xff]  }
0x1153   :  { %2709 = vpow2.f32 %v2461_v56  ;;  %v2582_v54 = vld [vmem:[%s3728_s5 + $0x34] ss:$8 sps:$4 sm:$0xff]   ;;  %v2583_v56 = vld [vmem:[%s3728_s5 + $0x20] ss:$8 sps:$4 sm:$0xff]  }
0x1154   :  { %1230 = vmatprep.subr.bf16.mxu1 %v2582_v54 }
0x1155   :  { %1231 = vmatpush1.bf16.msra.mxu1 %v2580_v53 }
0x1156   :  { %1232 = vmatprep.subr.bf16.mxu1 %v2585_v59 }
0x1159   :  { %1233 = vmatpush1.bf16.msra.mxu1 %v2583_v56 }
0x115c   :  { %v2704_v55 = vpop.eup %2703 }
0x115d   :  { %983 = vrot.lane.b32.xlu0 %v2704_v55, %s2950_s4 }
0x115e   :  { %v2706_v58 = vpop.eup %2705 }
0x115f   :  { %1007 = vrot.lane.b32.xlu1 %v2706_v58, %s2950_s4  ;;  %v2708_v38 = vpop.eup %2707 }
0x1160   :  { %v2710_v61 = vpop.eup %2709  ;;  %v977_v24 = vadd.f32 1.0, %v2708_v38  ;;  %v2586_v38 = vld [vmem:[%s3728_s5 + $0x10] ss:$8 sps:$4 sm:$0xff]  }
0x1161   :  { %v1001_v63 = vadd.f32 1.0, %v2710_v61  ;;  %v2588_v61 = vld [vmem:[%s3728_s5 + $0x14] ss:$8 sps:$4 sm:$0xff]  }
0x1162   :  { %2711 = vrcp.f32 %v977_v24  ;;  %v2591_v24 = vld [vmem:[%s3728_s5 + $0x4] ss:$8 sps:$4 sm:$0xff]   ;;  %1234 = vmatprep.subr.bf16.mxu1 %v2588_v61 }
0x1163   :  { %2713 = vrcp.f32 %v1001_v63  ;;  %1235 = vmatpush1.bf16.msra.mxu1 %v2586_v38  ;;  %v2589_v63 = vld [vmem:[%s3728_s5] ss:$8 sps:$4 sm:$0xff]  }
0x1164   :  { %1236 = vmatprep.subr.bf16.mxu1 %v2591_v24 }
0x1167   :  { %1237 = vmatpush1.bf16.msra.mxu1 %v2589_v63 }
0x116f   :  { %v2712_v0 = vpop.eup %2711 }
0x1170   :  { %v2714_v12 = vpop.eup %2713  ;;  %v981_v1 = vmul.f32 %v2712_v0, %v885_v27 }
0x1171   :  { %v1005_v8 = vmul.f32 %v2714_v12, %v909_v33 }
0x11cf   :  { %v984_v3 = vpop.permute.xlu0 %983 }
0x11d0   :  { %v986_v11 = vmul.f32 %v2712_v0, %v984_v3 }
0x11d1   :  { %v1008_v5 = vpop.permute.xlu1 %1007 }
0x11d2   :  { %988 = vrot.lane.b32.xlu0 %v986_v11, %s2951_s20  ;;  %v1010_v62 = vmul.f32 %v2714_v12, %v1008_v5 }
0x11d4   :  { %1012 = vrot.lane.b32.xlu1 %v1010_v62, %s2951_s20 }
0x1244   :  { %v989_v6 = vpop.permute.xlu0 %988 }
0x1245   :  { %v991_v7 = vadd.f32 %v989_v6, %v981_v1 }
0x1246   :  { %v1013_v57 = vpop.permute.xlu1 %1012 }
0x1247   :  { %2715 = vtanh.f32 %v991_v7  ;;  %v1015_v9 = vadd.f32 %v1013_v57, %v1005_v8  ;;  %v1140_v8 = vld [vmem:[#allocation3 + $0x10] sm:$0xff]  ;;  %v1141_v57 = vld [vmem:[#allocation3 + $0x18] sm:$0xff] }
0x1249   :  { %2717 = vtanh.f32 %v1015_v9 }
0x1254   :  { %v2716_v10 = vpop.eup %2715 }
0x1255   :  { %994 = vrot.lane.b32.xlu0 %v2716_v10, %s2950_s4  ;;  %v1143_v10 = vld [vmem:[#allocation3 + $0x28] sm:$0xff] }
0x1256   :  { %v2718_v13 = vpop.eup %2717 }
0x1257   :  { %1018 = vrot.lane.b32.xlu1 %v2718_v13, %s2950_s4  ;;  %v1142_v13 = vld [vmem:[#allocation3 + $0x20] sm:$0xff] }
0x12c7   :  { %v995_v36 = vpop.permute.xlu0 %994 }
0x12c8   :  { %v997_v14 = vmul.f32 %v2712_v0, %v995_v36  ;;  %v1148_v36 = vpack.c.bf16 %v1143_v10, %v1142_v13  ;;  %v3484_v10 = vld [vmem:[#allocation12 + $0x34] ss:$8 sps:$4 sm:$0xff]   ;;  %v3486_v13 = vld [vmem:[#allocation12 + $0x30] ss:$8 sps:$4 sm:$0xff]  }
0x12c9   :  { %v1019_v19 = vpop.permute.xlu1 %1018  ;;  %1414 = vmatprep.subr.bf16.mxu0 %v3484_v10  ;;  %1626 = vmatprep.subr.bf16.mxu1 %v3484_v10 }
0x12ca   :  { %1023 = vrot.lane.b32.xlu0 %v997_v14, %s2951_s20  ;;  %v1021_v15 = vmul.f32 %v2714_v12, %v1019_v19 }
0x12cc   :  { %1028 = vrot.lane.b32.xlu1 %v1021_v15, %s2950_s4 }
0x133c   :  { %v1024_v60 = vpop.permute.xlu0 %1023 }
0x133d   :  { %1026 = vst.msk [vmem:[#allocation3 + $0x30] sm:$0xff] %vm81_vm0, %v1024_v60 }
0x133e   :  { %v1029_v16 = vpop.permute.xlu1 %1028 }
0x133f   :  { %1031 = vst.msk [vmem:[#allocation3 + $0x8] sm:$0xff] %vm353_vm2, %v1029_v16  ;;  %v1032_v17 = vsel %vm81_vm0, %v1024_v60, %v1029_v16  ;;  %v1158_v60 = vld [vmem:[%s3730_s7] sm:$0x3] }
0x1340   :  { %v1033_v18 = vpack.c.bf16 %v1032_v17, %v1032_v17  ;;  %v1163_v16 = vrot.slane %v1158_v60, %v175_v29  ;;  %v1167_v17 = vrot.slane %v1158_v60, %v179_v39  ;;  %v3505_v60 = vld [vmem:[#allocation12 + $0x4] ss:$8 sps:$4 sm:$0xff]  }
0x1342   :  { %2462 = vmatmul.mubr.msk.bf16.vlgmr.msra.gmra.mxu0 %vm397_vm3, %v1033_v18 }
0x1343   :  { %1438 = vmatprep.mubr.bf16.mxu0 %v2948_v2  ;;  %1415 = vmatpush1.bf16.msra.mxu0 %v3486_v13 }
0x1344   :  { %v1144_v19 = vld [vmem:[#allocation3 + $0x30] sm:$0xff] }
0x1346   :  { %v1139_v6 = vld [vmem:[#allocation3 + $0x8] sm:$0xff] }
0x1402   :  { %v1071_v23 = vpop.f32.mrf.mxu0 }
0x1403   :  { %v1078_v26 = vadd.f32 %v1071_v23, %v284_v21 }
0x1404   :  { %v1073_v27 = vpop.f32.mrf.mxu0 }
0x1405   :  { %2719 = vtanh.f32 %v1078_v26  ;;  %v1079_v30 = vadd.f32 %v1073_v27, %v252_v25  ;;  %v2463_v22 = vmul.f32 -1.442695, %v1078_v26 }
0x1406   :  { %v1075_v32 = vpop.f32.mrf.mxu0 }
0x1407   :  { %2721 = vtanh.f32 %v1079_v30  ;;  %v2464_v44 = vmul.f32 -1.442695, %v1079_v30 }
0x1408   :  { %v1076_v33 = vpop.f32.mrf.mxu0  ;;  %2723 = vpow2.f32 %v2463_v22 }
0x1409   :  { %2725 = vpow2.f32 %v2464_v44 }
0x1412   :  { %v2720_v34 = vpop.eup %2719 }
0x1413   :  { %1089 = vrot.lane.b32.xlu1 %v2720_v34, %s2950_s4 }
0x1414   :  { %v2722_v41 = vpop.eup %2721 }
0x1415   :  { %1113 = vrot.lane.b32.xlu0 %v2722_v41, %s2950_s4  ;;  %v2724_v31 = vpop.eup %2723 }
0x1416   :  { %v2726_v42 = vpop.eup %2725  ;;  %v1083_v43 = vadd.f32 1.0, %v2724_v31 }
0x1417   :  { %v1107_v20 = vadd.f32 1.0, %v2726_v42 }
0x1418   :  { %2727 = vrcp.f32 %v1083_v43 }
0x1419   :  { %2729 = vrcp.f32 %v1107_v20 }
0x1425   :  { %v2728_v4 = vpop.eup %2727 }
0x1426   :  { %v2730_v47 = vpop.eup %2729  ;;  %v1087_v48 = vmul.f32 %v2728_v4, %v991_v7 }
0x1427   :  { %v1111_v37 = vmul.f32 %v2730_v47, %v1015_v9  ;;  %v1147_v9 = vpack.c.bf16 %v1141_v57, %v1140_v8 }
0x1485   :  { %v1090_v45 = vpop.permute.xlu1 %1089 }
0x1486   :  { %v1092_v46 = vmul.f32 %v2728_v4, %v1090_v45 }
0x1487   :  { %v1114_v40 = vpop.permute.xlu0 %1113 }
0x1488   :  { %1094 = vrot.lane.b32.xlu1 %v1092_v46, %s2951_s20  ;;  %v1116_v35 = vmul.f32 %v2730_v47, %v1114_v40 }
0x148a   :  { %1118 = vrot.lane.b32.xlu0 %v1116_v35, %s2951_s20 }
0x14fa   :  { %v1095_v49 = vpop.permute.xlu1 %1094 }
0x14fb   :  { %v1097_v50 = vadd.f32 %v1095_v49, %v1087_v48 }
0x14fc   :  { %v1119_v51 = vpop.permute.xlu0 %1118 }
0x14fd   :  { %2731 = vtanh.f32 %v1097_v50  ;;  %v1121_v52 = vadd.f32 %v1119_v51, %v1111_v37 }
0x14ff   :  { %2733 = vtanh.f32 %v1121_v52 }
0x150a   :  { %v2732_v55 = vpop.eup %2731 }
0x150b   :  { %1100 = vrot.lane.b32.xlu1 %v2732_v55, %s2950_s4 }
0x150c   :  { %v2734_v58 = vpop.eup %2733 }
0x150d   :  { %1124 = vrot.lane.b32.xlu0 %v2734_v58, %s2950_s4 }
0x157d   :  { %v1101_v0 = vpop.permute.xlu1 %1100 }
0x157e   :  { %v1103_v3 = vmul.f32 %v2728_v4, %v1101_v0 }
0x157f   :  { %v1125_v11 = vpop.permute.xlu0 %1124 }
0x1580   :  { %1129 = vrot.lane.b32.xlu1 %v1103_v3, %s2951_s20  ;;  %v1127_v12 = vmul.f32 %v2730_v47, %v1125_v11 }
0x1582   :  { %1134 = vrot.lane.b32.xlu0 %v1127_v12, %s2950_s4 }
0x15f2   :  { %v1130_v5 = vpop.permute.xlu1 %1129 }
0x15f3   :  { %1132 = vst.msk [vmem:[#allocation3 + $0x38] sm:$0xff] %vm81_vm0, %v1130_v5 }
0x15f4   :  { %v1135_v62 = vpop.permute.xlu0 %1134 }
0x15f5   :  { %1137 = vst.msk [vmem:[#allocation3] sm:$0xff] %vm353_vm2, %v1135_v62 }
0x15fa   :  { %v1145_v14 = vld [vmem:[#allocation3 + $0x38] sm:$0xff] }
0x15fb   :  { %v1149_v15 = vpack.c.bf16 %v1145_v14, %v1144_v19  ;;  %v3493_v14 = vld [vmem:[#allocation12 + $0x20] ss:$8 sps:$4 sm:$0xff]   ;;  %v3497_v19 = vld [vmem:[#allocation12 + $0x14] ss:$8 sps:$4 sm:$0xff]  }
0x15fc   :  { %v1138_v1 = vld [vmem:[#allocation3] sm:$0xff] }
0x15fd   :  { %v1146_v7 = vpack.c.bf16 %v1139_v6, %v1138_v1 }
0x15ff   :  { %2473 = vmatmul.mubr.msk.bf16.vlgmr.msra.gmra.mxu1 %vm397_vm3, %v1146_v7 }
0x1600   :  { %1264 = vmatprep.mubr.bf16.mxu1 %v2948_v2  ;;  %1627 = vmatpush1.bf16.msra.mxu1 %v3486_v13 }
0x1607   :  { %2474 = vmatmul.mubr.msk.bf16.gmra.mxu1 %vm397_vm3, %v1147_v9 }
0x1608   :  { %1274 = vmatprep.mubr.bf16.mxu1 %v2948_v2 }
0x160f   :  { %2475 = vmatmul.mubr.msk.bf16.gmra.mxu1 %vm397_vm3, %v1148_v36  ;;  %v3488_v36 = vld [vmem:[#allocation12 + $0x24] ss:$8 sps:$4 sm:$0xff]  }
0x1610   :  { %1284 = vmatprep.mubr.bf16.mxu1 %v2948_v2  ;;  %1416 = vmatprep.subr.bf16.mxu0 %v3488_v36 }
0x1611   :  { %1628 = vmatprep.subr.bf16.mxu1 %v3488_v36  ;;  %1417 = vmatpush1.bf16.msra.mxu0 %v3493_v14 }
0x1612   :  { %1629 = vmatpush1.bf16.msra.mxu1 %v3493_v14  ;;  %1418 = vmatprep.subr.bf16.mxu0 %v3497_v19 }
0x1613   :  { %1630 = vmatprep.subr.bf16.mxu1 %v3497_v19 }
0x1617   :  { %2476 = vmatmul.mubr.msk.bf16.gmra.mxu1 %vm397_vm3, %v1149_v15  ;;  %v3501_v15 = vld [vmem:[#allocation12 + $0x10] ss:$8 sps:$4 sm:$0xff]  }
0x1618   :  { %1650 = vmatprep.mubr.bf16.mxu1 %v2948_v2  ;;  %1419 = vmatpush1.bf16.msra.mxu0 %v3501_v15 }
0x1619   :  { %1631 = vmatpush1.bf16.msra.mxu1 %v3501_v15  ;;  %1420 = vmatprep.subr.bf16.mxu0 %v3505_v60 }
0x161a   :  { %1632 = vmatprep.subr.bf16.mxu1 %v3505_v60 }
0x16bf   :  { %v1256_v18 = vpop.f32.mrf.mxu1 }
0x16c0   :  { %v1257_v21 = vadd.f32 %v1256_v18, %v1163_v16  ;;  %v1295_v18 = vld [vmem:[#allocation12] sm:$0xff] }
0x16c1   :  { %v1258_v23 = vpop.f32.mrf.mxu1 }
0x16c2   :  { %2735 = vtanh.f32 %v1257_v21  ;;  %v3444_v25 = vadd.f32 %v1258_v23, %v1167_v17  ;;  %v2477_v55 = vmul.f32 -1.442695, %v1257_v21  ;;  %v1296_v21 = vld [vmem:[#allocation12 + $0x8] sm:$0xff] }
0x16c3   :  { %v1260_v26 = vpop.f32.mrf.mxu1  ;;  %v3513_v23 = vcombine.low %v1295_v18, %v1296_v21 }
0x16c4   :  { %v3446_v27 = vadd.f32 %v1260_v26, %v1163_v16 }
0x16c5   :  { %v1262_v30 = vpop.f32.mrf.mxu1  ;;  %1421 = vmatpush1.bf16.msra.mxu0 %v3513_v23  ;;  %1633 = vmatpush1.bf16.msra.mxu1 %v3513_v23 }
0x16c6   :  { %v3448_v32 = vadd.f32 %v1262_v30, %v1167_v17  ;;  %1520 = vmatprep.subr.bf16.mxu0 %v3484_v10  ;;  %1838 = vmatprep.subr.bf16.mxu1 %v3484_v10 }
0x16c7   :  { %v1266_v33 = vpop.f32.mrf.mxu1 }
0x16c8   :  { %v3450_v34 = vadd.f32 %v1266_v33, %v1163_v16 }
0x16c9   :  { %v1268_v41 = vpop.f32.mrf.mxu1 }
0x16ca   :  { %v3452_v29 = vadd.f32 %v1268_v41, %v1167_v17 }
0x16cb   :  { %v1270_v28 = vpop.f32.mrf.mxu1 }
0x16cc   :  { %v3454_v39 = vadd.f32 %v1270_v28, %v1163_v16 }
0x16cd   :  { %v1272_v22 = vpop.f32.mrf.mxu1 }
0x16ce   :  { %v3456_v44 = vadd.f32 %v1272_v22, %v1167_v17 }
0x16cf   :  { %v2736_v31 = vpop.eup %2735  ;;  %v1276_v42 = vpop.f32.mrf.mxu1 }
0x16d0   :  { %v3458_v43 = vadd.f32 %v1276_v42, %v1163_v16  ;;  %1312 = vrot.lane.b32.xlu0 %v2736_v31, %s2950_s4 }
0x16d1   :  { %v1278_v20 = vpop.f32.mrf.mxu1 }
0x16d2   :  { %v3461_v4 = vadd.f32 %v1278_v20, %v1167_v17 }
0x16d3   :  { %v1280_v45 = vpop.f32.mrf.mxu1 }
0x16d4   :  { %v3463_v46 = vadd.f32 %v1280_v45, %v1163_v16 }
0x16d5   :  { %v1282_v47 = vpop.f32.mrf.mxu1 }
0x16d6   :  { %v3465_v40 = vadd.f32 %v1282_v47, %v1167_v17 }
0x16d7   :  { %v1286_v35 = vpop.f32.mrf.mxu1 }
0x16d8   :  { %v3467_v48 = vadd.f32 %v1286_v35, %v1163_v16 }
0x16d9   :  { %v1288_v49 = vpop.f32.mrf.mxu1 }
0x16da   :  { %v3469_v50 = vadd.f32 %v1288_v49, %v1167_v17 }
0x16db   :  { %v1290_v37 = vpop.f32.mrf.mxu1 }
0x16dc   :  { %v3471_v51 = vadd.f32 %v1290_v37, %v1163_v16 }
0x16dd   :  { %v1292_v52 = vpop.f32.mrf.mxu1 }
0x16de   :  { %v1293_v53 = vadd.f32 %v1292_v52, %v1167_v17 }
0x16e0   :  { %2737 = vtanh.f32 %v1293_v53  ;;  %v2478_v56 = vmul.f32 -1.442695, %v1293_v53 }
0x16e1   :  { %2739 = vpow2.f32 %v2477_v55 }
0x16ed   :  { %v2738_v54 = vpop.eup %2737 }
0x16ee   :  { %1336 = vrot.lane.b32.xlu1 %v2738_v54, %s2950_s4  ;;  %v2740_v58 = vpop.eup %2739 }
0x16ef   :  { %v1306_v59 = vadd.f32 1.0, %v2740_v58 }
0x16f1   :  { %2741 = vrcp.f32 %v1306_v59 }
0x16f2   :  { %2743 = vpow2.f32 %v2478_v56 }
0x16fe   :  { %v2742_v38 = vpop.eup %2741 }
0x16ff   :  { %v2744_v63 = vpop.eup %2743  ;;  %v1310_v5 = vmul.f32 0.0, %v2742_v38 }
0x1700   :  { %v1330_v0 = vadd.f32 1.0, %v2744_v63 }
0x1702   :  { %2745 = vrcp.f32 %v1330_v0 }
0x170f   :  { %v2746_v3 = vpop.eup %2745 }
0x1710   :  { %v1334_v7 = vmul.f32 0.0, %v2746_v3 }
0x1742   :  { %v1313_v61 = vpop.permute.xlu0 %1312 }
0x1743   :  { %v1315_v24 = vmul.f32 %v2742_v38, %v1313_v61 }
0x1745   :  { %1317 = vrot.lane.b32.xlu0 %v1315_v24, %s2951_s20 }
0x1760   :  { %v1337_v11 = vpop.permute.xlu1 %1336 }
0x1761   :  { %v1339_v12 = vmul.f32 %v2746_v3, %v1337_v11 }
0x1763   :  { %1341 = vrot.lane.b32.xlu1 %v1339_v12, %s2951_s20 }
0x17b7   :  { %v1318_v62 = vpop.permute.xlu0 %1317 }
0x17b8   :  { %v3476_v1 = vadd.f32 %v1318_v62, %v1310_v5 }
0x17ba   :  { %2747 = vtanh.f32 %v3476_v1 }
0x17c7   :  { %v2748_v6 = vpop.eup %2747 }
0x17c8   :  { %1323 = vrot.lane.b32.xlu0 %v2748_v6, %s2950_s4 }
0x17d5   :  { %v1342_v8 = vpop.permute.xlu1 %1341 }
0x17d6   :  { %v3480_v57 = vadd.f32 %v1342_v8, %v1334_v7 }
0x17d8   :  { %2749 = vtanh.f32 %v3480_v57 }
0x17e5   :  { %v2750_v9 = vpop.eup %2749 }
0x17e6   :  { %1347 = vrot.lane.b32.xlu1 %v2750_v9, %s2950_s4 }
0x183a   :  { %v1324_v16 = vpop.permute.xlu0 %1323 }
0x183b   :  { %v1326_v17 = vmul.f32 %v2742_v38, %v1324_v16 }
0x183d   :  { %1352 = vrot.lane.b32.xlu0 %v1326_v17, %s2951_s20 }
0x1858   :  { %v1348_v26 = vpop.permute.xlu1 %1347 }
0x1859   :  { %v1350_v30 = vmul.f32 %v2746_v3, %v1348_v26 }
0x185b   :  { %1357 = vrot.lane.b32.xlu1 %v1350_v30, %s2950_s4 }
0x18af   :  { %v1353_v33 = vpop.permute.xlu0 %1352 }
0x18b0   :  { %1355 = vst.msk [vmem:[#allocation4] sm:$0xff] %vm81_vm0, %v1353_v33 }
0x18cd   :  { %v1358_v41 = vpop.permute.xlu1 %1357 }
0x18ce   :  { %1360 = vst.msk [vmem:[#allocation4 + $0x38] sm:$0xff] %vm353_vm2, %v1358_v41  ;;  %v1361_v28 = vsel %vm81_vm0, %v1353_v33, %v1358_v41 }
0x18cf   :  { %v1362_v22 = vpack.c.bf16 %v1361_v28, %v1361_v28 }
0x18d1   :  { %2487 = vmatmul.mubr.msk.bf16.vlgmr.msra.gmra.mxu0 %vm397_vm3, %v1362_v22 }
0x18d2   :  { %1521 = vmatpush1.bf16.msra.mxu0 %v3486_v13  ;;  %1544 = vmatprep.mubr.bf16.mxu0 %v2948_v2 }
0x18d3   :  { %1522 = vmatprep.subr.bf16.mxu0 %v3488_v36 }
0x18d6   :  { %1523 = vmatpush1.bf16.msra.mxu0 %v3493_v14 }
0x18d7   :  { %1524 = vmatprep.subr.bf16.mxu0 %v3497_v19 }
0x18da   :  { %1525 = vmatpush1.bf16.msra.mxu0 %v3501_v15 }
0x18db   :  { %1526 = vmatprep.subr.bf16.mxu0 %v3505_v60 }
0x18de   :  { %1527 = vmatpush1.bf16.msra.mxu0 %v3513_v23 }
0x18df   :  { %1732 = vmatprep.subr.bf16.mxu0 %v3484_v10 }
0x1991   :  { %v1440_v31 = vpop.f32.mrf.mxu0 }
0x1992   :  { %v1447_v42 = vadd.f32 %v1440_v31, %v3446_v27 }
0x1993   :  { %v1442_v20 = vpop.f32.mrf.mxu0 }
0x1994   :  { %2751 = vtanh.f32 %v1447_v42  ;;  %v1448_v45 = vadd.f32 %v1442_v20, %v3469_v50  ;;  %v2488_v52 = vmul.f32 -1.442695, %v1447_v42 }
0x1995   :  { %v1444_v47 = vpop.f32.mrf.mxu0 }
0x1996   :  { %2753 = vtanh.f32 %v1448_v45  ;;  %v2489_v53 = vmul.f32 -1.442695, %v1448_v45 }
0x1997   :  { %v1445_v35 = vpop.f32.mrf.mxu0  ;;  %2755 = vpow2.f32 %v2488_v52 }
0x1998   :  { %2757 = vpow2.f32 %v2489_v53 }
0x19a1   :  { %v2752_v49 = vpop.eup %2751 }
0x19a2   :  { %1458 = vrot.lane.b32.xlu0 %v2752_v49, %s2950_s4 }
0x19a3   :  { %v2754_v37 = vpop.eup %2753 }
0x19a4   :  { %1482 = vrot.lane.b32.xlu1 %v2754_v37, %s2950_s4  ;;  %v2756_v54 = vpop.eup %2755 }
0x19a5   :  { %v2758_v55 = vpop.eup %2757  ;;  %v1452_v27 = vadd.f32 1.0, %v2756_v54 }
0x19a6   :  { %v1476_v58 = vadd.f32 1.0, %v2758_v55 }
0x19a7   :  { %2759 = vrcp.f32 %v1452_v27 }
0x19a8   :  { %2761 = vrcp.f32 %v1476_v58 }
0x19b4   :  { %v2760_v50 = vpop.eup %2759 }
0x19b5   :  { %v2762_v38 = vpop.eup %2761  ;;  %v1456_v63 = vmul.f32 %v2760_v50, %v3476_v1 }
0x19b6   :  { %v1480_v11 = vmul.f32 %v2762_v38, %v3480_v57 }
0x1a14   :  { %v1459_v59 = vpop.permute.xlu0 %1458 }
0x1a15   :  { %v1461_v56 = vmul.f32 %v2760_v50, %v1459_v59 }
0x1a16   :  { %v1483_v61 = vpop.permute.xlu1 %1482 }
0x1a17   :  { %1463 = vrot.lane.b32.xlu0 %v1461_v56, %s2951_s20  ;;  %v1485_v24 = vmul.f32 %v2762_v38, %v1483_v61 }
0x1a19   :  { %1487 = vrot.lane.b32.xlu1 %v1485_v24, %s2951_s20 }
0x1a89   :  { %v1464_v0 = vpop.permute.xlu0 %1463 }
0x1a8a   :  { %v1466_v3 = vadd.f32 %v1464_v0, %v1456_v63 }
0x1a8b   :  { %v1488_v12 = vpop.permute.xlu1 %1487 }
0x1a8c   :  { %2763 = vtanh.f32 %v1466_v3  ;;  %v1490_v5 = vadd.f32 %v1488_v12, %v1480_v11 }
0x1a8e   :  { %2765 = vtanh.f32 %v1490_v5 }
0x1a99   :  { %v2764_v62 = vpop.eup %2763 }
0x1a9a   :  { %1469 = vrot.lane.b32.xlu0 %v2764_v62, %s2950_s4 }
0x1a9b   :  { %v2766_v6 = vpop.eup %2765 }
0x1a9c   :  { %1493 = vrot.lane.b32.xlu1 %v2766_v6, %s2950_s4 }
0x1b0c   :  { %v1470_v7 = vpop.permute.xlu0 %1469 }
0x1b0d   :  { %v1472_v8 = vmul.f32 %v2760_v50, %v1470_v7 }
0x1b0e   :  { %v1494_v9 = vpop.permute.xlu1 %1493 }
0x1b0f   :  { %1498 = vrot.lane.b32.xlu0 %v1472_v8, %s2951_s20  ;;  %v1496_v1 = vmul.f32 %v2762_v38, %v1494_v9 }
0x1b11   :  { %1503 = vrot.lane.b32.xlu1 %v1496_v1, %s2950_s4 }
0x1b81   :  { %v1499_v16 = vpop.permute.xlu0 %1498 }
0x1b82   :  { %1501 = vst.msk [vmem:[#allocation4 + $0x8] sm:$0xff] %vm81_vm0, %v1499_v16 }
0x1b83   :  { %v1504_v57 = vpop.permute.xlu1 %1503 }
0x1b84   :  { %1506 = vst.msk [vmem:[#allocation4 + $0x30] sm:$0xff] %vm353_vm2, %v1504_v57  ;;  %v1507_v17 = vsel %vm81_vm0, %v1499_v16, %v1504_v57 }
0x1b85   :  { %v1508_v18 = vpack.c.bf16 %v1507_v17, %v1507_v17 }
0x1b87   :  { %2490 = vmatmul.mubr.msk.bf16.vlgmr.msra.gmra.mxu0 %vm397_vm3, %v1508_v18 }
0x1b88   :  { %1733 = vmatpush1.bf16.msra.mxu0 %v3486_v13  ;;  %1756 = vmatprep.mubr.bf16.mxu0 %v2948_v2 }
0x1b89   :  { %1734 = vmatprep.subr.bf16.mxu0 %v3488_v36 }
0x1b8c   :  { %1735 = vmatpush1.bf16.msra.mxu0 %v3493_v14 }
0x1b8d   :  { %1736 = vmatprep.subr.bf16.mxu0 %v3497_v19 }
0x1b90   :  { %1737 = vmatpush1.bf16.msra.mxu0 %v3501_v15 }
0x1b91   :  { %1738 = vmatprep.subr.bf16.mxu0 %v3505_v60 }
0x1b94   :  { %1739 = vmatpush1.bf16.msra.mxu0 %v3513_v23 }
0x1b95   :  { %1944 = vmatprep.subr.bf16.mxu0 %v3484_v10 }
0x1c47   :  { %v1546_v21 = vpop.f32.mrf.mxu0 }
0x1c48   :  { %v1553_v26 = vadd.f32 %v1546_v21, %v3450_v34 }
0x1c49   :  { %v1548_v30 = vpop.f32.mrf.mxu0 }
0x1c4a   :  { %2767 = vtanh.f32 %v1553_v26  ;;  %v1554_v33 = vadd.f32 %v1548_v30, %v3465_v40  ;;  %v2491_v42 = vmul.f32 -1.442695, %v1553_v26 }
0x1c4b   :  { %v1550_v41 = vpop.f32.mrf.mxu0 }
0x1c4c   :  { %2769 = vtanh.f32 %v1554_v33  ;;  %v2492_v20 = vmul.f32 -1.442695, %v1554_v33 }
0x1c4d   :  { %v1551_v28 = vpop.f32.mrf.mxu0  ;;  %2771 = vpow2.f32 %v2491_v42 }
0x1c4e   :  { %2773 = vpow2.f32 %v2492_v20 }
0x1c57   :  { %v2768_v22 = vpop.eup %2767 }
0x1c58   :  { %1564 = vrot.lane.b32.xlu0 %v2768_v22, %s2950_s4 }
0x1c59   :  { %v2770_v31 = vpop.eup %2769 }
0x1c5a   :  { %1588 = vrot.lane.b32.xlu1 %v2770_v31, %s2950_s4  ;;  %v2772_v45 = vpop.eup %2771 }
0x1c5b   :  { %v2774_v47 = vpop.eup %2773  ;;  %v1558_v34 = vadd.f32 1.0, %v2772_v45 }
0x1c5c   :  { %v1582_v35 = vadd.f32 1.0, %v2774_v47 }
0x1c5d   :  { %2775 = vrcp.f32 %v1558_v34 }
0x1c5e   :  { %2777 = vrcp.f32 %v1582_v35 }
0x1c6a   :  { %v2776_v40 = vpop.eup %2775 }
0x1c6b   :  { %v2778_v52 = vpop.eup %2777  ;;  %v1562_v55 = vmul.f32 %v2776_v40, %v1466_v3 }
0x1c6c   :  { %v1586_v50 = vmul.f32 %v2778_v52, %v1490_v5 }
0x1cca   :  { %v1565_v49 = vpop.permute.xlu0 %1564 }
0x1ccb   :  { %v1567_v37 = vmul.f32 %v2776_v40, %v1565_v49 }
0x1ccc   :  { %v1589_v53 = vpop.permute.xlu1 %1588 }
0x1ccd   :  { %1569 = vrot.lane.b32.xlu0 %v1567_v37, %s2951_s20  ;;  %v1591_v54 = vmul.f32 %v2778_v52, %v1589_v53 }
0x1ccf   :  { %1593 = vrot.lane.b32.xlu1 %v1591_v54, %s2951_s20 }
0x1d3f   :  { %v1570_v27 = vpop.permute.xlu0 %1569 }
0x1d40   :  { %v1572_v58 = vadd.f32 %v1570_v27, %v1562_v55 }
0x1d41   :  { %v1594_v59 = vpop.permute.xlu1 %1593 }
0x1d42   :  { %2779 = vtanh.f32 %v1572_v58  ;;  %v1596_v56 = vadd.f32 %v1594_v59, %v1586_v50 }
0x1d44   :  { %2781 = vtanh.f32 %v1596_v56 }
0x1d4f   :  { %v2780_v38 = vpop.eup %2779 }
0x1d50   :  { %1575 = vrot.lane.b32.xlu0 %v2780_v38, %s2950_s4 }
0x1d51   :  { %v2782_v61 = vpop.eup %2781 }
0x1d52   :  { %1599 = vrot.lane.b32.xlu1 %v2782_v61, %s2950_s4 }
0x1dc2   :  { %v1576_v24 = vpop.permute.xlu0 %1575 }
0x1dc3   :  { %v1578_v63 = vmul.f32 %v2776_v40, %v1576_v24 }
0x1dc4   :  { %v1600_v0 = vpop.permute.xlu1 %1599 }
0x1dc5   :  { %1604 = vrot.lane.b32.xlu0 %v1578_v63, %s2951_s20  ;;  %v1602_v11 = vmul.f32 %v2778_v52, %v1600_v0 }
0x1dc7   :  { %1609 = vrot.lane.b32.xlu1 %v1602_v11, %s2950_s4 }
0x1e37   :  { %v1605_v3 = vpop.permute.xlu0 %1604 }
0x1e38   :  { %1607 = vst.msk [vmem:[#allocation4 + $0x10] sm:$0xff] %vm81_vm0, %v1605_v3 }
0x1e39   :  { %v1610_v12 = vpop.permute.xlu1 %1609 }
0x1e3a   :  { %1612 = vst.msk [vmem:[#allocation4 + $0x28] sm:$0xff] %vm353_vm2, %v1610_v12  ;;  %v1613_v5 = vsel %vm81_vm0, %v1605_v3, %v1610_v12 }
0x1e3b   :  { %v1614_v62 = vpack.c.bf16 %v1613_v5, %v1613_v5 }
0x1e3d   :  { %2493 = vmatmul.mubr.msk.bf16.vlgmr.msra.gmra.mxu1 %vm397_vm3, %v1614_v62 }
0x1e3e   :  { %1839 = vmatpush1.bf16.msra.mxu1 %v3486_v13  ;;  %1862 = vmatprep.mubr.bf16.mxu1 %v2948_v2 }
0x1e3f   :  { %1840 = vmatprep.subr.bf16.mxu1 %v3488_v36 }
0x1e42   :  { %1841 = vmatpush1.bf16.msra.mxu1 %v3493_v14 }
0x1e43   :  { %1842 = vmatprep.subr.bf16.mxu1 %v3497_v19 }
0x1e46   :  { %1843 = vmatpush1.bf16.msra.mxu1 %v3501_v15 }
0x1e47   :  { %1844 = vmatprep.subr.bf16.mxu1 %v3505_v60 }
0x1e4a   :  { %1845 = vmatpush1.bf16.msra.mxu1 %v3513_v23 }
0x1e4b   :  { %2050 = vmatprep.subr.bf16.mxu1 %v3484_v10 }
0x1efd   :  { %v1652_v6 = vpop.f32.mrf.mxu1 }
0x1efe   :  { %v1659_v7 = vadd.f32 %v1652_v6, %v3454_v39 }
0x1eff   :  { %v1654_v8 = vpop.f32.mrf.mxu1 }
0x1f00   :  { %2783 = vtanh.f32 %v1659_v7  ;;  %v1660_v9 = vadd.f32 %v1654_v8, %v3461_v4  ;;  %v2494_v18 = vmul.f32 -1.442695, %v1659_v7 }
0x1f01   :  { %v1656_v1 = vpop.f32.mrf.mxu1 }
0x1f02   :  { %2785 = vtanh.f32 %v1660_v9  ;;  %v2495_v21 = vmul.f32 -1.442695, %v1660_v9 }
0x1f03   :  { %v1657_v16 = vpop.f32.mrf.mxu1  ;;  %2787 = vpow2.f32 %v2494_v18 }
0x1f04   :  { %2789 = vpow2.f32 %v2495_v21 }
0x1f0d   :  { %v2784_v57 = vpop.eup %2783 }
0x1f0e   :  { %1670 = vrot.lane.b32.xlu0 %v2784_v57, %s2950_s4 }
0x1f0f   :  { %v2786_v17 = vpop.eup %2785 }
0x1f10   :  { %1694 = vrot.lane.b32.xlu1 %v2786_v17, %s2950_s4  ;;  %v2788_v10 = vpop.eup %2787 }
0x1f11   :  { %v2790_v26 = vpop.eup %2789  ;;  %v1664_v39 = vadd.f32 1.0, %v2788_v10 }
0x1f12   :  { %v1688_v30 = vadd.f32 1.0, %v2790_v26 }
0x1f13   :  { %2791 = vrcp.f32 %v1664_v39 }
0x1f14   :  { %2793 = vrcp.f32 %v1688_v30 }
0x1f20   :  { %v2792_v4 = vpop.eup %2791 }
0x1f21   :  { %v2794_v28 = vpop.eup %2793  ;;  %v1668_v42 = vmul.f32 %v2792_v4, %v1572_v58 }
0x1f22   :  { %v1692_v47 = vmul.f32 %v2794_v28, %v1596_v56 }
0x1f80   :  { %v1671_v33 = vpop.permute.xlu0 %1670 }
0x1f81   :  { %v1673_v41 = vmul.f32 %v2792_v4, %v1671_v33 }
0x1f82   :  { %v1695_v22 = vpop.permute.xlu1 %1694 }
0x1f83   :  { %1675 = vrot.lane.b32.xlu0 %v1673_v41, %s2951_s20  ;;  %v1697_v31 = vmul.f32 %v2794_v28, %v1695_v22 }
0x1f85   :  { %1699 = vrot.lane.b32.xlu1 %v1697_v31, %s2951_s20 }
0x1ff5   :  { %v1676_v20 = vpop.permute.xlu0 %1675 }
0x1ff6   :  { %v1678_v45 = vadd.f32 %v1676_v20, %v1668_v42 }
0x1ff7   :  { %v1700_v34 = vpop.permute.xlu1 %1699 }
0x1ff8   :  { %2795 = vtanh.f32 %v1678_v45  ;;  %v1702_v35 = vadd.f32 %v1700_v34, %v1692_v47 }
0x1ffa   :  { %2797 = vtanh.f32 %v1702_v35 }
0x2005   :  { %v2796_v40 = vpop.eup %2795 }
0x2006   :  { %1681 = vrot.lane.b32.xlu0 %v2796_v40, %s2950_s4 }
0x2007   :  { %v2798_v49 = vpop.eup %2797 }
0x2008   :  { %1705 = vrot.lane.b32.xlu1 %v2798_v49, %s2950_s4 }
0x2078   :  { %v1682_v37 = vpop.permute.xlu0 %1681 }
0x2079   :  { %v1684_v52 = vmul.f32 %v2792_v4, %v1682_v37 }
0x207a   :  { %v1706_v53 = vpop.permute.xlu1 %1705 }
0x207b   :  { %1710 = vrot.lane.b32.xlu0 %v1684_v52, %s2951_s20  ;;  %v1708_v54 = vmul.f32 %v2794_v28, %v1706_v53 }
0x207d   :  { %1715 = vrot.lane.b32.xlu1 %v1708_v54, %s2950_s4 }
0x20ed   :  { %v1711_v55 = vpop.permute.xlu0 %1710 }
0x20ee   :  { %1713 = vst.msk [vmem:[#allocation4 + $0x18] sm:$0xff] %vm81_vm0, %v1711_v55 }
0x20ef   :  { %v1716_v27 = vpop.permute.xlu1 %1715 }
0x20f0   :  { %1718 = vst.msk [vmem:[#allocation4 + $0x20] sm:$0xff] %vm353_vm2, %v1716_v27  ;;  %v1719_v58 = vsel %vm81_vm0, %v1711_v55, %v1716_v27 }
0x20f1   :  { %v1720_v50 = vpack.c.bf16 %v1719_v58, %v1719_v58 }
0x20f3   :  { %2496 = vmatmul.mubr.msk.bf16.vlgmr.msra.gmra.mxu0 %vm397_vm3, %v1720_v50 }
0x20f4   :  { %1945 = vmatpush1.bf16.msra.mxu0 %v3486_v13  ;;  %1968 = vmatprep.mubr.bf16.mxu0 %v2948_v2 }
0x20f5   :  { %1946 = vmatprep.subr.bf16.mxu0 %v3488_v36 }
0x20f8   :  { %1947 = vmatpush1.bf16.msra.mxu0 %v3493_v14 }
0x20f9   :  { %1948 = vmatprep.subr.bf16.mxu0 %v3497_v19 }
0x20fc   :  { %1949 = vmatpush1.bf16.msra.mxu0 %v3501_v15 }
0x20fd   :  { %1950 = vmatprep.subr.bf16.mxu0 %v3505_v60 }
0x2100   :  { %1951 = vmatpush1.bf16.msra.mxu0 %v3513_v23 }
0x21b3   :  { %v1758_v59 = vpop.f32.mrf.mxu0 }
0x21b4   :  { %v1765_v56 = vadd.f32 %v1758_v59, %v3458_v43 }
0x21b5   :  { %v1760_v38 = vpop.f32.mrf.mxu0 }
0x21b6   :  { %2799 = vtanh.f32 %v1765_v56  ;;  %v1766_v61 = vadd.f32 %v1760_v38, %v3456_v44  ;;  %v2497_v3 = vmul.f32 -1.442695, %v1765_v56 }
0x21b7   :  { %v1762_v24 = vpop.f32.mrf.mxu0 }
0x21b8   :  { %2801 = vtanh.f32 %v1766_v61  ;;  %v2498_v12 = vmul.f32 -1.442695, %v1766_v61 }
0x21b9   :  { %v1763_v63 = vpop.f32.mrf.mxu0  ;;  %2803 = vpow2.f32 %v2497_v3 }
0x21ba   :  { %2805 = vpow2.f32 %v2498_v12 }
0x21c3   :  { %v2800_v0 = vpop.eup %2799 }
0x21c4   :  { %1776 = vrot.lane.b32.xlu0 %v2800_v0, %s2950_s4 }
0x21c5   :  { %v2802_v11 = vpop.eup %2801 }
0x21c6   :  { %1800 = vrot.lane.b32.xlu1 %v2802_v11, %s2950_s4  ;;  %v2804_v5 = vpop.eup %2803 }
0x21c7   :  { %v2806_v62 = vpop.eup %2805  ;;  %v1770_v43 = vadd.f32 1.0, %v2804_v5 }
0x21c8   :  { %v1794_v6 = vadd.f32 1.0, %v2806_v62 }
0x21c9   :  { %2807 = vrcp.f32 %v1770_v43 }
0x21ca   :  { %2809 = vrcp.f32 %v1794_v6 }
0x21d6   :  { %v2808_v44 = vpop.eup %2807 }
0x21d7   :  { %v2810_v9 = vpop.eup %2809  ;;  %v1774_v57 = vmul.f32 %v2808_v44, %v1678_v45 }
0x21d8   :  { %v1798_v21 = vmul.f32 %v2810_v9, %v1702_v35 }
0x2236   :  { %v1777_v7 = vpop.permute.xlu0 %1776 }
0x2237   :  { %v1779_v8 = vmul.f32 %v2808_v44, %v1777_v7 }
0x2238   :  { %v1801_v1 = vpop.permute.xlu1 %1800 }
0x2239   :  { %1781 = vrot.lane.b32.xlu0 %v1779_v8, %s2951_s20  ;;  %v1803_v16 = vmul.f32 %v2810_v9, %v1801_v1 }
0x223b   :  { %1805 = vrot.lane.b32.xlu1 %v1803_v16, %s2951_s20 }
0x22ab   :  { %v1782_v17 = vpop.permute.xlu0 %1781 }
0x22ac   :  { %v1784_v18 = vadd.f32 %v1782_v17, %v1774_v57 }
0x22ad   :  { %v1806_v10 = vpop.permute.xlu1 %1805 }
0x22ae   :  { %2811 = vtanh.f32 %v1784_v18  ;;  %v1808_v26 = vadd.f32 %v1806_v10, %v1798_v21 }
0x22b0   :  { %2813 = vtanh.f32 %v1808_v26 }
0x22bb   :  { %v2812_v39 = vpop.eup %2811 }
0x22bc   :  { %1787 = vrot.lane.b32.xlu0 %v2812_v39, %s2950_s4 }
0x22bd   :  { %v2814_v30 = vpop.eup %2813 }
0x22be   :  { %1811 = vrot.lane.b32.xlu1 %v2814_v30, %s2950_s4 }
0x232e   :  { %v1788_v4 = vpop.permute.xlu0 %1787 }
0x232f   :  { %v1790_v33 = vmul.f32 %v2808_v44, %v1788_v4 }
0x2330   :  { %v1812_v41 = vpop.permute.xlu1 %1811 }
0x2331   :  { %1816 = vrot.lane.b32.xlu0 %v1790_v33, %s2951_s20  ;;  %v1814_v28 = vmul.f32 %v2810_v9, %v1812_v41 }
0x2333   :  { %1821 = vrot.lane.b32.xlu1 %v1814_v28, %s2950_s4 }
0x23a3   :  { %v1817_v22 = vpop.permute.xlu0 %1816 }
0x23a4   :  { %1819 = vst.msk [vmem:[#allocation4 + $0x20] sm:$0xff] %vm81_vm0, %v1817_v22 }
0x23a5   :  { %v1822_v31 = vpop.permute.xlu1 %1821 }
0x23a6   :  { %1824 = vst.msk [vmem:[#allocation4 + $0x18] sm:$0xff] %vm353_vm2, %v1822_v31  ;;  %v1825_v42 = vsel %vm81_vm0, %v1817_v22, %v1822_v31 }
0x23a7   :  { %v1826_v20 = vpack.c.bf16 %v1825_v42, %v1825_v42 }
0x23a9   :  { %2499 = vmatmul.mubr.msk.bf16.vlgmr.msra.gmra.mxu1 %vm397_vm3, %v1826_v20 }
0x23aa   :  { %2051 = vmatpush1.bf16.msra.mxu1 %v3486_v13  ;;  %2074 = vmatprep.mubr.bf16.mxu1 %v2948_v2 }
0x23ab   :  { %2052 = vmatprep.subr.bf16.mxu1 %v3488_v36 }
0x23ae   :  { %2053 = vmatpush1.bf16.msra.mxu1 %v3493_v14 }
0x23af   :  { %2054 = vmatprep.subr.bf16.mxu1 %v3497_v19 }
0x23b2   :  { %2055 = vmatpush1.bf16.msra.mxu1 %v3501_v15 }
0x23b3   :  { %2056 = vmatprep.subr.bf16.mxu1 %v3505_v60 }
0x23b6   :  { %2057 = vmatpush1.bf16.msra.mxu1 %v3513_v23 }
0x2469   :  { %v1864_v45 = vpop.f32.mrf.mxu1 }
0x246a   :  { %v1871_v47 = vadd.f32 %v1864_v45, %v3463_v46 }
0x246b   :  { %v1866_v34 = vpop.f32.mrf.mxu1 }
0x246c   :  { %2815 = vtanh.f32 %v1871_v47  ;;  %v1872_v13 = vadd.f32 %v1866_v34, %v3452_v29  ;;  %v2500_v19 = vmul.f32 -1.442695, %v1871_v47 }
0x246d   :  { %v1868_v2 = vpop.f32.mrf.mxu1 }
0x246e   :  { %2817 = vtanh.f32 %v1872_v13  ;;  %v2501_v15 = vmul.f32 -1.442695, %v1872_v13 }
0x246f   :  { %v1869_v36 = vpop.f32.mrf.mxu1  ;;  %2819 = vpow2.f32 %v2500_v19 }
0x2470   :  { %2821 = vpow2.f32 %v2501_v15 }
0x2479   :  { %v2816_v35 = vpop.eup %2815 }
0x247a   :  { %1882 = vrot.lane.b32.xlu0 %v2816_v35, %s2950_s4 }
0x247b   :  { %v2818_v14 = vpop.eup %2817 }
0x247c   :  { %1906 = vrot.lane.b32.xlu1 %v2818_v14, %s2950_s4  ;;  %v2820_v60 = vpop.eup %2819 }
0x247d   :  { %v2822_v23 = vpop.eup %2821  ;;  %v1876_v46 = vadd.f32 1.0, %v2820_v60 }
0x247e   :  { %v1900_v40 = vadd.f32 1.0, %v2822_v23 }
0x247f   :  { %2823 = vrcp.f32 %v1876_v46 }
0x2480   :  { %2825 = vrcp.f32 %v1900_v40 }
0x248c   :  { %v2824_v29 = vpop.eup %2823 }
0x248d   :  { %v2826_v52 = vpop.eup %2825  ;;  %v1880_v55 = vmul.f32 %v2824_v29, %v1784_v18 }
0x248e   :  { %v1904_v50 = vmul.f32 %v2826_v52, %v1808_v26 }
0x24ec   :  { %v1883_v49 = vpop.permute.xlu0 %1882 }
0x24ed   :  { %v1885_v37 = vmul.f32 %v2824_v29, %v1883_v49 }
0x24ee   :  { %v1907_v53 = vpop.permute.xlu1 %1906 }
0x24ef   :  { %1887 = vrot.lane.b32.xlu0 %v1885_v37, %s2951_s20  ;;  %v1909_v54 = vmul.f32 %v2826_v52, %v1907_v53 }
0x24f1   :  { %1911 = vrot.lane.b32.xlu1 %v1909_v54, %s2951_s20 }
0x2561   :  { %v1888_v27 = vpop.permute.xlu0 %1887 }
0x2562   :  { %v1890_v58 = vadd.f32 %v1888_v27, %v1880_v55 }
0x2563   :  { %v1912_v59 = vpop.permute.xlu1 %1911 }
0x2564   :  { %2827 = vtanh.f32 %v1890_v58  ;;  %v1914_v56 = vadd.f32 %v1912_v59, %v1904_v50 }
0x2566   :  { %2829 = vtanh.f32 %v1914_v56 }
0x2571   :  { %v2828_v38 = vpop.eup %2827 }
0x2572   :  { %1893 = vrot.lane.b32.xlu0 %v2828_v38, %s2950_s4 }
0x2573   :  { %v2830_v61 = vpop.eup %2829 }
0x2574   :  { %1917 = vrot.lane.b32.xlu1 %v2830_v61, %s2950_s4 }
0x25e4   :  { %v1894_v24 = vpop.permute.xlu0 %1893 }
0x25e5   :  { %v1896_v63 = vmul.f32 %v2824_v29, %v1894_v24 }
0x25e6   :  { %v1918_v0 = vpop.permute.xlu1 %1917 }
0x25e7   :  { %1922 = vrot.lane.b32.xlu0 %v1896_v63, %s2951_s20  ;;  %v1920_v11 = vmul.f32 %v2826_v52, %v1918_v0 }
0x25e9   :  { %1927 = vrot.lane.b32.xlu1 %v1920_v11, %s2950_s4 }
0x2659   :  { %v1923_v3 = vpop.permute.xlu0 %1922 }
0x265a   :  { %1925 = vst.msk [vmem:[#allocation4 + $0x28] sm:$0xff] %vm81_vm0, %v1923_v3 }
0x265b   :  { %v1928_v12 = vpop.permute.xlu1 %1927 }
0x265c   :  { %1930 = vst.msk [vmem:[#allocation4 + $0x10] sm:$0xff] %vm353_vm2, %v1928_v12  ;;  %v1931_v5 = vsel %vm81_vm0, %v1923_v3, %v1928_v12 }
0x265d   :  { %v1932_v62 = vpack.c.bf16 %v1931_v5, %v1931_v5  ;;  %v2603_v5 = vld [vmem:[%s3731_s8 + $0x18] sm:$0xff]  }
0x265e   :  { %2524 = vmatprep.subr.bf16.mxu0 %v2603_v5 }
0x265f   :  { %2502 = vmatmul.mubr.msk.bf16.vlgmr.msra.gmra.mxu0 %vm397_vm3, %v1932_v62 }
0x2660   :  { %2525 = vmatpush3.bf16.msra.mxu0 %v2603_v5 }
0x271f   :  { %v1970_v43 = vpop.f32.mrf.mxu0 }
0x2720   :  { %v1977_v6 = vadd.f32 %v1970_v43, %v3467_v48 }
0x2721   :  { %v1972_v44 = vpop.f32.mrf.mxu0 }
0x2722   :  { %2831 = vtanh.f32 %v1977_v6  ;;  %v1978_v7 = vadd.f32 %v1972_v44, %v3448_v32  ;;  %v2503_v57 = vmul.f32 -1.442695, %v1977_v6  ;;  %v2604_v6 = vld [vmem:[%s3731_s8 + $0x10] sm:$0xff]   ;;  %v2605_v44 = vld [vmem:[%s3731_s8 + $0x8] sm:$0xff]  }
0x2723   :  { %v1974_v8 = vpop.f32.mrf.mxu0  ;;  %2526 = vmatprep.subr.bf16.mxu0 %v2604_v6 }
0x2724   :  { %2833 = vtanh.f32 %v1978_v7  ;;  %v2504_v17 = vmul.f32 -1.442695, %v1978_v7  ;;  %2527 = vmatpush3.bf16.msra.mxu0 %v2604_v6  ;;  %v2606_v7 = vld [vmem:[%s3731_s8] sm:$0xff]  }
0x2725   :  { %v1975_v9 = vpop.f32.mrf.mxu0  ;;  %2835 = vpow2.f32 %v2503_v57  ;;  %2528 = vmatprep.subr.bf16.mxu0 %v2605_v44 }
0x2726   :  { %2837 = vpow2.f32 %v2504_v17 }
0x2728   :  { %2529 = vmatpush3.bf16.msra.mxu0 %v2605_v44 }
0x2729   :  { %2530 = vmatprep.subr.bf16.mxu0 %v2606_v7 }
0x272c   :  { %2531 = vmatpush3.bf16.msra.mxu0 %v2606_v7 }
0x272f   :  { %v2832_v1 = vpop.eup %2831 }
0x2730   :  { %1988 = vrot.lane.b32.xlu0 %v2832_v1, %s2950_s4 }
0x2731   :  { %v2834_v16 = vpop.eup %2833 }
0x2732   :  { %2012 = vrot.lane.b32.xlu1 %v2834_v16, %s2950_s4  ;;  %v2836_v18 = vpop.eup %2835 }
0x2733   :  { %v2838_v21 = vpop.eup %2837  ;;  %v1982_v48 = vadd.f32 1.0, %v2836_v18  ;;  %v2145_v18 = vld [vmem:[#allocation4 + $0x10] sm:$0xff] }
0x2734   :  { %v2006_v10 = vadd.f32 1.0, %v2838_v21 }
0x2735   :  { %2839 = vrcp.f32 %v1982_v48 }
0x2736   :  { %2841 = vrcp.f32 %v2006_v10  ;;  %v2148_v10 = vld [vmem:[#allocation4 + $0x28] sm:$0xff] }
0x2742   :  { %v2840_v32 = vpop.eup %2839 }
0x2743   :  { %v2842_v30 = vpop.eup %2841  ;;  %v1986_v41 = vmul.f32 %v2840_v32, %v1890_v58 }
0x2744   :  { %v2010_v31 = vmul.f32 %v2842_v30, %v1914_v56 }
0x27a2   :  { %v1989_v26 = vpop.permute.xlu0 %1988 }
0x27a3   :  { %v1991_v39 = vmul.f32 %v2840_v32, %v1989_v26  ;;  %v2146_v26 = vld [vmem:[#allocation4 + $0x18] sm:$0xff] }
0x27a4   :  { %v2013_v4 = vpop.permute.xlu1 %2012 }
0x27a5   :  { %1993 = vrot.lane.b32.xlu0 %v1991_v39, %s2951_s20  ;;  %v2015_v33 = vmul.f32 %v2842_v30, %v2013_v4  ;;  %v2152_v39 = vpack.c.bf16 %v2146_v26, %v2145_v18 }
0x27a7   :  { %2017 = vrot.lane.b32.xlu1 %v2015_v33, %s2951_s20 }
0x2817   :  { %v1994_v28 = vpop.permute.xlu0 %1993 }
0x2818   :  { %v1996_v22 = vadd.f32 %v1994_v28, %v1986_v41 }
0x2819   :  { %v2018_v42 = vpop.permute.xlu1 %2017 }
0x281a   :  { %2843 = vtanh.f32 %v1996_v22  ;;  %v2020_v20 = vadd.f32 %v2018_v42, %v2010_v31 }
0x281c   :  { %2845 = vtanh.f32 %v2020_v20 }
0x2827   :  { %v2844_v45 = vpop.eup %2843 }
0x2828   :  { %1999 = vrot.lane.b32.xlu0 %v2844_v45, %s2950_s4 }
0x2829   :  { %v2846_v47 = vpop.eup %2845 }
0x282a   :  { %2023 = vrot.lane.b32.xlu1 %v2846_v47, %s2950_s4 }
0x289a   :  { %v2000_v34 = vpop.permute.xlu0 %1999 }
0x289b   :  { %v2002_v13 = vmul.f32 %v2840_v32, %v2000_v34 }
0x289c   :  { %v2024_v2 = vpop.permute.xlu1 %2023 }
0x289d   :  { %2028 = vrot.lane.b32.xlu0 %v2002_v13, %s2951_s20  ;;  %v2026_v36 = vmul.f32 %v2842_v30, %v2024_v2  ;;  %v2147_v30 = vld [vmem:[#allocation4 + $0x20] sm:$0xff] }
0x289e   :  { %v2153_v4 = vpack.c.bf16 %v2148_v10, %v2147_v30 }
0x289f   :  { %2033 = vrot.lane.b32.xlu1 %v2026_v36, %s2950_s4 }
0x290f   :  { %v2029_v35 = vpop.permute.xlu0 %2028 }
0x2910   :  { %2031 = vst.msk [vmem:[#allocation4 + $0x30] sm:$0xff] %vm81_vm0, %v2029_v35 }
0x2911   :  { %v2034_v14 = vpop.permute.xlu1 %2033 }
0x2912   :  { %2036 = vst.msk [vmem:[#allocation4 + $0x8] sm:$0xff] %vm353_vm2, %v2034_v14  ;;  %v2037_v19 = vsel %vm81_vm0, %v2029_v35, %v2034_v14 }
0x2913   :  { %v2038_v15 = vpack.c.bf16 %v2037_v19, %v2037_v19 }
0x2915   :  { %2505 = vmatmul.mubr.msk.bf16.vlgmr.msra.gmra.mxu1 %vm397_vm3, %v2038_v15 }
0x2917   :  { %v2149_v41 = vld [vmem:[#allocation4 + $0x30] sm:$0xff] }
0x2919   :  { %v2144_v48 = vld [vmem:[#allocation4 + $0x8] sm:$0xff] }
0x29d5   :  { %v2076_v60 = vpop.f32.mrf.mxu1 }
0x29d6   :  { %v2083_v23 = vadd.f32 %v2076_v60, %v3471_v51 }
0x29d7   :  { %v2078_v46 = vpop.f32.mrf.mxu1 }
0x29d8   :  { %2847 = vtanh.f32 %v2083_v23  ;;  %v2084_v40 = vadd.f32 %v2078_v46, %v3444_v25  ;;  %v2506_v53 = vmul.f32 -1.442695, %v2083_v23 }
0x29d9   :  { %v2080_v29 = vpop.f32.mrf.mxu1 }
0x29da   :  { %2849 = vtanh.f32 %v2084_v40  ;;  %v2507_v54 = vmul.f32 -1.442695, %v2084_v40 }
0x29db   :  { %v2081_v49 = vpop.f32.mrf.mxu1  ;;  %2851 = vpow2.f32 %v2506_v53 }
0x29dc   :  { %2853 = vpow2.f32 %v2507_v54 }
0x29e5   :  { %v2848_v37 = vpop.eup %2847 }
0x29e6   :  { %2094 = vrot.lane.b32.xlu1 %v2848_v37, %s2950_s4 }
0x29e7   :  { %v2850_v52 = vpop.eup %2849 }
0x29e8   :  { %2118 = vrot.lane.b32.xlu0 %v2850_v52, %s2950_s4  ;;  %v2852_v55 = vpop.eup %2851 }
0x29e9   :  { %v2854_v27 = vpop.eup %2853  ;;  %v2088_v51 = vadd.f32 1.0, %v2852_v55 }
0x29ea   :  { %v2112_v58 = vadd.f32 1.0, %v2854_v27 }
0x29eb   :  { %2855 = vrcp.f32 %v2088_v51 }
0x29ec   :  { %2857 = vrcp.f32 %v2112_v58 }
0x29f8   :  { %v2856_v25 = vpop.eup %2855 }
0x29f9   :  { %v2858_v56 = vpop.eup %2857  ;;  %v2092_v24 = vmul.f32 %v2856_v25, %v1996_v22  ;;  %v2265_v22 = vstv %s3732_s9  ;;  %s2955_s9 = smov 4  }
0x29fa   :  { %v2116_v11 = vmul.f32 %v2858_v56, %v2020_v20 }
0x2a58   :  { %v2095_v50 = vpop.permute.xlu1 %2094 }
0x2a59   :  { %v2097_v59 = vmul.f32 %v2856_v25, %v2095_v50 }
0x2a5a   :  { %v2119_v38 = vpop.permute.xlu0 %2118 }
0x2a5b   :  { %2099 = vrot.lane.b32.xlu1 %v2097_v59, %s2951_s20  ;;  %v2121_v61 = vmul.f32 %v2858_v56, %v2119_v38 }
0x2a5d   :  { %2123 = vrot.lane.b32.xlu0 %v2121_v61, %s2951_s20 }
0x2acd   :  { %v2100_v63 = vpop.permute.xlu1 %2099 }
0x2ace   :  { %v2102_v0 = vadd.f32 %v2100_v63, %v2092_v24 }
0x2acf   :  { %v2124_v3 = vpop.permute.xlu0 %2123 }
0x2ad0   :  { %2859 = vtanh.f32 %v2102_v0  ;;  %v2126_v12 = vadd.f32 %v2124_v3, %v2116_v11 }
0x2ad2   :  { %2861 = vtanh.f32 %v2126_v12 }
0x2add   :  { %v2860_v62 = vpop.eup %2859 }
0x2ade   :  { %2105 = vrot.lane.b32.xlu1 %v2860_v62, %s2950_s4 }
0x2adf   :  { %v2862_v43 = vpop.eup %2861 }
0x2ae0   :  { %2129 = vrot.lane.b32.xlu0 %v2862_v43, %s2950_s4 }
0x2b50   :  { %v2106_v8 = vpop.permute.xlu1 %2105 }
0x2b51   :  { %v2108_v9 = vmul.f32 %v2856_v25, %v2106_v8 }
0x2b52   :  { %v2130_v1 = vpop.permute.xlu0 %2129 }
0x2b53   :  { %2134 = vrot.lane.b32.xlu1 %v2108_v9, %s2951_s20  ;;  %v2132_v16 = vmul.f32 %v2858_v56, %v2130_v1  ;;  %s2952_s20 = smov 2  }
0x2b55   :  { %2139 = vrot.lane.b32.xlu0 %v2132_v16, %s2950_s4 }
0x2bc5   :  { %v2135_v57 = vpop.permute.xlu1 %2134 }
0x2bc6   :  { %2137 = vst.msk [vmem:[#allocation4 + $0x38] sm:$0xff] %vm81_vm0, %v2135_v57 }
0x2bc7   :  { %v2140_v17 = vpop.permute.xlu0 %2139 }
0x2bc8   :  { %2142 = vst.msk [vmem:[#allocation4] sm:$0xff] %vm353_vm2, %v2140_v17 }
0x2bcd   :  { %v2150_v33 = vld [vmem:[#allocation4 + $0x38] sm:$0xff] }
0x2bce   :  { %v2154_v28 = vpack.c.bf16 %v2150_v33, %v2149_v41 }
0x2bcf   :  { %v2143_v21 = vld [vmem:[#allocation4] sm:$0xff] }
0x2bd0   :  { %v2151_v32 = vpack.c.bf16 %v2144_v48, %v2143_v21 }
0x2bd2   :  { %2532 = vmatprep.mubr.msk.bf16.mxu0 %vm397_vm3, %v2151_v32  ;;  %v2368_v32 = vstv %s3733_s10 }
0x2bd3   :  { %2533 = vmatmul.mubr.msk.bf16.vlgmr.msra.gmra.mxu0 %vm397_vm3, %v2152_v39 }
0x2bd4   :  { %2536 = vmatprep.mubr.msk.bf16.mxu0 %vm397_vm3, %v2153_v4 }
0x2bdb   :  { %2537 = vmatmul.mubr.msk.bf16.gmra.mxu0 %vm397_vm3, %v2154_v28 }
0x2c93   :  { %v2534_v31 = vpop.f32.mrf.mxu0 }
0x2c94   :  { %v2268_v42 = vadd.f32 %v2534_v31, %v2265_v22 }
0x2c95   :  { %v2233_v20 = vpop.f32.mrf.mxu0 }
0x2c96   :  { %v2266_v45 = vadd.f32 %v2265_v22, %v2233_v20  ;;  %2279 = vrot.lane.b32.xlu1 %v2268_v42, %s2952_s20 }
0x2c97   :  { %v2535_v47 = vpop.f32.mrf.mxu0 }
0x2c98   :  { %v2269_v34 = vadd.f32 %v2535_v47, %v2265_v22 }
0x2c99   :  { %v3685_v13 = vpop.f32.mrf.mxu0 }
0x2c9a   :  { %2283 = vrot.lane.b32.xlu0 %v2269_v34, %s2953_s29  ;;  %v2267_v36 = vadd.f32 %v2265_v22, %v3685_v13 }
0x2c9b   :  { %v2538_v2 = vpop.f32.mrf.mxu0 }
0x2c9c   :  { %v2272_v60 = vadd.f32 %v2538_v2, %v2265_v22 }
0x2c9d   :  { %v2249_v35 = vpop.f32.mrf.mxu0 }
0x2c9e   :  { %v2270_v14 = vadd.f32 %v2265_v22, %v2249_v35  ;;  %2275 = vrot.lane.b32.xlu0 %v2267_v36, %s2954_s2 }
0x2c9f   :  { %v2539_v19 = vpop.f32.mrf.mxu0 }
0x2ca0   :  { %2287 = vrot.lane.b32.xlu1 %v2270_v14, %s2955_s9  ;;  %v2273_v46 = vadd.f32 %v2539_v19, %v2265_v22 }
0x2ca1   :  { %v2252_v15 = vpop.f32.mrf.mxu0 }
0x2ca2   :  { %v2271_v23 = vadd.f32 %v2265_v22, %v2252_v15 }
0x2ca4   :  { %2295 = vrot.lane.b32.xlu1 %v2272_v60, %s2956_s19  ;;  %2291 = vrot.lane.b32.xlu0 %v2271_v23, %s2957_s6 }
0x2ca8   :  { %2299 = vrot.lane.b32.xlu0 %v2273_v46, %s2958_s23 }
0x2cac   :  { %2317 = vrot.lane.b32.xlu0 %v2233_v20, %s2959_s16 }
0x2cb0   :  { %2329 = vrot.lane.b32.xlu0 %v2249_v35, %s2953_s29 }
0x2d08   :  { %v2280_v29 = vpop.permute.xlu1 %2279 }
0x2d0c   :  { %v2284_v40 = vpop.permute.xlu0 %2283 }
0x2d10   :  { %v2276_v49 = vpop.permute.xlu0 %2275 }
0x2d11   :  { %v2303_v37 = vsel %vm2302_vm4, %v2266_v45, %v2276_v49 }
0x2d12   :  { %v2305_v52 = vsel %vm2304_vm5, %v2303_v37, %v2280_v29  ;;  %v2288_v53 = vpop.permute.xlu1 %2287 }
0x2d13   :  { %v2307_v54 = vsel %vm2306_vm6, %v2305_v52, %v2284_v40 }
0x2d14   :  { %v2309_v55 = vsel %vm2308_vm7, %v2307_v54, %v2288_v53 }
0x2d16   :  { %v2292_v27 = vpop.permute.xlu0 %2291  ;;  %v2296_v51 = vpop.permute.xlu1 %2295 }
0x2d17   :  { %v2311_v58 = vsel %vm2310_vm8, %v2309_v55, %v2292_v27 }
0x2d18   :  { %v2313_v25 = vsel %vm2312_vm9, %v2311_v58, %v2296_v51 }
0x2d1a   :  { %v2300_v50 = vpop.permute.xlu0 %2299 }
0x2d1b   :  { %v2315_v59 = vsel %vm2314_vm10, %v2313_v25, %v2300_v50 }
0x2d1c   :  { %v2352_v56 = vsel %vm2351_vm11, %v2315_v59, -inf }
0x2d1d   :  { %2353 = vmax.xlane.f32.xlu1 %v2352_v56 }
0x2d1e   :  { %v2318_v11 = vpop.permute.xlu0 %2317 }
0x2d1f   :  { %v2344_v43 = vsel %vm2302_vm4, %v2318_v11, %v3685_v13 }
0x2d22   :  { %v2330_v3 = vpop.permute.xlu0 %2329 }
0x2d2e   :  { %2321 = vrot.lane.b32.xlu1 %v2534_v31, %s2954_s2 }
0x2d32   :  { %2325 = vrot.lane.b32.xlu1 %v2535_v47, %s2952_s20 }
0x2d36   :  { %2333 = vrot.lane.b32.xlu1 %v2252_v15, %s2955_s9 }
0x2d3a   :  { %2341 = vrot.lane.b32.xlu1 %v2539_v19, %s2956_s19 }
0x2da6   :  { %v2354_v38 = vpop.xlane.xlu1 %2353 }
0x2da7   :  { %v2355_v61 = vsub.f32 %v2315_v59, %v2354_v38 }
0x2da9   :  { %v2356_v24 = vmul.f32 1.442695, %v2355_v61 }
0x2daa   :  { %v2322_v12 = vpop.permute.xlu1 %2321 }
0x2dab   :  { %2863 = vpow2.f32 %v2356_v24  ;;  %v2345_v6 = vsel %vm2304_vm5, %v2344_v43, %v2322_v12 }
0x2dae   :  { %v2326_v62 = vpop.permute.xlu1 %2325 }
0x2daf   :  { %v2346_v44 = vsel %vm2306_vm6, %v2345_v6, %v2326_v62 }
0x2db0   :  { %v2347_v9 = vsel %vm2308_vm7, %v2346_v44, %v2330_v3 }
0x2db2   :  { %v2334_v7 = vpop.permute.xlu1 %2333 }
0x2db3   :  { %v2348_v1 = vsel %vm2310_vm8, %v2347_v9, %v2334_v7 }
0x2db6   :  { %v2342_v17 = vpop.permute.xlu1 %2341 }
0x2db8   :  { %v2864_v63 = vpop.eup %2863 }
0x2db9   :  { %v2358_v0 = vsel %vm2351_vm11, %v2864_v63, 0.0 }
0x2dba   :  { %2359 = vadd.xlane.f32.xlu0 %v2358_v0 }
0x2dd0   :  { %2337 = vrot.lane.b32.xlu0 %v2538_v2, %s2957_s6 }
0x2e43   :  { %v2360_v5 = vpop.xlane.xlu0 %2359 }
0x2e44   :  { %2865 = vrcp.f32 %v2360_v5 }
0x2e47   :  { %v2338_v8 = vpop.permute.xlu0 %2337 }
0x2e48   :  { %v2349_v16 = vsel %vm2312_vm9, %v2348_v1, %v2338_v8 }
0x2e49   :  { %v2350_v21 = vsel %vm2314_vm10, %v2349_v16, %v2342_v17 }
0x2e51   :  { %v2866_v57 = vpop.eup %2865 }
0x2e52   :  { %v2362_v18 = vmul.f32 %v2866_v57, %v2864_v63 }
0x2e54   :  { %2371 = vrot.lane.b32.xlu1 %v2362_v18, %s2954_s2  ;;  %v2363_v48 = vmul.f32 %v2362_v18, %v2350_v21 }
0x2e56   :  { %v2364_v10 = vsel %vm2351_vm11, %v2363_v48, 0.0 }
0x2e57   :  { %2365 = vadd.xlane.f32.xlu0 %v2364_v10 }
0x2ec6   :  { %v2372_v30 = vpop.permute.xlu1 %2371 }
0x2ee0   :  { %v2366_v26 = vpop.xlane.xlu0 %2365 }
0x2ee1   :  { %v2369_v39 = vadd.f32 %v2368_v32, %v2366_v26 }
0x2ee3   :  { %v2374_v4 = vsel %vm2302_vm4, %v2369_v39, %v2372_v30 }
0x2ee4   :  { %v2376_v33 = vsel %vm2375_vm12, %v2374_v4, 0.0 }
0x2ee5   :  { %2377 = vst [vmem:[#allocation14] sm:$0xff] %v2376_v33 }
0x2ee6   :  { %2926 = shalt.err (!%p2923_p0)
}
0x2ee7   :  { %2387 = dma.vmem_to_hbm [thread:$0]  %s2385_s18, 128, %s3734_s11, [#allocation9]  }
0x2ee8   :  { %2941 = dma.done.wait [#allocation9], 128  }
0x2ee9   :  { %2942 = vsyncadd [#allocation9], 4294967168 }
0x2eea   :  { %2391 = vsyncpa [#allocation8], 1 }
0x2eeb   :  { %2392 = vsyncpa [#allocation13], 1 }
0x2eec   :  { %2393 = vsyncpa [#allocation9], 1 }
0x2eed   :  { %2394 = vsyncpa [#allocation10], 1 }

</bundles_post_ra>
